<compile_context>
chip_gen: v6e
topology: v6e:2x2x1
jax: 0.10.0
libtpu: 0.0.40
codegen_flags: <defaults>
</compile_context>

<pallas_src>
import math
import functools

import jax
import jax.numpy as jnp
from jax import lax
from jax.experimental import pallas as pl
from jax.experimental.pallas import tpu as pltpu


_MM_DTYPE = jnp.bfloat16      # MXU operand dtype (f32 accumulation). jnp.float32 => exact f32.
_LN_EPS = 1e-5
_BN_EPS = 1e-5
_NEG_INF = -1e30
_NT_DIMS = (((1,), (1,)), ((), ()))   # a @ b.T, contracting last dims (no explicit .T)


# ---------------------------------------------------------------------------
# small in-kernel helpers
# ---------------------------------------------------------------------------

def _mm(a, b):
    return jnp.dot(a.astype(_MM_DTYPE), b.astype(_MM_DTYPE),
                   preferred_element_type=jnp.float32)


def _mm_nt(a, b):
    return lax.dot_general(a.astype(_MM_DTYPE), b.astype(_MM_DTYPE), _NT_DIMS,
                           preferred_element_type=jnp.float32)


def _layernorm(x, g, b, eps):
    mean = jnp.mean(x, axis=-1, keepdims=True)
    var = jnp.mean((x - mean) ** 2, axis=-1, keepdims=True)
    return (x - mean) * lax.rsqrt(var + eps) * g + b


# ---------------------------------------------------------------------------
# fused backbone kernel: input projection + all encoder layers
# ---------------------------------------------------------------------------

def _backbone_kernel(x_ref, maskb_ref,
                     wp_ref, bp_ref,
                     wq_ref, bq_ref, wk_ref, bk_ref, wv_ref, bv_ref,
                     wo_ref, bo_ref,
                     ln1g_ref, ln1b_ref, ln2g_ref, ln2b_ref,
                     ff1w_ref, ff1b_ref, ff2w_ref, ff2b_ref,
                     o_ref, *, num_layers, nheads, scale):
    maskb = maskb_ref[...]                                     # (TS, TS) additive mask

    # input projection: rows are (n, s) pairs, purely row-wise
    h = _mm(x_ref[...], wp_ref[...]) + bp_ref[...]             # (TS, E) f32

    for l in range(num_layers):
        # ----- multi-head self-attention (post-norm encoder layer, eval mode) -----
        att = jnp.zeros(h.shape, jnp.float32)
        for hh in range(nheads):
            q = _mm(h, wq_ref[l, hh, :, :]) + bq_ref[l, hh, :, :]      # (TS, hd)
            k = _mm(h, wk_ref[l, hh, :, :]) + bk_ref[l, hh, :, :]
            v = _mm(h, wv_ref[l, hh, :, :]) + bv_ref[l, hh, :, :]
            s = _mm_nt(q, k) * scale + maskb                           # (TS, TS)
            s = s - jnp.max(s, axis=-1, keepdims=True)
            p = jnp.exp(s)
            p = p * pl.reciprocal(jnp.sum(p, axis=-1, keepdims=True), approx=True)
            o_h = _mm(p, v)                                            # (TS, hd)
            att = att + _mm(o_h, wo_ref[l, hh, :, :])                  # (TS, E)
        att = att + bo_ref[l, :, :]
        # dropout = identity (eval mode)
        h1 = _layernorm(h + att, ln1g_ref[l, :, :], ln1b_ref[l, :, :], _LN_EPS)

        # ----- feed-forward (dim_feedforward = nh) -----
        ff = jnp.maximum(_mm(h1, ff1w_ref[l, :, :]) + ff1b_ref[l, :, :], 0.0)
        ff = _mm(ff, ff2w_ref[l, :, :]) + ff2b_ref[l, :, :]
        h = _layernorm(h1 + ff, ln2g_ref[l, :, :], ln2b_ref[l, :, :], _LN_EPS)

    o_ref[...] = h.astype(o_ref.dtype)


def _backbone_call(x2d, maskb, pk, *, num_layers, nheads, tile_rows):
    R, C = x2d.shape
    E = pk["bp"].shape[-1]
    hd = E // nheads
    NL = num_layers
    TS = tile_rows
    grid = (R // TS,)

    p2 = lambda i: (0, 0)
    p3 = lambda i: (0, 0, 0)
    p4 = lambda i: (0, 0, 0, 0)

    in_specs = [
        pl.BlockSpec((TS, C), lambda i: (i, 0)),        # x rows (streamed)
        pl.BlockSpec((TS, TS), p2),                     # block-diagonal additive mask
        pl.BlockSpec((C, E), p2),                       # input proj W
        pl.BlockSpec((1, E), p2),                       # input proj b
        pl.BlockSpec((NL, nheads, E, hd), p4),          # Wq (per head)
        pl.BlockSpec((NL, nheads, 1, hd), p4),          # bq
        pl.BlockSpec((NL, nheads, E, hd), p4),          # Wk
        pl.BlockSpec((NL, nheads, 1, hd), p4),          # bk
        pl.BlockSpec((NL, nheads, E, hd), p4),          # Wv
        pl.BlockSpec((NL, nheads, 1, hd), p4),          # bv
        pl.BlockSpec((NL, nheads, hd, E), p4),          # Wo (per head rows)
        pl.BlockSpec((NL, 1, E), p3),                   # bo
        pl.BlockSpec((NL, 1, E), p3),                   # ln1 gamma
        pl.BlockSpec((NL, 1, E), p3),                   # ln1 beta
        pl.BlockSpec((NL, 1, E), p3),                   # ln2 gamma
        pl.BlockSpec((NL, 1, E), p3),                   # ln2 beta
        pl.BlockSpec((NL, E, E), p3),                   # ff1 W
        pl.BlockSpec((NL, 1, E), p3),                   # ff1 b
        pl.BlockSpec((NL, E, E), p3),                   # ff2 W
        pl.BlockSpec((NL, 1, E), p3),                   # ff2 b
    ]

    # advisory cost estimate for the XLA scheduler
    flops = int(R * (2 * C * E + NL * (12 * E * E + 4 * E * TS)))
    transc = int(R * NL * nheads * TS)
    weight_bytes = sum(int(v.size) * v.dtype.itemsize for k, v in pk.items()
                       if not k.startswith("head"))
    bytes_accessed = int(x2d.size * 4 + R * E * 4 + weight_bytes)
    cost = pl.CostEstimate(flops=flops, transcendentals=transc,
                           bytes_accessed=bytes_accessed)

    kernel = functools.partial(_backbone_kernel, num_layers=NL, nheads=nheads,
                               scale=1.0 / math.sqrt(hd))
    return pl.pallas_call(
        kernel,
        out_shape=jax.ShapeDtypeStruct((R, E), jnp.float32),
        grid=grid,
        in_specs=in_specs,
        out_specs=pl.BlockSpec((TS, E), lambda i: (i, 0)),
        compiler_params=pltpu.CompilerParams(dimension_semantics=("parallel",)),
        cost_estimate=cost,
    )(x2d, maskb, pk["wp"], pk["bp"],
      pk["wq"], pk["bq"], pk["wk"], pk["bk"], pk["wv"], pk["bv"],
      pk["wo"], pk["bo"], pk["ln1g"], pk["ln1b"], pk["ln2g"], pk["ln2b"],
      pk["ff1w"], pk["ff1b"], pk["ff2w"], pk["ff2b"])


# ---------------------------------------------------------------------------
# head kernel: AdaptiveConcatPool1d + BatchNorm1d(eval) + Linear
# ---------------------------------------------------------------------------

def _head_kernel(x_ref, wmax_ref, wavg_ref, b_ref, o_ref):
    x = x_ref[...]                             # (L, B, E)
    mx = jnp.max(x, axis=0)                    # AdaptiveMaxPool1d(1) over L -> (B, E)
    av = jnp.mean(x, axis=0)                   # AdaptiveAvgPool1d(1) over L -> (B, E)
    # TODO(synk): BatchNorm1d(2*nh) uses default running stats (mean=0, var=1,
    # affine=identity), i.e. a freshly-initialized model; trained stats would be
    # extra inputs here.
    bn_scale = (1.0 + _BN_EPS) ** -0.5
    y = jnp.dot(mx * bn_scale, wmax_ref[...], preferred_element_type=jnp.float32)
    y = y + jnp.dot(av * bn_scale, wavg_ref[...], preferred_element_type=jnp.float32)
    o_ref[...] = (y + b_ref[...]).astype(o_ref.dtype)


def _head_call(y, w_max, w_avg, b):
    Ldim, Bdim, E = y.shape
    nc = w_max.shape[1]
    return pl.pallas_call(
        _head_kernel,
        out_shape=jax.ShapeDtypeStruct((Bdim, nc), jnp.float32),
        grid=(1,),
        in_specs=[
            pl.BlockSpec((Ldim, Bdim, E), lambda i: (0, 0, 0)),
            pl.BlockSpec((E, nc), lambda i: (0, 0)),
            pl.BlockSpec((E, nc), lambda i: (0, 0)),
            pl.BlockSpec((1, nc), lambda i: (0, 0)),
        ],
        out_specs=pl.BlockSpec((Bdim, nc), lambda i: (0, 0)),
        compiler_params=pltpu.CompilerParams(dimension_semantics=("arbitrary",)),
    )(y, w_max, w_avg, b)


# ---------------------------------------------------------------------------
# parameter packing (PyTorch-style layout -> kernel layout, done once host-side)
# ---------------------------------------------------------------------------

def _pack_params(params, *, E, H):
    hd = E // H
    layers = params["layers"]
    NL = len(layers)

    def stack(name):
        return jnp.stack([lp[name] for lp in layers])

    in_w = stack("in_proj_w")                              # (NL, E, 3E)
    in_b = stack("in_proj_b")                              # (NL, 3E)

    def split_w(part):                                     # q/k/v weight, per-head
        w = in_w[:, :, part * E:(part + 1) * E]            # (NL, E, E)
        return w.reshape(NL, E, H, hd).transpose(0, 2, 1, 3).astype(_MM_DTYPE)

    def split_b(part):
        return in_b[:, part * E:(part + 1) * E].reshape(NL, H, 1, hd).astype(jnp.float32)

    return {
        "wp": params["proj_w"].astype(_MM_DTYPE),
        "bp": params["proj_b"].reshape(1, E).astype(jnp.float32),
        "wq": split_w(0), "wk": split_w(1), "wv": split_w(2),
        "bq": split_b(0), "bk": split_b(1), "bv": split_b(2),
        "wo": stack("out_w").reshape(NL, H, hd, E).astype(_MM_DTYPE),
        "bo": stack("out_b").reshape(NL, 1, E).astype(jnp.float32),
        "ln1g": stack("ln1_g").reshape(NL, 1, E),
        "ln1b": stack("ln1_b").reshape(NL, 1, E),
        "ln2g": stack("ln2_g").reshape(NL, 1, E),
        "ln2b": stack("ln2_b").reshape(NL, 1, E),
        "ff1w": stack("ff1_w").astype(_MM_DTYPE),
        "ff1b": stack("ff1_b").reshape(NL, 1, E).astype(jnp.float32),
        "ff2w": stack("ff2_w").astype(_MM_DTYPE),
        "ff2b": stack("ff2_b").reshape(NL, 1, E).astype(jnp.float32),
        "head_w_max": params["head_w"][:E],                # concat order: [max ; avg]
        "head_w_avg": params["head_w"][E:],
        "head_b": params["head_b"].reshape(1, -1),
    }


def _choose_tiles(N, S, max_rows=2048):
    """Pick TN | N so the row block TN*S is (8,·)-tileable and bounded; prefer
    >= 2 grid steps so v7x can shard the parallel axis over its 2 TensorCores."""
    divisors = [d for d in range(1, N + 1) if N % d == 0]
    good = [d for d in divisors if (d * S) % 8 == 0 and d * S <= max_rows]
    multi = [d for d in good if d < N]
    if multi:
        tn = max(multi)
    elif good:
        tn = max(good)
    else:
        tn = N                          # full-array block is always legal
    return tn * S


# ---------------------------------------------------------------------------
# full model forward
# ---------------------------------------------------------------------------

def transformer_model_forward(x, params, *, nh, nheads):
    """x: (B, C, L) -> logits (B, num_classes)."""
    B, C, L = x.shape
    E = nh
    S, N = B, L                                   # attention sequence = B, batch = L
    NL = len(params["layers"])
    pk = _pack_params(params, E=E, H=nheads)

    TS = _choose_tiles(N, S)

    # n-major 2-D activation slab: row = l*B + b  (one-time tiny layout transpose)
    x2d = x.transpose(2, 0, 1).reshape(N * S, C)

    # additive mask: rows attend iff they share the same n (= same l)
    grp = jnp.arange(TS, dtype=jnp.int32) // S
    maskb = jnp.where(grp[:, None] == grp[None, :], 0.0, _NEG_INF).astype(jnp.float32)

    y2d = _backbone_call(x2d, maskb, pk, num_layers=NL, nheads=nheads, tile_rows=TS)

    y = y2d.reshape(N, S, E)                      # (L, B, E): pool over L in the head
    return _head_call(y, pk["head_w_max"], pk["head_w_avg"], pk["head_b"])


# ---------------------------------------------------------------------------
# deterministic synthetic parameters (shapes from the module __init__)
# ---------------------------------------------------------------------------

def init_params(key, C, nh, nheads, nlayers, depth, num_classes):
    def nrm(k, shape, scale=0.05):
        return scale * jax.random.normal(k, shape, dtype=jnp.float32)

    keys = jax.random.split(key, 4 + depth * nlayers)
    params = {
        "proj_w": nrm(keys[0], (C, nh)),
        "proj_b": nrm(keys[1], (nh,)),
        "head_w": nrm(keys[2], (2 * nh, num_classes)),
        "head_b": nrm(keys[3], (num_classes,)),
        "layers": [],
    }
    for li in range(depth * nlayers):
        ks = jax.random.split(keys[4 + li], 8)
        params["layers"].append({
            "in_proj_w": nrm(ks[0], (nh, 3 * nh)),
            "in_proj_b": nrm(ks[1], (3 * nh,)),
            "out_w": nrm(ks[2], (nh, nh)),
            "out_b": nrm(ks[3], (nh,)),
            "ff1_w": nrm(ks[4], (nh, nh)),     # dim_feedforward = nh
            "ff1_b": nrm(ks[5], (nh,)),
            "ff2_w": nrm(ks[6], (nh, nh)),
            "ff2_b": nrm(ks[7], (nh,)),
            "ln1_g": jnp.ones((nh,), jnp.float32),
            "ln1_b": jnp.zeros((nh,), jnp.float32),
            "ln2_g": jnp.ones((nh,), jnp.float32),
            "ln2_b": jnp.zeros((nh,), jnp.float32),
        })
    return params


# ---------------------------------------------------------------------------

if __name__ == "__main__":
    # Small shapes consistent with the module: x is (B, input_channels, seq_len)
    B, C, L = 2, 4, 16
    nh, nheads, nlayers, depth, num_classes = 32, 4, 1, 2, 5

    key = jax.random.PRNGKey(0)
    kx, kp = jax.random.split(key)
    x = jax.random.normal(kx, (B, C, L), dtype=jnp.float32)
    params = init_params(kp, C, nh, nheads, nlayers, depth, num_classes)

    fwd = jax.jit(functools.partial(transformer_model_forward, nh=nh, nheads=nheads))
    out = fwd(x, params)
    out = jax.block_until_ready(out)

    assert out.shape == (B, num_classes)
    assert bool(jnp.all(jnp.isfinite(out)))
    print("KERNEL_OK")
</pallas_src>

<mosaic_0001>
module attributes {stable_mosaic.version = 11 : i64} {
  func.func @_head_kernel(%arg0: i32, %arg1: memref<16x2x32xf32, #tpu.memory_space<vmem>>, %arg2: memref<32x5xf32, #tpu.memory_space<vmem>>, %arg3: memref<32x5xf32, #tpu.memory_space<vmem>>, %arg4: memref<1x5xf32, #tpu.memory_space<vmem>>, %arg5: memref<2x5xf32, #tpu.memory_space<vmem>>) attributes {dimension_semantics = [#tpu.dimension_semantics<arbitrary>], iteration_bounds = array<i64: 1>, scalar_prefetch = 0 : i64, scratch_operands = 0 : i64, tpu.core_type = #tpu.core_type<tc>, window_params = [{pipeline_mode = #tpu.pipeline_mode<synchronous>, transform_indices = @transform_0, window_bounds = array<i64: 16, 2, 32>}, {pipeline_mode = #tpu.pipeline_mode<synchronous>, transform_indices = @transform_1, window_bounds = array<i64: 32, 5>}, {pipeline_mode = #tpu.pipeline_mode<synchronous>, transform_indices = @transform_2, window_bounds = array<i64: 32, 5>}, {pipeline_mode = #tpu.pipeline_mode<synchronous>, transform_indices = @transform_3, window_bounds = array<i64: 1, 5>}, {pipeline_mode = #tpu.pipeline_mode<synchronous>, transform_indices = @transform_4, window_bounds = array<i64: 2, 5>}]} {
    %c0 = arith.constant 0 : index
    %c0_0 = arith.constant 0 : index
    %c0_1 = arith.constant 0 : index
    %0 = vector.load %arg1[%c0, %c0_0, %c0_1] : memref<16x2x32xf32, #tpu.memory_space<vmem>>, vector<16x2x32xf32>
    %cst = arith.constant dense<0xFF800000> : vector<2x32xf32>
    %1 = vector.multi_reduction <maximumf>, %0, %cst [0] : vector<16x2x32xf32> to vector<2x32xf32>
    %cst_2 = arith.constant dense<0.000000e+00> : vector<2x32xf32>
    %2 = vector.multi_reduction <add>, %0, %cst_2 [0] : vector<16x2x32xf32> to vector<2x32xf32>
    %cst_3 = arith.constant 1.600000e+01 : f32
    %3 = vector.broadcast %cst_3 : f32 to vector<2x32xf32>
    %4 = arith.divf %2, %3 : vector<2x32xf32>
    %cst_4 = arith.constant 0.999994993 : f32
    %5 = vector.broadcast %cst_4 : f32 to vector<2x32xf32>
    %6 = arith.mulf %1, %5 : vector<2x32xf32>
    %c0_5 = arith.constant 0 : index
    %c0_6 = arith.constant 0 : index
    %7 = vector.load %arg2[%c0_5, %c0_6] : memref<32x5xf32, #tpu.memory_space<vmem>>, vector<32x5xf32>
    %cst_7 = arith.constant dense<0.000000e+00> : vector<2x5xf32>
    %8 = tpu.matmul %6, %7, %cst_7 {dimension_numbers = #tpu.dot_dimension_numbers<[1], [0], [0], [1], [0, 0, 1, 1], [], []>} : vector<2x32xf32>, vector<32x5xf32>, vector<2x5xf32> -> vector<2x5xf32>
    %cst_8 = arith.constant 0.999994993 : f32
    %9 = vector.broadcast %cst_8 : f32 to vector<2x32xf32>
    %10 = arith.mulf %4, %9 : vector<2x32xf32>
    %c0_9 = arith.constant 0 : index
    %c0_10 = arith.constant 0 : index
    %11 = vector.load %arg3[%c0_9, %c0_10] : memref<32x5xf32, #tpu.memory_space<vmem>>, vector<32x5xf32>
    %cst_11 = arith.constant dense<0.000000e+00> : vector<2x5xf32>
    %12 = tpu.matmul %10, %11, %cst_11 {dimension_numbers = #tpu.dot_dimension_numbers<[1], [0], [0], [1], [0, 0, 1, 1], [], []>} : vector<2x32xf32>, vector<32x5xf32>, vector<2x5xf32> -> vector<2x5xf32>
    %13 = arith.addf %8, %12 : vector<2x5xf32>
    %c0_12 = arith.constant 0 : index
    %c0_13 = arith.constant 0 : index
    %14 = vector.load %arg4[%c0_12, %c0_13] : memref<1x5xf32, #tpu.memory_space<vmem>>, vector<1x5xf32>
    %15 = vector.broadcast %14 : vector<1x5xf32> to vector<2x5xf32>
    %16 = arith.addf %13, %15 : vector<2x5xf32>
    %c0_14 = arith.constant 0 : index
    %c0_15 = arith.constant 0 : index
    %17 = vector.load %arg5[%c0_14, %c0_15] : memref<2x5xf32, #tpu.memory_space<vmem>>, vector<2x5xf32>
    tpu.vector_store %arg5[%c0_14, %c0_15], %16 {strides = array<i32>} : memref<2x5xf32, #tpu.memory_space<vmem>>, vector<2x5xf32>,
    return
  }
  func.func @transform_0(%arg0: i32) -> (i32, i32, i32) {
    %c0_i32 = arith.constant 0 : i32
    %c0_i32_0 = arith.constant 0 : i32
    %c0_i32_1 = arith.constant 0 : i32
    %c0_i32_2 = arith.constant 0 : i32
    return %c0_i32, %c0_i32_0, %c0_i32_1 : i32, i32, i32
  }
  func.func @transform_1(%arg0: i32) -> (i32, i32) {
    %c0_i32 = arith.constant 0 : i32
    %c0_i32_0 = arith.constant 0 : i32
    %c0_i32_1 = arith.constant 0 : i32
    return %c0_i32, %c0_i32_0 : i32, i32
  }
  func.func @transform_2(%arg0: i32) -> (i32, i32) {
    %c0_i32 = arith.constant 0 : i32
    %c0_i32_0 = arith.constant 0 : i32
    %c0_i32_1 = arith.constant 0 : i32
    return %c0_i32, %c0_i32_0 : i32, i32
  }
  func.func @transform_3(%arg0: i32) -> (i32, i32) {
    %c0_i32 = arith.constant 0 : i32
    %c0_i32_0 = arith.constant 0 : i32
    %c0_i32_1 = arith.constant 0 : i32
    return %c0_i32, %c0_i32_0 : i32, i32
  }
  func.func @transform_4(%arg0: i32) -> (i32, i32) {
    %c0_i32 = arith.constant 0 : i32
    %c0_i32_0 = arith.constant 0 : i32
    %c0_i32_1 = arith.constant 0 : i32
    return %c0_i32, %c0_i32_0 : i32, i32
  }
}

module attributes {stable_mosaic.version = 11 : i64} {
  func.func @_backbone_kernel(%arg0: i32, %arg1: memref<16x4xf32, #tpu.memory_space<vmem>>, %arg2: memref<16x16xf32, #tpu.memory_space<vmem>>, %arg3: memref<4x32xbf16, #tpu.memory_space<vmem>>, %arg4: memref<1x32xf32, #tpu.memory_space<vmem>>, %arg5: memref<2x4x32x8xbf16, #tpu.memory_space<vmem>>, %arg6: memref<2x4x1x8xf32, #tpu.memory_space<vmem>>, %arg7: memref<2x4x32x8xbf16, #tpu.memory_space<vmem>>, %arg8: memref<2x4x1x8xf32, #tpu.memory_space<vmem>>, %arg9: memref<2x4x32x8xbf16, #tpu.memory_space<vmem>>, %arg10: memref<2x4x1x8xf32, #tpu.memory_space<vmem>>, %arg11: memref<2x4x8x32xbf16, #tpu.memory_space<vmem>>, %arg12: memref<2x1x32xf32, #tpu.memory_space<vmem>>, %arg13: memref<2x1x32xf32, #tpu.memory_space<vmem>>, %arg14: memref<2x1x32xf32, #tpu.memory_space<vmem>>, %arg15: memref<2x1x32xf32, #tpu.memory_space<vmem>>, %arg16: memref<2x1x32xf32, #tpu.memory_space<vmem>>, %arg17: memref<2x32x32xbf16, #tpu.memory_space<vmem>>, %arg18: memref<2x1x32xf32, #tpu.memory_space<vmem>>, %arg19: memref<2x32x32xbf16, #tpu.memory_space<vmem>>, %arg20: memref<2x1x32xf32, #tpu.memory_space<vmem>>, %arg21: memref<16x32xf32, #tpu.memory_space<vmem>>) attributes {dimension_semantics = [#tpu.dimension_semantics<parallel>], iteration_bounds = array<i64: 2>, scalar_prefetch = 0 : i64, scratch_operands = 0 : i64, tpu.core_type = #tpu.core_type<tc>, window_params = [{transform_indices = @transform_0, window_bounds = array<i64: 16, 4>}, {pipeline_mode = #tpu.pipeline_mode<synchronous>, transform_indices = @transform_1, window_bounds = array<i64: 16, 16>}, {pipeline_mode = #tpu.pipeline_mode<synchronous>, transform_indices = @transform_2, window_bounds = array<i64: 4, 32>}, {pipeline_mode = #tpu.pipeline_mode<synchronous>, transform_indices = @transform_3, window_bounds = array<i64: 1, 32>}, {pipeline_mode = #tpu.pipeline_mode<synchronous>, transform_indices = @transform_4, window_bounds = array<i64: 2, 4, 32, 8>}, {pipeline_mode = #tpu.pipeline_mode<synchronous>, transform_indices = @transform_5, window_bounds = array<i64: 2, 4, 1, 8>}, {pipeline_mode = #tpu.pipeline_mode<synchronous>, transform_indices = @transform_6, window_bounds = array<i64: 2, 4, 32, 8>}, {pipeline_mode = #tpu.pipeline_mode<synchronous>, transform_indices = @transform_7, window_bounds = array<i64: 2, 4, 1, 8>}, {pipeline_mode = #tpu.pipeline_mode<synchronous>, transform_indices = @transform_8, window_bounds = array<i64: 2, 4, 32, 8>}, {pipeline_mode = #tpu.pipeline_mode<synchronous>, transform_indices = @transform_9, window_bounds = array<i64: 2, 4, 1, 8>}, {pipeline_mode = #tpu.pipeline_mode<synchronous>, transform_indices = @transform_10, window_bounds = array<i64: 2, 4, 8, 32>}, {pipeline_mode = #tpu.pipeline_mode<synchronous>, transform_indices = @transform_11, window_bounds = array<i64: 2, 1, 32>}, {pipeline_mode = #tpu.pipeline_mode<synchronous>, transform_indices = @transform_12, window_bounds = array<i64: 2, 1, 32>}, {pipeline_mode = #tpu.pipeline_mode<synchronous>, transform_indices = @transform_13, window_bounds = array<i64: 2, 1, 32>}, {pipeline_mode = #tpu.pipeline_mode<synchronous>, transform_indices = @transform_14, window_bounds = array<i64: 2, 1, 32>}, {pipeline_mode = #tpu.pipeline_mode<synchronous>, transform_indices = @transform_15, window_bounds = array<i64: 2, 1, 32>}, {pipeline_mode = #tpu.pipeline_mode<synchronous>, transform_indices = @transform_16, window_bounds = array<i64: 2, 32, 32>}, {pipeline_mode = #tpu.pipeline_mode<synchronous>, transform_indices = @transform_17, window_bounds = array<i64: 2, 1, 32>}, {pipeline_mode = #tpu.pipeline_mode<synchronous>, transform_indices = @transform_18, window_bounds = array<i64: 2, 32, 32>}, {pipeline_mode = #tpu.pipeline_mode<synchronous>, transform_indices = @transform_19, window_bounds = array<i64: 2, 1, 32>}, {transform_indices = @transform_20, window_bounds = array<i64: 16, 32>}]} {
    %c0 = arith.constant 0 : index
    %c0_0 = arith.constant 0 : index
    %0 = vector.load %arg2[%c0, %c0_0] : memref<16x16xf32, #tpu.memory_space<vmem>>, vector<16x16xf32>
    %c0_1 = arith.constant 0 : index
    %c0_2 = arith.constant 0 : index
    %1 = vector.load %arg1[%c0_1, %c0_2] : memref<16x4xf32, #tpu.memory_space<vmem>>, vector<16x4xf32>
    %c0_3 = arith.constant 0 : index
    %c0_4 = arith.constant 0 : index
    %2 = vector.load %arg3[%c0_3, %c0_4] : memref<4x32xbf16, #tpu.memory_space<vmem>>, vector<4x32xbf16>
    %3 = arith.truncf %1 : vector<16x4xf32> to vector<16x4xbf16>
    %cst = arith.constant dense<0.000000e+00> : vector<16x32xf32>
    %4 = tpu.matmul %3, %2, %cst {dimension_numbers = #tpu.dot_dimension_numbers<[1], [0], [0], [1], [0, 0, 1, 1], [], []>} : vector<16x4xbf16>, vector<4x32xbf16>, vector<16x32xf32> -> vector<16x32xf32>
    %c0_5 = arith.constant 0 : index
    %c0_6 = arith.constant 0 : index
    %5 = vector.load %arg4[%c0_5, %c0_6] : memref<1x32xf32, #tpu.memory_space<vmem>>, vector<1x32xf32>
    %6 = vector.broadcast %5 : vector<1x32xf32> to vector<16x32xf32>
    %7 = arith.addf %4, %6 : vector<16x32xf32>
    %cst_7 = arith.constant 0.000000e+00 : f32
    %8 = vector.broadcast %cst_7 : f32 to vector<16x32xf32>
    %c0_8 = arith.constant 0 : index
    %c0_9 = arith.constant 0 : index
    %c0_10 = arith.constant 0 : index
    %c0_11 = arith.constant 0 : index
    %9 = vector.load %arg5[%c0_8, %c0_9, %c0_10, %c0_11] : memref<2x4x32x8xbf16, #tpu.memory_space<vmem>>, vector<1x1x32x8xbf16>
    %10 = vector.shape_cast %9 : vector<1x1x32x8xbf16> to vector<32x8xbf16>
    %11 = arith.truncf %7 : vector<16x32xf32> to vector<16x32xbf16>
    %cst_12 = arith.constant dense<0.000000e+00> : vector<16x8xf32>
    %12 = tpu.matmul %11, %10, %cst_12 {dimension_numbers = #tpu.dot_dimension_numbers<[1], [0], [0], [1], [0, 0, 1, 1], [], []>} : vector<16x32xbf16>, vector<32x8xbf16>, vector<16x8xf32> -> vector<16x8xf32>
    %c0_13 = arith.constant 0 : index
    %c0_14 = arith.constant 0 : index
    %c0_15 = arith.constant 0 : index
    %c0_16 = arith.constant 0 : index
    %13 = vector.load %arg6[%c0_13, %c0_14, %c0_15, %c0_16] : memref<2x4x1x8xf32, #tpu.memory_space<vmem>>, vector<1x1x1x8xf32>
    %14 = vector.shape_cast %13 : vector<1x1x1x8xf32> to vector<1x8xf32>
    %15 = vector.broadcast %14 : vector<1x8xf32> to vector<16x8xf32>
    %16 = arith.addf %12, %15 : vector<16x8xf32>
    %c0_17 = arith.constant 0 : index
    %c0_18 = arith.constant 0 : index
    %c0_19 = arith.constant 0 : index
    %c0_20 = arith.constant 0 : index
    %17 = vector.load %arg7[%c0_17, %c0_18, %c0_19, %c0_20] : memref<2x4x32x8xbf16, #tpu.memory_space<vmem>>, vector<1x1x32x8xbf16>
    %18 = vector.shape_cast %17 : vector<1x1x32x8xbf16> to vector<32x8xbf16>
    %19 = arith.truncf %7 : vector<16x32xf32> to vector<16x32xbf16>
    %cst_21 = arith.constant dense<0.000000e+00> : vector<16x8xf32>
    %20 = tpu.matmul %19, %18, %cst_21 {dimension_numbers = #tpu.dot_dimension_numbers<[1], [0], [0], [1], [0, 0, 1, 1], [], []>} : vector<16x32xbf16>, vector<32x8xbf16>, vector<16x8xf32> -> vector<16x8xf32>
    %c0_22 = arith.constant 0 : index
    %c0_23 = arith.constant 0 : index
    %c0_24 = arith.constant 0 : index
    %c0_25 = arith.constant 0 : index
    %21 = vector.load %arg8[%c0_22, %c0_23, %c0_24, %c0_25] : memref<2x4x1x8xf32, #tpu.memory_space<vmem>>, vector<1x1x1x8xf32>
    %22 = vector.shape_cast %21 : vector<1x1x1x8xf32> to vector<1x8xf32>
    %23 = vector.broadcast %22 : vector<1x8xf32> to vector<16x8xf32>
    %24 = arith.addf %20, %23 : vector<16x8xf32>
    %c0_26 = arith.constant 0 : index
    %c0_27 = arith.constant 0 : index
    %c0_28 = arith.constant 0 : index
    %c0_29 = arith.constant 0 : index
    %25 = vector.load %arg9[%c0_26, %c0_27, %c0_28, %c0_29] : memref<2x4x32x8xbf16, #tpu.memory_space<vmem>>, vector<1x1x32x8xbf16>
    %26 = vector.shape_cast %25 : vector<1x1x32x8xbf16> to vector<32x8xbf16>
    %27 = arith.truncf %7 : vector<16x32xf32> to vector<16x32xbf16>
    %cst_30 = arith.constant dense<0.000000e+00> : vector<16x8xf32>
    %28 = tpu.matmul %27, %26, %cst_30 {dimension_numbers = #tpu.dot_dimension_numbers<[1], [0], [0], [1], [0, 0, 1, 1], [], []>} : vector<16x32xbf16>, vector<32x8xbf16>, vector<16x8xf32> -> vector<16x8xf32>
    %c0_31 = arith.constant 0 : index
    %c0_32 = arith.constant 0 : index
    %c0_33 = arith.constant 0 : index
    %c0_34 = arith.constant 0 : index
    %29 = vector.load %arg10[%c0_31, %c0_32, %c0_33, %c0_34] : memref<2x4x1x8xf32, #tpu.memory_space<vmem>>, vector<1x1x1x8xf32>
    %30 = vector.shape_cast %29 : vector<1x1x1x8xf32> to vector<1x8xf32>
    %31 = vector.broadcast %30 : vector<1x8xf32> to vector<16x8xf32>
    %32 = arith.addf %28, %31 : vector<16x8xf32>
    %33 = arith.truncf %16 : vector<16x8xf32> to vector<16x8xbf16>
    %34 = arith.truncf %24 : vector<16x8xf32> to vector<16x8xbf16>
    %cst_35 = arith.constant dense<0.000000e+00> : vector<16x16xf32>
    %35 = tpu.matmul %33, %34, %cst_35 {dimension_numbers = #tpu.dot_dimension_numbers<[1], [1], [0], [0], [0, 0, 1, 0], [], []>} : vector<16x8xbf16>, vector<16x8xbf16>, vector<16x16xf32> -> vector<16x16xf32>
    %cst_36 = arith.constant 0.353553385 : f32
    %36 = vector.broadcast %cst_36 : f32 to vector<16x16xf32>
    %37 = arith.mulf %35, %36 : vector<16x16xf32>
    %38 = arith.addf %37, %0 : vector<16x16xf32>
    %cst_37 = arith.constant dense<0xFF800000> : vector<16xf32>
    %39 = vector.multi_reduction <maximumf>, %38, %cst_37 [1] : vector<16x16xf32> to vector<16xf32>
    %40 = vector.shape_cast %39 : vector<16xf32> to vector<16x1xf32>
    %41 = vector.broadcast %40 : vector<16x1xf32> to vector<16x16xf32>
    %42 = arith.subf %38, %41 : vector<16x16xf32>
    %43 = math.exp %42 : vector<16x16xf32>
    %cst_38 = arith.constant dense<0.000000e+00> : vector<16xf32>
    %44 = vector.multi_reduction <add>, %43, %cst_38 [1] : vector<16x16xf32> to vector<16xf32>
    %45 = vector.shape_cast %44 : vector<16xf32> to vector<16x1xf32>
    %46 = tpu.reciprocal %45 {approx = true} : vector<16x1xf32> -> vector<16x1xf32>
    %47 = vector.broadcast %46 : vector<16x1xf32> to vector<16x16xf32>
    %48 = arith.mulf %43, %47 : vector<16x16xf32>
    %49 = arith.truncf %48 : vector<16x16xf32> to vector<16x16xbf16>
    %50 = arith.truncf %32 : vector<16x8xf32> to vector<16x8xbf16>
    %cst_39 = arith.constant dense<0.000000e+00> : vector<16x8xf32>
    %51 = tpu.matmul %49, %50, %cst_39 {dimension_numbers = #tpu.dot_dimension_numbers<[1], [0], [0], [1], [0, 0, 1, 1], [], []>} : vector<16x16xbf16>, vector<16x8xbf16>, vector<16x8xf32> -> vector<16x8xf32>
    %c0_40 = arith.constant 0 : index
    %c0_41 = arith.constant 0 : index
    %c0_42 = arith.constant 0 : index
    %c0_43 = arith.constant 0 : index
    %52 = vector.load %arg11[%c0_40, %c0_41, %c0_42, %c0_43] : memref<2x4x8x32xbf16, #tpu.memory_space<vmem>>, vector<1x1x8x32xbf16>
    %53 = vector.shape_cast %52 : vector<1x1x8x32xbf16> to vector<8x32xbf16>
    %54 = arith.truncf %51 : vector<16x8xf32> to vector<16x8xbf16>
    %cst_44 = arith.constant dense<0.000000e+00> : vector<16x32xf32>
    %55 = tpu.matmul %54, %53, %cst_44 {dimension_numbers = #tpu.dot_dimension_numbers<[1], [0], [0], [1], [0, 0, 1, 1], [], []>} : vector<16x8xbf16>, vector<8x32xbf16>, vector<16x32xf32> -> vector<16x32xf32>
    %56 = arith.addf %8, %55 : vector<16x32xf32>
    %c0_45 = arith.constant 0 : index
    %c1 = arith.constant 1 : index
    %c0_46 = arith.constant 0 : index
    %c0_47 = arith.constant 0 : index
    %57 = vector.load %arg5[%c0_45, %c1, %c0_46, %c0_47] : memref<2x4x32x8xbf16, #tpu.memory_space<vmem>>, vector<1x1x32x8xbf16>
    %58 = vector.shape_cast %57 : vector<1x1x32x8xbf16> to vector<32x8xbf16>
    %59 = arith.truncf %7 : vector<16x32xf32> to vector<16x32xbf16>
    %cst_48 = arith.constant dense<0.000000e+00> : vector<16x8xf32>
    %60 = tpu.matmul %59, %58, %cst_48 {dimension_numbers = #tpu.dot_dimension_numbers<[1], [0], [0], [1], [0, 0, 1, 1], [], []>} : vector<16x32xbf16>, vector<32x8xbf16>, vector<16x8xf32> -> vector<16x8xf32>
    %c0_49 = arith.constant 0 : index
    %c1_50 = arith.constant 1 : index
    %c0_51 = arith.constant 0 : index
    %c0_52 = arith.constant 0 : index
    %61 = vector.load %arg6[%c0_49, %c1_50, %c0_51, %c0_52] : memref<2x4x1x8xf32, #tpu.memory_space<vmem>>, vector<1x1x1x8xf32>
    %62 = vector.shape_cast %61 : vector<1x1x1x8xf32> to vector<1x8xf32>
    %63 = vector.broadcast %62 : vector<1x8xf32> to vector<16x8xf32>
    %64 = arith.addf %60, %63 : vector<16x8xf32>
    %c0_53 = arith.constant 0 : index
    %c1_54 = arith.constant 1 : index
    %c0_55 = arith.constant 0 : index
    %c0_56 = arith.constant 0 : index
    %65 = vector.load %arg7[%c0_53, %c1_54, %c0_55, %c0_56] : memref<2x4x32x8xbf16, #tpu.memory_space<vmem>>, vector<1x1x32x8xbf16>
    %66 = vector.shape_cast %65 : vector<1x1x32x8xbf16> to vector<32x8xbf16>
    %67 = arith.truncf %7 : vector<16x32xf32> to vector<16x32xbf16>
    %cst_57 = arith.constant dense<0.000000e+00> : vector<16x8xf32>
    %68 = tpu.matmul %67, %66, %cst_57 {dimension_numbers = #tpu.dot_dimension_numbers<[1], [0], [0], [1], [0, 0, 1, 1], [], []>} : vector<16x32xbf16>, vector<32x8xbf16>, vector<16x8xf32> -> vector<16x8xf32>
    %c0_58 = arith.constant 0 : index
    %c1_59 = arith.constant 1 : index
    %c0_60 = arith.constant 0 : index
    %c0_61 = arith.constant 0 : index
    %69 = vector.load %arg8[%c0_58, %c1_59, %c0_60, %c0_61] : memref<2x4x1x8xf32, #tpu.memory_space<vmem>>, vector<1x1x1x8xf32>
    %70 = vector.shape_cast %69 : vector<1x1x1x8xf32> to vector<1x8xf32>
    %71 = vector.broadcast %70 : vector<1x8xf32> to vector<16x8xf32>
    %72 = arith.addf %68, %71 : vector<16x8xf32>
    %c0_62 = arith.constant 0 : index
    %c1_63 = arith.constant 1 : index
    %c0_64 = arith.constant 0 : index
    %c0_65 = arith.constant 0 : index
    %73 = vector.load %arg9[%c0_62, %c1_63, %c0_64, %c0_65] : memref<2x4x32x8xbf16, #tpu.memory_space<vmem>>, vector<1x1x32x8xbf16>
    %74 = vector.shape_cast %73 : vector<1x1x32x8xbf16> to vector<32x8xbf16>
    %75 = arith.truncf %7 : vector<16x32xf32> to vector<16x32xbf16>
    %cst_66 = arith.constant dense<0.000000e+00> : vector<16x8xf32>
    %76 = tpu.matmul %75, %74, %cst_66 {dimension_numbers = #tpu.dot_dimension_numbers<[1], [0], [0], [1], [0, 0, 1, 1], [], []>} : vector<16x32xbf16>, vector<32x8xbf16>, vector<16x8xf32> -> vector<16x8xf32>
    %c0_67 = arith.constant 0 : index
    %c1_68 = arith.constant 1 : index
    %c0_69 = arith.constant 0 : index
    %c0_70 = arith.constant 0 : index
    %77 = vector.load %arg10[%c0_67, %c1_68, %c0_69, %c0_70] : memref<2x4x1x8xf32, #tpu.memory_space<vmem>>, vector<1x1x1x8xf32>
    %78 = vector.shape_cast %77 : vector<1x1x1x8xf32> to vector<1x8xf32>
    %79 = vector.broadcast %78 : vector<1x8xf32> to vector<16x8xf32>
    %80 = arith.addf %76, %79 : vector<16x8xf32>
    %81 = arith.truncf %64 : vector<16x8xf32> to vector<16x8xbf16>
    %82 = arith.truncf %72 : vector<16x8xf32> to vector<16x8xbf16>
    %cst_71 = arith.constant dense<0.000000e+00> : vector<16x16xf32>
    %83 = tpu.matmul %81, %82, %cst_71 {dimension_numbers = #tpu.dot_dimension_numbers<[1], [1], [0], [0], [0, 0, 1, 0], [], []>} : vector<16x8xbf16>, vector<16x8xbf16>, vector<16x16xf32> -> vector<16x16xf32>
    %cst_72 = arith.constant 0.353553385 : f32
    %84 = vector.broadcast %cst_72 : f32 to vector<16x16xf32>
    %85 = arith.mulf %83, %84 : vector<16x16xf32>
    %86 = arith.addf %85, %0 : vector<16x16xf32>
    %cst_73 = arith.constant dense<0xFF800000> : vector<16xf32>
    %87 = vector.multi_reduction <maximumf>, %86, %cst_73 [1] : vector<16x16xf32> to vector<16xf32>
    %88 = vector.shape_cast %87 : vector<16xf32> to vector<16x1xf32>
    %89 = vector.broadcast %88 : vector<16x1xf32> to vector<16x16xf32>
    %90 = arith.subf %86, %89 : vector<16x16xf32>
    %91 = math.exp %90 : vector<16x16xf32>
    %cst_74 = arith.constant dense<0.000000e+00> : vector<16xf32>
    %92 = vector.multi_reduction <add>, %91, %cst_74 [1] : vector<16x16xf32> to vector<16xf32>
    %93 = vector.shape_cast %92 : vector<16xf32> to vector<16x1xf32>
    %94 = tpu.reciprocal %93 {approx = true} : vector<16x1xf32> -> vector<16x1xf32>
    %95 = vector.broadcast %94 : vector<16x1xf32> to vector<16x16xf32>
    %96 = arith.mulf %91, %95 : vector<16x16xf32>
    %97 = arith.truncf %96 : vector<16x16xf32> to vector<16x16xbf16>
    %98 = arith.truncf %80 : vector<16x8xf32> to vector<16x8xbf16>
    %cst_75 = arith.constant dense<0.000000e+00> : vector<16x8xf32>
    %99 = tpu.matmul %97, %98, %cst_75 {dimension_numbers = #tpu.dot_dimension_numbers<[1], [0], [0], [1], [0, 0, 1, 1], [], []>} : vector<16x16xbf16>, vector<16x8xbf16>, vector<16x8xf32> -> vector<16x8xf32>
    %c0_76 = arith.constant 0 : index
    %c1_77 = arith.constant 1 : index
    %c0_78 = arith.constant 0 : index
    %c0_79 = arith.constant 0 : index
    %100 = vector.load %arg11[%c0_76, %c1_77, %c0_78, %c0_79] : memref<2x4x8x32xbf16, #tpu.memory_space<vmem>>, vector<1x1x8x32xbf16>
    %101 = vector.shape_cast %100 : vector<1x1x8x32xbf16> to vector<8x32xbf16>
    %102 = arith.truncf %99 : vector<16x8xf32> to vector<16x8xbf16>
    %cst_80 = arith.constant dense<0.000000e+00> : vector<16x32xf32>
    %103 = tpu.matmul %102, %101, %cst_80 {dimension_numbers = #tpu.dot_dimension_numbers<[1], [0], [0], [1], [0, 0, 1, 1], [], []>} : vector<16x8xbf16>, vector<8x32xbf16>, vector<16x32xf32> -> vector<16x32xf32>
    %104 = arith.addf %56, %103 : vector<16x32xf32>
    %c0_81 = arith.constant 0 : index
    %c2 = arith.constant 2 : index
    %c0_82 = arith.constant 0 : index
    %c0_83 = arith.constant 0 : index
    %105 = vector.load %arg5[%c0_81, %c2, %c0_82, %c0_83] : memref<2x4x32x8xbf16, #tpu.memory_space<vmem>>, vector<1x1x32x8xbf16>
    %106 = vector.shape_cast %105 : vector<1x1x32x8xbf16> to vector<32x8xbf16>
    %107 = arith.truncf %7 : vector<16x32xf32> to vector<16x32xbf16>
    %cst_84 = arith.constant dense<0.000000e+00> : vector<16x8xf32>
    %108 = tpu.matmul %107, %106, %cst_84 {dimension_numbers = #tpu.dot_dimension_numbers<[1], [0], [0], [1], [0, 0, 1, 1], [], []>} : vector<16x32xbf16>, vector<32x8xbf16>, vector<16x8xf32> -> vector<16x8xf32>
    %c0_85 = arith.constant 0 : index
    %c2_86 = arith.constant 2 : index
    %c0_87 = arith.constant 0 : index
    %c0_88 = arith.constant 0 : index
    %109 = vector.load %arg6[%c0_85, %c2_86, %c0_87, %c0_88] : memref<2x4x1x8xf32, #tpu.memory_space<vmem>>, vector<1x1x1x8xf32>
    %110 = vector.shape_cast %109 : vector<1x1x1x8xf32> to vector<1x8xf32>
    %111 = vector.broadcast %110 : vector<1x8xf32> to vector<16x8xf32>
    %112 = arith.addf %108, %111 : vector<16x8xf32>
    %c0_89 = arith.constant 0 : index
    %c2_90 = arith.constant 2 : index
    %c0_91 = arith.constant 0 : index
    %c0_92 = arith.constant 0 : index
    %113 = vector.load %arg7[%c0_89, %c2_90, %c0_91, %c0_92] : memref<2x4x32x8xbf16, #tpu.memory_space<vmem>>, vector<1x1x32x8xbf16>
    %114 = vector.shape_cast %113 : vector<1x1x32x8xbf16> to vector<32x8xbf16>
    %115 = arith.truncf %7 : vector<16x32xf32> to vector<16x32xbf16>
    %cst_93 = arith.constant dense<0.000000e+00> : vector<16x8xf32>
    %116 = tpu.matmul %115, %114, %cst_93 {dimension_numbers = #tpu.dot_dimension_numbers<[1], [0], [0], [1], [0, 0, 1, 1], [], []>} : vector<16x32xbf16>, vector<32x8xbf16>, vector<16x8xf32> -> vector<16x8xf32>
    %c0_94 = arith.constant 0 : index
    %c2_95 = arith.constant 2 : index
    %c0_96 = arith.constant 0 : index
    %c0_97 = arith.constant 0 : index
    %117 = vector.load %arg8[%c0_94, %c2_95, %c0_96, %c0_97] : memref<2x4x1x8xf32, #tpu.memory_space<vmem>>, vector<1x1x1x8xf32>
    %118 = vector.shape_cast %117 : vector<1x1x1x8xf32> to vector<1x8xf32>
    %119 = vector.broadcast %118 : vector<1x8xf32> to vector<16x8xf32>
    %120 = arith.addf %116, %119 : vector<16x8xf32>
    %c0_98 = arith.constant 0 : index
    %c2_99 = arith.constant 2 : index
    %c0_100 = arith.constant 0 : index
    %c0_101 = arith.constant 0 : index
    %121 = vector.load %arg9[%c0_98, %c2_99, %c0_100, %c0_101] : memref<2x4x32x8xbf16, #tpu.memory_space<vmem>>, vector<1x1x32x8xbf16>
    %122 = vector.shape_cast %121 : vector<1x1x32x8xbf16> to vector<32x8xbf16>
    %123 = arith.truncf %7 : vector<16x32xf32> to vector<16x32xbf16>
    %cst_102 = arith.constant dense<0.000000e+00> : vector<16x8xf32>
    %124 = tpu.matmul %123, %122, %cst_102 {dimension_numbers = #tpu.dot_dimension_numbers<[1], [0], [0], [1], [0, 0, 1, 1], [], []>} : vector<16x32xbf16>, vector<32x8xbf16>, vector<16x8xf32> -> vector<16x8xf32>
    %c0_103 = arith.constant 0 : index
    %c2_104 = arith.constant 2 : index
    %c0_105 = arith.constant 0 : index
    %c0_106 = arith.constant 0 : index
    %125 = vector.load %arg10[%c0_103, %c2_104, %c0_105, %c0_106] : memref<2x4x1x8xf32, #tpu.memory_space<vmem>>, vector<1x1x1x8xf32>
    %126 = vector.shape_cast %125 : vector<1x1x1x8xf32> to vector<1x8xf32>
    %127 = vector.broadcast %126 : vector<1x8xf32> to vector<16x8xf32>
    %128 = arith.addf %124, %127 : vector<16x8xf32>
    %129 = arith.truncf %112 : vector<16x8xf32> to vector<16x8xbf16>
    %130 = arith.truncf %120 : vector<16x8xf32> to vector<16x8xbf16>
    %cst_107 = arith.constant dense<0.000000e+00> : vector<16x16xf32>
    %131 = tpu.matmul %129, %130, %cst_107 {dimension_numbers = #tpu.dot_dimension_numbers<[1], [1], [0], [0], [0, 0, 1, 0], [], []>} : vector<16x8xbf16>, vector<16x8xbf16>, vector<16x16xf32> -> vector<16x16xf32>
    %cst_108 = arith.constant 0.353553385 : f32
    %132 = vector.broadcast %cst_108 : f32 to vector<16x16xf32>
    %133 = arith.mulf %131, %132 : vector<16x16xf32>
    %134 = arith.addf %133, %0 : vector<16x16xf32>
    %cst_109 = arith.constant dense<0xFF800000> : vector<16xf32>
    %135 = vector.multi_reduction <maximumf>, %134, %cst_109 [1] : vector<16x16xf32> to vector<16xf32>
    %136 = vector.shape_cast %135 : vector<16xf32> to vector<16x1xf32>
    %137 = vector.broadcast %136 : vector<16x1xf32> to vector<16x16xf32>
    %138 = arith.subf %134, %137 : vector<16x16xf32>
    %139 = math.exp %138 : vector<16x16xf32>
    %cst_110 = arith.constant dense<0.000000e+00> : vector<16xf32>
    %140 = vector.multi_reduction <add>, %139, %cst_110 [1] : vector<16x16xf32> to vector<16xf32>
    %141 = vector.shape_cast %140 : vector<16xf32> to vector<16x1xf32>
    %142 = tpu.reciprocal %141 {approx = true} : vector<16x1xf32> -> vector<16x1xf32>
    %143 = vector.broadcast %142 : vector<16x1xf32> to vector<16x16xf32>
    %144 = arith.mulf %139, %143 : vector<16x16xf32>
    %145 = arith.truncf %144 : vector<16x16xf32> to vector<16x16xbf16>
    %146 = arith.truncf %128 : vector<16x8xf32> to vector<16x8xbf16>
    %cst_111 = arith.constant dense<0.000000e+00> : vector<16x8xf32>
    %147 = tpu.matmul %145, %146, %cst_111 {dimension_numbers = #tpu.dot_dimension_numbers<[1], [0], [0], [1], [0, 0, 1, 1], [], []>} : vector<16x16xbf16>, vector<16x8xbf16>, vector<16x8xf32> -> vector<16x8xf32>
    %c0_112 = arith.constant 0 : index
    %c2_113 = arith.constant 2 : index
    %c0_114 = arith.constant 0 : index
    %c0_115 = arith.constant 0 : index
    %148 = vector.load %arg11[%c0_112, %c2_113, %c0_114, %c0_115] : memref<2x4x8x32xbf16, #tpu.memory_space<vmem>>, vector<1x1x8x32xbf16>
    %149 = vector.shape_cast %148 : vector<1x1x8x32xbf16> to vector<8x32xbf16>
    %150 = arith.truncf %147 : vector<16x8xf32> to vector<16x8xbf16>
    %cst_116 = arith.constant dense<0.000000e+00> : vector<16x32xf32>
    %151 = tpu.matmul %150, %149, %cst_116 {dimension_numbers = #tpu.dot_dimension_numbers<[1], [0], [0], [1], [0, 0, 1, 1], [], []>} : vector<16x8xbf16>, vector<8x32xbf16>, vector<16x32xf32> -> vector<16x32xf32>
    %152 = arith.addf %104, %151 : vector<16x32xf32>
    %c0_117 = arith.constant 0 : index
    %c3 = arith.constant 3 : index
    %c0_118 = arith.constant 0 : index
    %c0_119 = arith.constant 0 : index
    %153 = vector.load %arg5[%c0_117, %c3, %c0_118, %c0_119] : memref<2x4x32x8xbf16, #tpu.memory_space<vmem>>, vector<1x1x32x8xbf16>
    %154 = vector.shape_cast %153 : vector<1x1x32x8xbf16> to vector<32x8xbf16>
    %155 = arith.truncf %7 : vector<16x32xf32> to vector<16x32xbf16>
    %cst_120 = arith.constant dense<0.000000e+00> : vector<16x8xf32>
    %156 = tpu.matmul %155, %154, %cst_120 {dimension_numbers = #tpu.dot_dimension_numbers<[1], [0], [0], [1], [0, 0, 1, 1], [], []>} : vector<16x32xbf16>, vector<32x8xbf16>, vector<16x8xf32> -> vector<16x8xf32>
    %c0_121 = arith.constant 0 : index
    %c3_122 = arith.constant 3 : index
    %c0_123 = arith.constant 0 : index
    %c0_124 = arith.constant 0 : index
    %157 = vector.load %arg6[%c0_121, %c3_122, %c0_123, %c0_124] : memref<2x4x1x8xf32, #tpu.memory_space<vmem>>, vector<1x1x1x8xf32>
    %158 = vector.shape_cast %157 : vector<1x1x1x8xf32> to vector<1x8xf32>
    %159 = vector.broadcast %158 : vector<1x8xf32> to vector<16x8xf32>
    %160 = arith.addf %156, %159 : vector<16x8xf32>
    %c0_125 = arith.constant 0 : index
    %c3_126 = arith.constant 3 : index
    %c0_127 = arith.constant 0 : index
    %c0_128 = arith.constant 0 : index
    %161 = vector.load %arg7[%c0_125, %c3_126, %c0_127, %c0_128] : memref<2x4x32x8xbf16, #tpu.memory_space<vmem>>, vector<1x1x32x8xbf16>
    %162 = vector.shape_cast %161 : vector<1x1x32x8xbf16> to vector<32x8xbf16>
    %163 = arith.truncf %7 : vector<16x32xf32> to vector<16x32xbf16>
    %cst_129 = arith.constant dense<0.000000e+00> : vector<16x8xf32>
    %164 = tpu.matmul %163, %162, %cst_129 {dimension_numbers = #tpu.dot_dimension_numbers<[1], [0], [0], [1], [0, 0, 1, 1], [], []>} : vector<16x32xbf16>, vector<32x8xbf16>, vector<16x8xf32> -> vector<16x8xf32>
    %c0_130 = arith.constant 0 : index
    %c3_131 = arith.constant 3 : index
    %c0_132 = arith.constant 0 : index
    %c0_133 = arith.constant 0 : index
    %165 = vector.load %arg8[%c0_130, %c3_131, %c0_132, %c0_133] : memref<2x4x1x8xf32, #tpu.memory_space<vmem>>, vector<1x1x1x8xf32>
    %166 = vector.shape_cast %165 : vector<1x1x1x8xf32> to vector<1x8xf32>
    %167 = vector.broadcast %166 : vector<1x8xf32> to vector<16x8xf32>
    %168 = arith.addf %164, %167 : vector<16x8xf32>
    %c0_134 = arith.constant 0 : index
    %c3_135 = arith.constant 3 : index
    %c0_136 = arith.constant 0 : index
    %c0_137 = arith.constant 0 : index
    %169 = vector.load %arg9[%c0_134, %c3_135, %c0_136, %c0_137] : memref<2x4x32x8xbf16, #tpu.memory_space<vmem>>, vector<1x1x32x8xbf16>
    %170 = vector.shape_cast %169 : vector<1x1x32x8xbf16> to vector<32x8xbf16>
    %171 = arith.truncf %7 : vector<16x32xf32> to vector<16x32xbf16>
    %cst_138 = arith.constant dense<0.000000e+00> : vector<16x8xf32>
    %172 = tpu.matmul %171, %170, %cst_138 {dimension_numbers = #tpu.dot_dimension_numbers<[1], [0], [0], [1], [0, 0, 1, 1], [], []>} : vector<16x32xbf16>, vector<32x8xbf16>, vector<16x8xf32> -> vector<16x8xf32>
    %c0_139 = arith.constant 0 : index
    %c3_140 = arith.constant 3 : index
    %c0_141 = arith.constant 0 : index
    %c0_142 = arith.constant 0 : index
    %173 = vector.load %arg10[%c0_139, %c3_140, %c0_141, %c0_142] : memref<2x4x1x8xf32, #tpu.memory_space<vmem>>, vector<1x1x1x8xf32>
    %174 = vector.shape_cast %173 : vector<1x1x1x8xf32> to vector<1x8xf32>
    %175 = vector.broadcast %174 : vector<1x8xf32> to vector<16x8xf32>
    %176 = arith.addf %172, %175 : vector<16x8xf32>
    %177 = arith.truncf %160 : vector<16x8xf32> to vector<16x8xbf16>
    %178 = arith.truncf %168 : vector<16x8xf32> to vector<16x8xbf16>
    %cst_143 = arith.constant dense<0.000000e+00> : vector<16x16xf32>
    %179 = tpu.matmul %177, %178, %cst_143 {dimension_numbers = #tpu.dot_dimension_numbers<[1], [1], [0], [0], [0, 0, 1, 0], [], []>} : vector<16x8xbf16>, vector<16x8xbf16>, vector<16x16xf32> -> vector<16x16xf32>
    %cst_144 = arith.constant 0.353553385 : f32
    %180 = vector.broadcast %cst_144 : f32 to vector<16x16xf32>
    %181 = arith.mulf %179, %180 : vector<16x16xf32>
    %182 = arith.addf %181, %0 : vector<16x16xf32>
    %cst_145 = arith.constant dense<0xFF800000> : vector<16xf32>
    %183 = vector.multi_reduction <maximumf>, %182, %cst_145 [1] : vector<16x16xf32> to vector<16xf32>
    %184 = vector.shape_cast %183 : vector<16xf32> to vector<16x1xf32>
    %185 = vector.broadcast %184 : vector<16x1xf32> to vector<16x16xf32>
    %186 = arith.subf %182, %185 : vector<16x16xf32>
    %187 = math.exp %186 : vector<16x16xf32>
    %cst_146 = arith.constant dense<0.000000e+00> : vector<16xf32>
    %188 = vector.multi_reduction <add>, %187, %cst_146 [1] : vector<16x16xf32> to vector<16xf32>
    %189 = vector.shape_cast %188 : vector<16xf32> to vector<16x1xf32>
    %190 = tpu.reciprocal %189 {approx = true} : vector<16x1xf32> -> vector<16x1xf32>
    %191 = vector.broadcast %190 : vector<16x1xf32> to vector<16x16xf32>
    %192 = arith.mulf %187, %191 : vector<16x16xf32>
    %193 = arith.truncf %192 : vector<16x16xf32> to vector<16x16xbf16>
    %194 = arith.truncf %176 : vector<16x8xf32> to vector<16x8xbf16>
    %cst_147 = arith.constant dense<0.000000e+00> : vector<16x8xf32>
    %195 = tpu.matmul %193, %194, %cst_147 {dimension_numbers = #tpu.dot_dimension_numbers<[1], [0], [0], [1], [0, 0, 1, 1], [], []>} : vector<16x16xbf16>, vector<16x8xbf16>, vector<16x8xf32> -> vector<16x8xf32>
    %c0_148 = arith.constant 0 : index
    %c3_149 = arith.constant 3 : index
    %c0_150 = arith.constant 0 : index
    %c0_151 = arith.constant 0 : index
    %196 = vector.load %arg11[%c0_148, %c3_149, %c0_150, %c0_151] : memref<2x4x8x32xbf16, #tpu.memory_space<vmem>>, vector<1x1x8x32xbf16>
    %197 = vector.shape_cast %196 : vector<1x1x8x32xbf16> to vector<8x32xbf16>
    %198 = arith.truncf %195 : vector<16x8xf32> to vector<16x8xbf16>
    %cst_152 = arith.constant dense<0.000000e+00> : vector<16x32xf32>
    %199 = tpu.matmul %198, %197, %cst_152 {dimension_numbers = #tpu.dot_dimension_numbers<[1], [0], [0], [1], [0, 0, 1, 1], [], []>} : vector<16x8xbf16>, vector<8x32xbf16>, vector<16x32xf32> -> vector<16x32xf32>
    %200 = arith.addf %152, %199 : vector<16x32xf32>
    %c0_153 = arith.constant 0 : index
    %c0_154 = arith.constant 0 : index
    %c0_155 = arith.constant 0 : index
    %201 = vector.load %arg12[%c0_153, %c0_154, %c0_155] : memref<2x1x32xf32, #tpu.memory_space<vmem>>, vector<1x1x32xf32>
    %202 = vector.shape_cast %201 : vector<1x1x32xf32> to vector<1x32xf32>
    %203 = vector.broadcast %202 : vector<1x32xf32> to vector<16x32xf32>
    %204 = arith.addf %200, %203 : vector<16x32xf32>
    %205 = arith.addf %7, %204 : vector<16x32xf32>
    %c0_156 = arith.constant 0 : index
    %c0_157 = arith.constant 0 : index
    %c0_158 = arith.constant 0 : index
    %206 = vector.load %arg13[%c0_156, %c0_157, %c0_158] : memref<2x1x32xf32, #tpu.memory_space<vmem>>, vector<1x1x32xf32>
    %207 = vector.shape_cast %206 : vector<1x1x32xf32> to vector<1x32xf32>
    %c0_159 = arith.constant 0 : index
    %c0_160 = arith.constant 0 : index
    %c0_161 = arith.constant 0 : index
    %208 = vector.load %arg14[%c0_159, %c0_160, %c0_161] : memref<2x1x32xf32, #tpu.memory_space<vmem>>, vector<1x1x32xf32>
    %209 = vector.shape_cast %208 : vector<1x1x32xf32> to vector<1x32xf32>
    %cst_162 = arith.constant dense<0.000000e+00> : vector<16xf32>
    %210 = vector.multi_reduction <add>, %205, %cst_162 [1] : vector<16x32xf32> to vector<16xf32>
    %211 = vector.shape_cast %210 : vector<16xf32> to vector<16x1xf32>
    %cst_163 = arith.constant 3.200000e+01 : f32
    %212 = vector.broadcast %cst_163 : f32 to vector<16x1xf32>
    %213 = arith.divf %211, %212 : vector<16x1xf32>
    %214 = vector.broadcast %213 : vector<16x1xf32> to vector<16x32xf32>
    %215 = arith.subf %205, %214 : vector<16x32xf32>
    %216 = arith.mulf %215, %215 : vector<16x32xf32>
    %cst_164 = arith.constant dense<0.000000e+00> : vector<16xf32>
    %217 = vector.multi_reduction <add>, %216, %cst_164 [1] : vector<16x32xf32> to vector<16xf32>
    %218 = vector.shape_cast %217 : vector<16xf32> to vector<16x1xf32>
    %cst_165 = arith.constant 3.200000e+01 : f32
    %219 = vector.broadcast %cst_165 : f32 to vector<16x1xf32>
    %220 = arith.divf %218, %219 : vector<16x1xf32>
    %221 = vector.broadcast %213 : vector<16x1xf32> to vector<16x32xf32>
    %222 = arith.subf %205, %221 : vector<16x32xf32>
    %cst_166 = arith.constant 9.99999974E-6 : f32
    %223 = vector.broadcast %cst_166 : f32 to vector<16x1xf32>
    %224 = arith.addf %220, %223 : vector<16x1xf32>
    %225 = math.rsqrt %224 : vector<16x1xf32>
    %226 = vector.broadcast %225 : vector<16x1xf32> to vector<16x32xf32>
    %227 = arith.mulf %222, %226 : vector<16x32xf32>
    %228 = vector.broadcast %207 : vector<1x32xf32> to vector<16x32xf32>
    %229 = arith.mulf %227, %228 : vector<16x32xf32>
    %230 = vector.broadcast %209 : vector<1x32xf32> to vector<16x32xf32>
    %231 = arith.addf %229, %230 : vector<16x32xf32>
    %c0_167 = arith.constant 0 : index
    %c0_168 = arith.constant 0 : index
    %c0_169 = arith.constant 0 : index
    %232 = vector.load %arg17[%c0_167, %c0_168, %c0_169] : memref<2x32x32xbf16, #tpu.memory_space<vmem>>, vector<1x32x32xbf16>
    %233 = vector.shape_cast %232 : vector<1x32x32xbf16> to vector<32x32xbf16>
    %234 = arith.truncf %231 : vector<16x32xf32> to vector<16x32xbf16>
    %cst_170 = arith.constant dense<0.000000e+00> : vector<16x32xf32>
    %235 = tpu.matmul %234, %233, %cst_170 {dimension_numbers = #tpu.dot_dimension_numbers<[1], [0], [0], [1], [0, 0, 1, 1], [], []>} : vector<16x32xbf16>, vector<32x32xbf16>, vector<16x32xf32> -> vector<16x32xf32>
    %c0_171 = arith.constant 0 : index
    %c0_172 = arith.constant 0 : index
    %c0_173 = arith.constant 0 : index
    %236 = vector.load %arg18[%c0_171, %c0_172, %c0_173] : memref<2x1x32xf32, #tpu.memory_space<vmem>>, vector<1x1x32xf32>
    %237 = vector.shape_cast %236 : vector<1x1x32xf32> to vector<1x32xf32>
    %238 = vector.broadcast %237 : vector<1x32xf32> to vector<16x32xf32>
    %239 = arith.addf %235, %238 : vector<16x32xf32>
    %cst_174 = arith.constant 0.000000e+00 : f32
    %240 = vector.broadcast %cst_174 : f32 to vector<16x32xf32>
    %241 = arith.maximumf %239, %240 : vector<16x32xf32>
    %c0_175 = arith.constant 0 : index
    %c0_176 = arith.constant 0 : index
    %c0_177 = arith.constant 0 : index
    %242 = vector.load %arg19[%c0_175, %c0_176, %c0_177] : memref<2x32x32xbf16, #tpu.memory_space<vmem>>, vector<1x32x32xbf16>
    %243 = vector.shape_cast %242 : vector<1x32x32xbf16> to vector<32x32xbf16>
    %244 = arith.truncf %241 : vector<16x32xf32> to vector<16x32xbf16>
    %cst_178 = arith.constant dense<0.000000e+00> : vector<16x32xf32>
    %245 = tpu.matmul %244, %243, %cst_178 {dimension_numbers = #tpu.dot_dimension_numbers<[1], [0], [0], [1], [0, 0, 1, 1], [], []>} : vector<16x32xbf16>, vector<32x32xbf16>, vector<16x32xf32> -> vector<16x32xf32>
    %c0_179 = arith.constant 0 : index
    %c0_180 = arith.constant 0 : index
    %c0_181 = arith.constant 0 : index
    %246 = vector.load %arg20[%c0_179, %c0_180, %c0_181] : memref<2x1x32xf32, #tpu.memory_space<vmem>>, vector<1x1x32xf32>
    %247 = vector.shape_cast %246 : vector<1x1x32xf32> to vector<1x32xf32>
    %248 = vector.broadcast %247 : vector<1x32xf32> to vector<16x32xf32>
    %249 = arith.addf %245, %248 : vector<16x32xf32>
    %250 = arith.addf %231, %249 : vector<16x32xf32>
    %c0_182 = arith.constant 0 : index
    %c0_183 = arith.constant 0 : index
    %c0_184 = arith.constant 0 : index
    %251 = vector.load %arg15[%c0_182, %c0_183, %c0_184] : memref<2x1x32xf32, #tpu.memory_space<vmem>>, vector<1x1x32xf32>
    %252 = vector.shape_cast %251 : vector<1x1x32xf32> to vector<1x32xf32>
    %c0_185 = arith.constant 0 : index
    %c0_186 = arith.constant 0 : index
    %c0_187 = arith.constant 0 : index
    %253 = vector.load %arg16[%c0_185, %c0_186, %c0_187] : memref<2x1x32xf32, #tpu.memory_space<vmem>>, vector<1x1x32xf32>
    %254 = vector.shape_cast %253 : vector<1x1x32xf32> to vector<1x32xf32>
    %cst_188 = arith.constant dense<0.000000e+00> : vector<16xf32>
    %255 = vector.multi_reduction <add>, %250, %cst_188 [1] : vector<16x32xf32> to vector<16xf32>
    %256 = vector.shape_cast %255 : vector<16xf32> to vector<16x1xf32>
    %cst_189 = arith.constant 3.200000e+01 : f32
    %257 = vector.broadcast %cst_189 : f32 to vector<16x1xf32>
    %258 = arith.divf %256, %257 : vector<16x1xf32>
    %259 = vector.broadcast %258 : vector<16x1xf32> to vector<16x32xf32>
    %260 = arith.subf %250, %259 : vector<16x32xf32>
    %261 = arith.mulf %260, %260 : vector<16x32xf32>
    %cst_190 = arith.constant dense<0.000000e+00> : vector<16xf32>
    %262 = vector.multi_reduction <add>, %261, %cst_190 [1] : vector<16x32xf32> to vector<16xf32>
    %263 = vector.shape_cast %262 : vector<16xf32> to vector<16x1xf32>
    %cst_191 = arith.constant 3.200000e+01 : f32
    %264 = vector.broadcast %cst_191 : f32 to vector<16x1xf32>
    %265 = arith.divf %263, %264 : vector<16x1xf32>
    %266 = vector.broadcast %258 : vector<16x1xf32> to vector<16x32xf32>
    %267 = arith.subf %250, %266 : vector<16x32xf32>
    %cst_192 = arith.constant 9.99999974E-6 : f32
    %268 = vector.broadcast %cst_192 : f32 to vector<16x1xf32>
    %269 = arith.addf %265, %268 : vector<16x1xf32>
    %270 = math.rsqrt %269 : vector<16x1xf32>
    %271 = vector.broadcast %270 : vector<16x1xf32> to vector<16x32xf32>
    %272 = arith.mulf %267, %271 : vector<16x32xf32>
    %273 = vector.broadcast %252 : vector<1x32xf32> to vector<16x32xf32>
    %274 = arith.mulf %272, %273 : vector<16x32xf32>
    %275 = vector.broadcast %254 : vector<1x32xf32> to vector<16x32xf32>
    %276 = arith.addf %274, %275 : vector<16x32xf32>
    %cst_193 = arith.constant 0.000000e+00 : f32
    %277 = vector.broadcast %cst_193 : f32 to vector<16x32xf32>
    %c1_194 = arith.constant 1 : index
    %c0_195 = arith.constant 0 : index
    %c0_196 = arith.constant 0 : index
    %c0_197 = arith.constant 0 : index
    %278 = vector.load %arg5[%c1_194, %c0_195, %c0_196, %c0_197] : memref<2x4x32x8xbf16, #tpu.memory_space<vmem>>, vector<1x1x32x8xbf16>
    %279 = vector.shape_cast %278 : vector<1x1x32x8xbf16> to vector<32x8xbf16>
    %280 = arith.truncf %276 : vector<16x32xf32> to vector<16x32xbf16>
    %cst_198 = arith.constant dense<0.000000e+00> : vector<16x8xf32>
    %281 = tpu.matmul %280, %279, %cst_198 {dimension_numbers = #tpu.dot_dimension_numbers<[1], [0], [0], [1], [0, 0, 1, 1], [], []>} : vector<16x32xbf16>, vector<32x8xbf16>, vector<16x8xf32> -> vector<16x8xf32>
    %c1_199 = arith.constant 1 : index
    %c0_200 = arith.constant 0 : index
    %c0_201 = arith.constant 0 : index
    %c0_202 = arith.constant 0 : index
    %282 = vector.load %arg6[%c1_199, %c0_200, %c0_201, %c0_202] : memref<2x4x1x8xf32, #tpu.memory_space<vmem>>, vector<1x1x1x8xf32>
    %283 = vector.shape_cast %282 : vector<1x1x1x8xf32> to vector<1x8xf32>
    %284 = vector.broadcast %283 : vector<1x8xf32> to vector<16x8xf32>
    %285 = arith.addf %281, %284 : vector<16x8xf32>
    %c1_203 = arith.constant 1 : index
    %c0_204 = arith.constant 0 : index
    %c0_205 = arith.constant 0 : index
    %c0_206 = arith.constant 0 : index
    %286 = vector.load %arg7[%c1_203, %c0_204, %c0_205, %c0_206] : memref<2x4x32x8xbf16, #tpu.memory_space<vmem>>, vector<1x1x32x8xbf16>
    %287 = vector.shape_cast %286 : vector<1x1x32x8xbf16> to vector<32x8xbf16>
    %288 = arith.truncf %276 : vector<16x32xf32> to vector<16x32xbf16>
    %cst_207 = arith.constant dense<0.000000e+00> : vector<16x8xf32>
    %289 = tpu.matmul %288, %287, %cst_207 {dimension_numbers = #tpu.dot_dimension_numbers<[1], [0], [0], [1], [0, 0, 1, 1], [], []>} : vector<16x32xbf16>, vector<32x8xbf16>, vector<16x8xf32> -> vector<16x8xf32>
    %c1_208 = arith.constant 1 : index
    %c0_209 = arith.constant 0 : index
    %c0_210 = arith.constant 0 : index
    %c0_211 = arith.constant 0 : index
    %290 = vector.load %arg8[%c1_208, %c0_209, %c0_210, %c0_211] : memref<2x4x1x8xf32, #tpu.memory_space<vmem>>, vector<1x1x1x8xf32>
    %291 = vector.shape_cast %290 : vector<1x1x1x8xf32> to vector<1x8xf32>
    %292 = vector.broadcast %291 : vector<1x8xf32> to vector<16x8xf32>
    %293 = arith.addf %289, %292 : vector<16x8xf32>
    %c1_212 = arith.constant 1 : index
    %c0_213 = arith.constant 0 : index
    %c0_214 = arith.constant 0 : index
    %c0_215 = arith.constant 0 : index
    %294 = vector.load %arg9[%c1_212, %c0_213, %c0_214, %c0_215] : memref<2x4x32x8xbf16, #tpu.memory_space<vmem>>, vector<1x1x32x8xbf16>
    %295 = vector.shape_cast %294 : vector<1x1x32x8xbf16> to vector<32x8xbf16>
    %296 = arith.truncf %276 : vector<16x32xf32> to vector<16x32xbf16>
    %cst_216 = arith.constant dense<0.000000e+00> : vector<16x8xf32>
    %297 = tpu.matmul %296, %295, %cst_216 {dimension_numbers = #tpu.dot_dimension_numbers<[1], [0], [0], [1], [0, 0, 1, 1], [], []>} : vector<16x32xbf16>, vector<32x8xbf16>, vector<16x8xf32> -> vector<16x8xf32>
    %c1_217 = arith.constant 1 : index
    %c0_218 = arith.constant 0 : index
    %c0_219 = arith.constant 0 : index
    %c0_220 = arith.constant 0 : index
    %298 = vector.load %arg10[%c1_217, %c0_218, %c0_219, %c0_220] : memref<2x4x1x8xf32, #tpu.memory_space<vmem>>, vector<1x1x1x8xf32>
    %299 = vector.shape_cast %298 : vector<1x1x1x8xf32> to vector<1x8xf32>
    %300 = vector.broadcast %299 : vector<1x8xf32> to vector<16x8xf32>
    %301 = arith.addf %297, %300 : vector<16x8xf32>
    %302 = arith.truncf %285 : vector<16x8xf32> to vector<16x8xbf16>
    %303 = arith.truncf %293 : vector<16x8xf32> to vector<16x8xbf16>
    %cst_221 = arith.constant dense<0.000000e+00> : vector<16x16xf32>
    %304 = tpu.matmul %302, %303, %cst_221 {dimension_numbers = #tpu.dot_dimension_numbers<[1], [1], [0], [0], [0, 0, 1, 0], [], []>} : vector<16x8xbf16>, vector<16x8xbf16>, vector<16x16xf32> -> vector<16x16xf32>
    %cst_222 = arith.constant 0.353553385 : f32
    %305 = vector.broadcast %cst_222 : f32 to vector<16x16xf32>
    %306 = arith.mulf %304, %305 : vector<16x16xf32>
    %307 = arith.addf %306, %0 : vector<16x16xf32>
    %cst_223 = arith.constant dense<0xFF800000> : vector<16xf32>
    %308 = vector.multi_reduction <maximumf>, %307, %cst_223 [1] : vector<16x16xf32> to vector<16xf32>
    %309 = vector.shape_cast %308 : vector<16xf32> to vector<16x1xf32>
    %310 = vector.broadcast %309 : vector<16x1xf32> to vector<16x16xf32>
    %311 = arith.subf %307, %310 : vector<16x16xf32>
    %312 = math.exp %311 : vector<16x16xf32>
    %cst_224 = arith.constant dense<0.000000e+00> : vector<16xf32>
    %313 = vector.multi_reduction <add>, %312, %cst_224 [1] : vector<16x16xf32> to vector<16xf32>
    %314 = vector.shape_cast %313 : vector<16xf32> to vector<16x1xf32>
    %315 = tpu.reciprocal %314 {approx = true} : vector<16x1xf32> -> vector<16x1xf32>
    %316 = vector.broadcast %315 : vector<16x1xf32> to vector<16x16xf32>
    %317 = arith.mulf %312, %316 : vector<16x16xf32>
    %318 = arith.truncf %317 : vector<16x16xf32> to vector<16x16xbf16>
    %319 = arith.truncf %301 : vector<16x8xf32> to vector<16x8xbf16>
    %cst_225 = arith.constant dense<0.000000e+00> : vector<16x8xf32>
    %320 = tpu.matmul %318, %319, %cst_225 {dimension_numbers = #tpu.dot_dimension_numbers<[1], [0], [0], [1], [0, 0, 1, 1], [], []>} : vector<16x16xbf16>, vector<16x8xbf16>, vector<16x8xf32> -> vector<16x8xf32>
    %c1_226 = arith.constant 1 : index
    %c0_227 = arith.constant 0 : index
    %c0_228 = arith.constant 0 : index
    %c0_229 = arith.constant 0 : index
    %321 = vector.load %arg11[%c1_226, %c0_227, %c0_228, %c0_229] : memref<2x4x8x32xbf16, #tpu.memory_space<vmem>>, vector<1x1x8x32xbf16>
    %322 = vector.shape_cast %321 : vector<1x1x8x32xbf16> to vector<8x32xbf16>
    %323 = arith.truncf %320 : vector<16x8xf32> to vector<16x8xbf16>
    %cst_230 = arith.constant dense<0.000000e+00> : vector<16x32xf32>
    %324 = tpu.matmul %323, %322, %cst_230 {dimension_numbers = #tpu.dot_dimension_numbers<[1], [0], [0], [1], [0, 0, 1, 1], [], []>} : vector<16x8xbf16>, vector<8x32xbf16>, vector<16x32xf32> -> vector<16x32xf32>
    %325 = arith.addf %277, %324 : vector<16x32xf32>
    %c1_231 = arith.constant 1 : index
    %c1_232 = arith.constant 1 : index
    %c0_233 = arith.constant 0 : index
    %c0_234 = arith.constant 0 : index
    %326 = vector.load %arg5[%c1_231, %c1_232, %c0_233, %c0_234] : memref<2x4x32x8xbf16, #tpu.memory_space<vmem>>, vector<1x1x32x8xbf16>
    %327 = vector.shape_cast %326 : vector<1x1x32x8xbf16> to vector<32x8xbf16>
    %328 = arith.truncf %276 : vector<16x32xf32> to vector<16x32xbf16>
    %cst_235 = arith.constant dense<0.000000e+00> : vector<16x8xf32>
    %329 = tpu.matmul %328, %327, %cst_235 {dimension_numbers = #tpu.dot_dimension_numbers<[1], [0], [0], [1], [0, 0, 1, 1], [], []>} : vector<16x32xbf16>, vector<32x8xbf16>, vector<16x8xf32> -> vector<16x8xf32>
    %c1_236 = arith.constant 1 : index
    %c1_237 = arith.constant 1 : index
    %c0_238 = arith.constant 0 : index
    %c0_239 = arith.constant 0 : index
    %330 = vector.load %arg6[%c1_236, %c1_237, %c0_238, %c0_239] : memref<2x4x1x8xf32, #tpu.memory_space<vmem>>, vector<1x1x1x8xf32>
    %331 = vector.shape_cast %330 : vector<1x1x1x8xf32> to vector<1x8xf32>
    %332 = vector.broadcast %331 : vector<1x8xf32> to vector<16x8xf32>
    %333 = arith.addf %329, %332 : vector<16x8xf32>
    %c1_240 = arith.constant 1 : index
    %c1_241 = arith.constant 1 : index
    %c0_242 = arith.constant 0 : index
    %c0_243 = arith.constant 0 : index
    %334 = vector.load %arg7[%c1_240, %c1_241, %c0_242, %c0_243] : memref<2x4x32x8xbf16, #tpu.memory_space<vmem>>, vector<1x1x32x8xbf16>
    %335 = vector.shape_cast %334 : vector<1x1x32x8xbf16> to vector<32x8xbf16>
    %336 = arith.truncf %276 : vector<16x32xf32> to vector<16x32xbf16>
    %cst_244 = arith.constant dense<0.000000e+00> : vector<16x8xf32>
    %337 = tpu.matmul %336, %335, %cst_244 {dimension_numbers = #tpu.dot_dimension_numbers<[1], [0], [0], [1], [0, 0, 1, 1], [], []>} : vector<16x32xbf16>, vector<32x8xbf16>, vector<16x8xf32> -> vector<16x8xf32>
    %c1_245 = arith.constant 1 : index
    %c1_246 = arith.constant 1 : index
    %c0_247 = arith.constant 0 : index
    %c0_248 = arith.constant 0 : index
    %338 = vector.load %arg8[%c1_245, %c1_246, %c0_247, %c0_248] : memref<2x4x1x8xf32, #tpu.memory_space<vmem>>, vector<1x1x1x8xf32>
    %339 = vector.shape_cast %338 : vector<1x1x1x8xf32> to vector<1x8xf32>
    %340 = vector.broadcast %339 : vector<1x8xf32> to vector<16x8xf32>
    %341 = arith.addf %337, %340 : vector<16x8xf32>
    %c1_249 = arith.constant 1 : index
    %c1_250 = arith.constant 1 : index
    %c0_251 = arith.constant 0 : index
    %c0_252 = arith.constant 0 : index
    %342 = vector.load %arg9[%c1_249, %c1_250, %c0_251, %c0_252] : memref<2x4x32x8xbf16, #tpu.memory_space<vmem>>, vector<1x1x32x8xbf16>
    %343 = vector.shape_cast %342 : vector<1x1x32x8xbf16> to vector<32x8xbf16>
    %344 = arith.truncf %276 : vector<16x32xf32> to vector<16x32xbf16>
    %cst_253 = arith.constant dense<0.000000e+00> : vector<16x8xf32>
    %345 = tpu.matmul %344, %343, %cst_253 {dimension_numbers = #tpu.dot_dimension_numbers<[1], [0], [0], [1], [0, 0, 1, 1], [], []>} : vector<16x32xbf16>, vector<32x8xbf16>, vector<16x8xf32> -> vector<16x8xf32>
    %c1_254 = arith.constant 1 : index
    %c1_255 = arith.constant 1 : index
    %c0_256 = arith.constant 0 : index
    %c0_257 = arith.constant 0 : index
    %346 = vector.load %arg10[%c1_254, %c1_255, %c0_256, %c0_257] : memref<2x4x1x8xf32, #tpu.memory_space<vmem>>, vector<1x1x1x8xf32>
    %347 = vector.shape_cast %346 : vector<1x1x1x8xf32> to vector<1x8xf32>
    %348 = vector.broadcast %347 : vector<1x8xf32> to vector<16x8xf32>
    %349 = arith.addf %345, %348 : vector<16x8xf32>
    %350 = arith.truncf %333 : vector<16x8xf32> to vector<16x8xbf16>
    %351 = arith.truncf %341 : vector<16x8xf32> to vector<16x8xbf16>
    %cst_258 = arith.constant dense<0.000000e+00> : vector<16x16xf32>
    %352 = tpu.matmul %350, %351, %cst_258 {dimension_numbers = #tpu.dot_dimension_numbers<[1], [1], [0], [0], [0, 0, 1, 0], [], []>} : vector<16x8xbf16>, vector<16x8xbf16>, vector<16x16xf32> -> vector<16x16xf32>
    %cst_259 = arith.constant 0.353553385 : f32
    %353 = vector.broadcast %cst_259 : f32 to vector<16x16xf32>
    %354 = arith.mulf %352, %353 : vector<16x16xf32>
    %355 = arith.addf %354, %0 : vector<16x16xf32>
    %cst_260 = arith.constant dense<0xFF800000> : vector<16xf32>
    %356 = vector.multi_reduction <maximumf>, %355, %cst_260 [1] : vector<16x16xf32> to vector<16xf32>
    %357 = vector.shape_cast %356 : vector<16xf32> to vector<16x1xf32>
    %358 = vector.broadcast %357 : vector<16x1xf32> to vector<16x16xf32>
    %359 = arith.subf %355, %358 : vector<16x16xf32>
    %360 = math.exp %359 : vector<16x16xf32>
    %cst_261 = arith.constant dense<0.000000e+00> : vector<16xf32>
    %361 = vector.multi_reduction <add>, %360, %cst_261 [1] : vector<16x16xf32> to vector<16xf32>
    %362 = vector.shape_cast %361 : vector<16xf32> to vector<16x1xf32>
    %363 = tpu.reciprocal %362 {approx = true} : vector<16x1xf32> -> vector<16x1xf32>
    %364 = vector.broadcast %363 : vector<16x1xf32> to vector<16x16xf32>
    %365 = arith.mulf %360, %364 : vector<16x16xf32>
    %366 = arith.truncf %365 : vector<16x16xf32> to vector<16x16xbf16>
    %367 = arith.truncf %349 : vector<16x8xf32> to vector<16x8xbf16>
    %cst_262 = arith.constant dense<0.000000e+00> : vector<16x8xf32>
    %368 = tpu.matmul %366, %367, %cst_262 {dimension_numbers = #tpu.dot_dimension_numbers<[1], [0], [0], [1], [0, 0, 1, 1], [], []>} : vector<16x16xbf16>, vector<16x8xbf16>, vector<16x8xf32> -> vector<16x8xf32>
    %c1_263 = arith.constant 1 : index
    %c1_264 = arith.constant 1 : index
    %c0_265 = arith.constant 0 : index
    %c0_266 = arith.constant 0 : index
    %369 = vector.load %arg11[%c1_263, %c1_264, %c0_265, %c0_266] : memref<2x4x8x32xbf16, #tpu.memory_space<vmem>>, vector<1x1x8x32xbf16>
    %370 = vector.shape_cast %369 : vector<1x1x8x32xbf16> to vector<8x32xbf16>
    %371 = arith.truncf %368 : vector<16x8xf32> to vector<16x8xbf16>
    %cst_267 = arith.constant dense<0.000000e+00> : vector<16x32xf32>
    %372 = tpu.matmul %371, %370, %cst_267 {dimension_numbers = #tpu.dot_dimension_numbers<[1], [0], [0], [1], [0, 0, 1, 1], [], []>} : vector<16x8xbf16>, vector<8x32xbf16>, vector<16x32xf32> -> vector<16x32xf32>
    %373 = arith.addf %325, %372 : vector<16x32xf32>
    %c1_268 = arith.constant 1 : index
    %c2_269 = arith.constant 2 : index
    %c0_270 = arith.constant 0 : index
    %c0_271 = arith.constant 0 : index
    %374 = vector.load %arg5[%c1_268, %c2_269, %c0_270, %c0_271] : memref<2x4x32x8xbf16, #tpu.memory_space<vmem>>, vector<1x1x32x8xbf16>
    %375 = vector.shape_cast %374 : vector<1x1x32x8xbf16> to vector<32x8xbf16>
    %376 = arith.truncf %276 : vector<16x32xf32> to vector<16x32xbf16>
    %cst_272 = arith.constant dense<0.000000e+00> : vector<16x8xf32>
    %377 = tpu.matmul %376, %375, %cst_272 {dimension_numbers = #tpu.dot_dimension_numbers<[1], [0], [0], [1], [0, 0, 1, 1], [], []>} : vector<16x32xbf16>, vector<32x8xbf16>, vector<16x8xf32> -> vector<16x8xf32>
    %c1_273 = arith.constant 1 : index
    %c2_274 = arith.constant 2 : index
    %c0_275 = arith.constant 0 : index
    %c0_276 = arith.constant 0 : index
    %378 = vector.load %arg6[%c1_273, %c2_274, %c0_275, %c0_276] : memref<2x4x1x8xf32, #tpu.memory_space<vmem>>, vector<1x1x1x8xf32>
    %379 = vector.shape_cast %378 : vector<1x1x1x8xf32> to vector<1x8xf32>
    %380 = vector.broadcast %379 : vector<1x8xf32> to vector<16x8xf32>
    %381 = arith.addf %377, %380 : vector<16x8xf32>
    %c1_277 = arith.constant 1 : index
    %c2_278 = arith.constant 2 : index
    %c0_279 = arith.constant 0 : index
    %c0_280 = arith.constant 0 : index
    %382 = vector.load %arg7[%c1_277, %c2_278, %c0_279, %c0_280] : memref<2x4x32x8xbf16, #tpu.memory_space<vmem>>, vector<1x1x32x8xbf16>
    %383 = vector.shape_cast %382 : vector<1x1x32x8xbf16> to vector<32x8xbf16>
    %384 = arith.truncf %276 : vector<16x32xf32> to vector<16x32xbf16>
    %cst_281 = arith.constant dense<0.000000e+00> : vector<16x8xf32>
    %385 = tpu.matmul %384, %383, %cst_281 {dimension_numbers = #tpu.dot_dimension_numbers<[1], [0], [0], [1], [0, 0, 1, 1], [], []>} : vector<16x32xbf16>, vector<32x8xbf16>, vector<16x8xf32> -> vector<16x8xf32>
    %c1_282 = arith.constant 1 : index
    %c2_283 = arith.constant 2 : index
    %c0_284 = arith.constant 0 : index
    %c0_285 = arith.constant 0 : index
    %386 = vector.load %arg8[%c1_282, %c2_283, %c0_284, %c0_285] : memref<2x4x1x8xf32, #tpu.memory_space<vmem>>, vector<1x1x1x8xf32>
    %387 = vector.shape_cast %386 : vector<1x1x1x8xf32> to vector<1x8xf32>
    %388 = vector.broadcast %387 : vector<1x8xf32> to vector<16x8xf32>
    %389 = arith.addf %385, %388 : vector<16x8xf32>
    %c1_286 = arith.constant 1 : index
    %c2_287 = arith.constant 2 : index
    %c0_288 = arith.constant 0 : index
    %c0_289 = arith.constant 0 : index
    %390 = vector.load %arg9[%c1_286, %c2_287, %c0_288, %c0_289] : memref<2x4x32x8xbf16, #tpu.memory_space<vmem>>, vector<1x1x32x8xbf16>
    %391 = vector.shape_cast %390 : vector<1x1x32x8xbf16> to vector<32x8xbf16>
    %392 = arith.truncf %276 : vector<16x32xf32> to vector<16x32xbf16>
    %cst_290 = arith.constant dense<0.000000e+00> : vector<16x8xf32>
    %393 = tpu.matmul %392, %391, %cst_290 {dimension_numbers = #tpu.dot_dimension_numbers<[1], [0], [0], [1], [0, 0, 1, 1], [], []>} : vector<16x32xbf16>, vector<32x8xbf16>, vector<16x8xf32> -> vector<16x8xf32>
    %c1_291 = arith.constant 1 : index
    %c2_292 = arith.constant 2 : index
    %c0_293 = arith.constant 0 : index
    %c0_294 = arith.constant 0 : index
    %394 = vector.load %arg10[%c1_291, %c2_292, %c0_293, %c0_294] : memref<2x4x1x8xf32, #tpu.memory_space<vmem>>, vector<1x1x1x8xf32>
    %395 = vector.shape_cast %394 : vector<1x1x1x8xf32> to vector<1x8xf32>
    %396 = vector.broadcast %395 : vector<1x8xf32> to vector<16x8xf32>
    %397 = arith.addf %393, %396 : vector<16x8xf32>
    %398 = arith.truncf %381 : vector<16x8xf32> to vector<16x8xbf16>
    %399 = arith.truncf %389 : vector<16x8xf32> to vector<16x8xbf16>
    %cst_295 = arith.constant dense<0.000000e+00> : vector<16x16xf32>
    %400 = tpu.matmul %398, %399, %cst_295 {dimension_numbers = #tpu.dot_dimension_numbers<[1], [1], [0], [0], [0, 0, 1, 0], [], []>} : vector<16x8xbf16>, vector<16x8xbf16>, vector<16x16xf32> -> vector<16x16xf32>
    %cst_296 = arith.constant 0.353553385 : f32
    %401 = vector.broadcast %cst_296 : f32 to vector<16x16xf32>
    %402 = arith.mulf %400, %401 : vector<16x16xf32>
    %403 = arith.addf %402, %0 : vector<16x16xf32>
    %cst_297 = arith.constant dense<0xFF800000> : vector<16xf32>
    %404 = vector.multi_reduction <maximumf>, %403, %cst_297 [1] : vector<16x16xf32> to vector<16xf32>
    %405 = vector.shape_cast %404 : vector<16xf32> to vector<16x1xf32>
    %406 = vector.broadcast %405 : vector<16x1xf32> to vector<16x16xf32>
    %407 = arith.subf %403, %406 : vector<16x16xf32>
    %408 = math.exp %407 : vector<16x16xf32>
    %cst_298 = arith.constant dense<0.000000e+00> : vector<16xf32>
    %409 = vector.multi_reduction <add>, %408, %cst_298 [1] : vector<16x16xf32> to vector<16xf32>
    %410 = vector.shape_cast %409 : vector<16xf32> to vector<16x1xf32>
    %411 = tpu.reciprocal %410 {approx = true} : vector<16x1xf32> -> vector<16x1xf32>
    %412 = vector.broadcast %411 : vector<16x1xf32> to vector<16x16xf32>
    %413 = arith.mulf %408, %412 : vector<16x16xf32>
    %414 = arith.truncf %413 : vector<16x16xf32> to vector<16x16xbf16>
    %415 = arith.truncf %397 : vector<16x8xf32> to vector<16x8xbf16>
    %cst_299 = arith.constant dense<0.000000e+00> : vector<16x8xf32>
    %416 = tpu.matmul %414, %415, %cst_299 {dimension_numbers = #tpu.dot_dimension_numbers<[1], [0], [0], [1], [0, 0, 1, 1], [], []>} : vector<16x16xbf16>, vector<16x8xbf16>, vector<16x8xf32> -> vector<16x8xf32>
    %c1_300 = arith.constant 1 : index
    %c2_301 = arith.constant 2 : index
    %c0_302 = arith.constant 0 : index
    %c0_303 = arith.constant 0 : index
    %417 = vector.load %arg11[%c1_300, %c2_301, %c0_302, %c0_303] : memref<2x4x8x32xbf16, #tpu.memory_space<vmem>>, vector<1x1x8x32xbf16>
    %418 = vector.shape_cast %417 : vector<1x1x8x32xbf16> to vector<8x32xbf16>
    %419 = arith.truncf %416 : vector<16x8xf32> to vector<16x8xbf16>
    %cst_304 = arith.constant dense<0.000000e+00> : vector<16x32xf32>
    %420 = tpu.matmul %419, %418, %cst_304 {dimension_numbers = #tpu.dot_dimension_numbers<[1], [0], [0], [1], [0, 0, 1, 1], [], []>} : vector<16x8xbf16>, vector<8x32xbf16>, vector<16x32xf32> -> vector<16x32xf32>
    %421 = arith.addf %373, %420 : vector<16x32xf32>
    %c1_305 = arith.constant 1 : index
    %c3_306 = arith.constant 3 : index
    %c0_307 = arith.constant 0 : index
    %c0_308 = arith.constant 0 : index
    %422 = vector.load %arg5[%c1_305, %c3_306, %c0_307, %c0_308] : memref<2x4x32x8xbf16, #tpu.memory_space<vmem>>, vector<1x1x32x8xbf16>
    %423 = vector.shape_cast %422 : vector<1x1x32x8xbf16> to vector<32x8xbf16>
    %424 = arith.truncf %276 : vector<16x32xf32> to vector<16x32xbf16>
    %cst_309 = arith.constant dense<0.000000e+00> : vector<16x8xf32>
    %425 = tpu.matmul %424, %423, %cst_309 {dimension_numbers = #tpu.dot_dimension_numbers<[1], [0], [0], [1], [0, 0, 1, 1], [], []>} : vector<16x32xbf16>, vector<32x8xbf16>, vector<16x8xf32> -> vector<16x8xf32>
    %c1_310 = arith.constant 1 : index
    %c3_311 = arith.constant 3 : index
    %c0_312 = arith.constant 0 : index
    %c0_313 = arith.constant 0 : index
    %426 = vector.load %arg6[%c1_310, %c3_311, %c0_312, %c0_313] : memref<2x4x1x8xf32, #tpu.memory_space<vmem>>, vector<1x1x1x8xf32>
    %427 = vector.shape_cast %426 : vector<1x1x1x8xf32> to vector<1x8xf32>
    %428 = vector.broadcast %427 : vector<1x8xf32> to vector<16x8xf32>
    %429 = arith.addf %425, %428 : vector<16x8xf32>
    %c1_314 = arith.constant 1 : index
    %c3_315 = arith.constant 3 : index
    %c0_316 = arith.constant 0 : index
    %c0_317 = arith.constant 0 : index
    %430 = vector.load %arg7[%c1_314, %c3_315, %c0_316, %c0_317] : memref<2x4x32x8xbf16, #tpu.memory_space<vmem>>, vector<1x1x32x8xbf16>
    %431 = vector.shape_cast %430 : vector<1x1x32x8xbf16> to vector<32x8xbf16>
    %432 = arith.truncf %276 : vector<16x32xf32> to vector<16x32xbf16>
    %cst_318 = arith.constant dense<0.000000e+00> : vector<16x8xf32>
    %433 = tpu.matmul %432, %431, %cst_318 {dimension_numbers = #tpu.dot_dimension_numbers<[1], [0], [0], [1], [0, 0, 1, 1], [], []>} : vector<16x32xbf16>, vector<32x8xbf16>, vector<16x8xf32> -> vector<16x8xf32>
    %c1_319 = arith.constant 1 : index
    %c3_320 = arith.constant 3 : index
    %c0_321 = arith.constant 0 : index
    %c0_322 = arith.constant 0 : index
    %434 = vector.load %arg8[%c1_319, %c3_320, %c0_321, %c0_322] : memref<2x4x1x8xf32, #tpu.memory_space<vmem>>, vector<1x1x1x8xf32>
    %435 = vector.shape_cast %434 : vector<1x1x1x8xf32> to vector<1x8xf32>
    %436 = vector.broadcast %435 : vector<1x8xf32> to vector<16x8xf32>
    %437 = arith.addf %433, %436 : vector<16x8xf32>
    %c1_323 = arith.constant 1 : index
    %c3_324 = arith.constant 3 : index
    %c0_325 = arith.constant 0 : index
    %c0_326 = arith.constant 0 : index
    %438 = vector.load %arg9[%c1_323, %c3_324, %c0_325, %c0_326] : memref<2x4x32x8xbf16, #tpu.memory_space<vmem>>, vector<1x1x32x8xbf16>
    %439 = vector.shape_cast %438 : vector<1x1x32x8xbf16> to vector<32x8xbf16>
    %440 = arith.truncf %276 : vector<16x32xf32> to vector<16x32xbf16>
    %cst_327 = arith.constant dense<0.000000e+00> : vector<16x8xf32>
    %441 = tpu.matmul %440, %439, %cst_327 {dimension_numbers = #tpu.dot_dimension_numbers<[1], [0], [0], [1], [0, 0, 1, 1], [], []>} : vector<16x32xbf16>, vector<32x8xbf16>, vector<16x8xf32> -> vector<16x8xf32>
    %c1_328 = arith.constant 1 : index
    %c3_329 = arith.constant 3 : index
    %c0_330 = arith.constant 0 : index
    %c0_331 = arith.constant 0 : index
    %442 = vector.load %arg10[%c1_328, %c3_329, %c0_330, %c0_331] : memref<2x4x1x8xf32, #tpu.memory_space<vmem>>, vector<1x1x1x8xf32>
    %443 = vector.shape_cast %442 : vector<1x1x1x8xf32> to vector<1x8xf32>
    %444 = vector.broadcast %443 : vector<1x8xf32> to vector<16x8xf32>
    %445 = arith.addf %441, %444 : vector<16x8xf32>
    %446 = arith.truncf %429 : vector<16x8xf32> to vector<16x8xbf16>
    %447 = arith.truncf %437 : vector<16x8xf32> to vector<16x8xbf16>
    %cst_332 = arith.constant dense<0.000000e+00> : vector<16x16xf32>
    %448 = tpu.matmul %446, %447, %cst_332 {dimension_numbers = #tpu.dot_dimension_numbers<[1], [1], [0], [0], [0, 0, 1, 0], [], []>} : vector<16x8xbf16>, vector<16x8xbf16>, vector<16x16xf32> -> vector<16x16xf32>
    %cst_333 = arith.constant 0.353553385 : f32
    %449 = vector.broadcast %cst_333 : f32 to vector<16x16xf32>
    %450 = arith.mulf %448, %449 : vector<16x16xf32>
    %451 = arith.addf %450, %0 : vector<16x16xf32>
    %cst_334 = arith.constant dense<0xFF800000> : vector<16xf32>
    %452 = vector.multi_reduction <maximumf>, %451, %cst_334 [1] : vector<16x16xf32> to vector<16xf32>
    %453 = vector.shape_cast %452 : vector<16xf32> to vector<16x1xf32>
    %454 = vector.broadcast %453 : vector<16x1xf32> to vector<16x16xf32>
    %455 = arith.subf %451, %454 : vector<16x16xf32>
    %456 = math.exp %455 : vector<16x16xf32>
    %cst_335 = arith.constant dense<0.000000e+00> : vector<16xf32>
    %457 = vector.multi_reduction <add>, %456, %cst_335 [1] : vector<16x16xf32> to vector<16xf32>
    %458 = vector.shape_cast %457 : vector<16xf32> to vector<16x1xf32>
    %459 = tpu.reciprocal %458 {approx = true} : vector<16x1xf32> -> vector<16x1xf32>
    %460 = vector.broadcast %459 : vector<16x1xf32> to vector<16x16xf32>
    %461 = arith.mulf %456, %460 : vector<16x16xf32>
    %462 = arith.truncf %461 : vector<16x16xf32> to vector<16x16xbf16>
    %463 = arith.truncf %445 : vector<16x8xf32> to vector<16x8xbf16>
    %cst_336 = arith.constant dense<0.000000e+00> : vector<16x8xf32>
    %464 = tpu.matmul %462, %463, %cst_336 {dimension_numbers = #tpu.dot_dimension_numbers<[1], [0], [0], [1], [0, 0, 1, 1], [], []>} : vector<16x16xbf16>, vector<16x8xbf16>, vector<16x8xf32> -> vector<16x8xf32>
    %c1_337 = arith.constant 1 : index
    %c3_338 = arith.constant 3 : index
    %c0_339 = arith.constant 0 : index
    %c0_340 = arith.constant 0 : index
    %465 = vector.load %arg11[%c1_337, %c3_338, %c0_339, %c0_340] : memref<2x4x8x32xbf16, #tpu.memory_space<vmem>>, vector<1x1x8x32xbf16>
    %466 = vector.shape_cast %465 : vector<1x1x8x32xbf16> to vector<8x32xbf16>
    %467 = arith.truncf %464 : vector<16x8xf32> to vector<16x8xbf16>
    %cst_341 = arith.constant dense<0.000000e+00> : vector<16x32xf32>
    %468 = tpu.matmul %467, %466, %cst_341 {dimension_numbers = #tpu.dot_dimension_numbers<[1], [0], [0], [1], [0, 0, 1, 1], [], []>} : vector<16x8xbf16>, vector<8x32xbf16>, vector<16x32xf32> -> vector<16x32xf32>
    %469 = arith.addf %421, %468 : vector<16x32xf32>
    %c1_342 = arith.constant 1 : index
    %c0_343 = arith.constant 0 : index
    %c0_344 = arith.constant 0 : index
    %470 = vector.load %arg12[%c1_342, %c0_343, %c0_344] : memref<2x1x32xf32, #tpu.memory_space<vmem>>, vector<1x1x32xf32>
    %471 = vector.shape_cast %470 : vector<1x1x32xf32> to vector<1x32xf32>
    %472 = vector.broadcast %471 : vector<1x32xf32> to vector<16x32xf32>
    %473 = arith.addf %469, %472 : vector<16x32xf32>
    %474 = arith.addf %276, %473 : vector<16x32xf32>
    %c1_345 = arith.constant 1 : index
    %c0_346 = arith.constant 0 : index
    %c0_347 = arith.constant 0 : index
    %475 = vector.load %arg13[%c1_345, %c0_346, %c0_347] : memref<2x1x32xf32, #tpu.memory_space<vmem>>, vector<1x1x32xf32>
    %476 = vector.shape_cast %475 : vector<1x1x32xf32> to vector<1x32xf32>
    %c1_348 = arith.constant 1 : index
    %c0_349 = arith.constant 0 : index
    %c0_350 = arith.constant 0 : index
    %477 = vector.load %arg14[%c1_348, %c0_349, %c0_350] : memref<2x1x32xf32, #tpu.memory_space<vmem>>, vector<1x1x32xf32>
    %478 = vector.shape_cast %477 : vector<1x1x32xf32> to vector<1x32xf32>
    %cst_351 = arith.constant dense<0.000000e+00> : vector<16xf32>
    %479 = vector.multi_reduction <add>, %474, %cst_351 [1] : vector<16x32xf32> to vector<16xf32>
    %480 = vector.shape_cast %479 : vector<16xf32> to vector<16x1xf32>
    %cst_352 = arith.constant 3.200000e+01 : f32
    %481 = vector.broadcast %cst_352 : f32 to vector<16x1xf32>
    %482 = arith.divf %480, %481 : vector<16x1xf32>
    %483 = vector.broadcast %482 : vector<16x1xf32> to vector<16x32xf32>
    %484 = arith.subf %474, %483 : vector<16x32xf32>
    %485 = arith.mulf %484, %484 : vector<16x32xf32>
    %cst_353 = arith.constant dense<0.000000e+00> : vector<16xf32>
    %486 = vector.multi_reduction <add>, %485, %cst_353 [1] : vector<16x32xf32> to vector<16xf32>
    %487 = vector.shape_cast %486 : vector<16xf32> to vector<16x1xf32>
    %cst_354 = arith.constant 3.200000e+01 : f32
    %488 = vector.broadcast %cst_354 : f32 to vector<16x1xf32>
    %489 = arith.divf %487, %488 : vector<16x1xf32>
    %490 = vector.broadcast %482 : vector<16x1xf32> to vector<16x32xf32>
    %491 = arith.subf %474, %490 : vector<16x32xf32>
    %cst_355 = arith.constant 9.99999974E-6 : f32
    %492 = vector.broadcast %cst_355 : f32 to vector<16x1xf32>
    %493 = arith.addf %489, %492 : vector<16x1xf32>
    %494 = math.rsqrt %493 : vector<16x1xf32>
    %495 = vector.broadcast %494 : vector<16x1xf32> to vector<16x32xf32>
    %496 = arith.mulf %491, %495 : vector<16x32xf32>
    %497 = vector.broadcast %476 : vector<1x32xf32> to vector<16x32xf32>
    %498 = arith.mulf %496, %497 : vector<16x32xf32>
    %499 = vector.broadcast %478 : vector<1x32xf32> to vector<16x32xf32>
    %500 = arith.addf %498, %499 : vector<16x32xf32>
    %c1_356 = arith.constant 1 : index
    %c0_357 = arith.constant 0 : index
    %c0_358 = arith.constant 0 : index
    %501 = vector.load %arg17[%c1_356, %c0_357, %c0_358] : memref<2x32x32xbf16, #tpu.memory_space<vmem>>, vector<1x32x32xbf16>
    %502 = vector.shape_cast %501 : vector<1x32x32xbf16> to vector<32x32xbf16>
    %503 = arith.truncf %500 : vector<16x32xf32> to vector<16x32xbf16>
    %cst_359 = arith.constant dense<0.000000e+00> : vector<16x32xf32>
    %504 = tpu.matmul %503, %502, %cst_359 {dimension_numbers = #tpu.dot_dimension_numbers<[1], [0], [0], [1], [0, 0, 1, 1], [], []>} : vector<16x32xbf16>, vector<32x32xbf16>, vector<16x32xf32> -> vector<16x32xf32>
    %c1_360 = arith.constant 1 : index
    %c0_361 = arith.constant 0 : index
    %c0_362 = arith.constant 0 : index
    %505 = vector.load %arg18[%c1_360, %c0_361, %c0_362] : memref<2x1x32xf32, #tpu.memory_space<vmem>>, vector<1x1x32xf32>
    %506 = vector.shape_cast %505 : vector<1x1x32xf32> to vector<1x32xf32>
    %507 = vector.broadcast %506 : vector<1x32xf32> to vector<16x32xf32>
    %508 = arith.addf %504, %507 : vector<16x32xf32>
    %cst_363 = arith.constant 0.000000e+00 : f32
    %509 = vector.broadcast %cst_363 : f32 to vector<16x32xf32>
    %510 = arith.maximumf %508, %509 : vector<16x32xf32>
    %c1_364 = arith.constant 1 : index
    %c0_365 = arith.constant 0 : index
    %c0_366 = arith.constant 0 : index
    %511 = vector.load %arg19[%c1_364, %c0_365, %c0_366] : memref<2x32x32xbf16, #tpu.memory_space<vmem>>, vector<1x32x32xbf16>
    %512 = vector.shape_cast %511 : vector<1x32x32xbf16> to vector<32x32xbf16>
    %513 = arith.truncf %510 : vector<16x32xf32> to vector<16x32xbf16>
    %cst_367 = arith.constant dense<0.000000e+00> : vector<16x32xf32>
    %514 = tpu.matmul %513, %512, %cst_367 {dimension_numbers = #tpu.dot_dimension_numbers<[1], [0], [0], [1], [0, 0, 1, 1], [], []>} : vector<16x32xbf16>, vector<32x32xbf16>, vector<16x32xf32> -> vector<16x32xf32>
    %c1_368 = arith.constant 1 : index
    %c0_369 = arith.constant 0 : index
    %c0_370 = arith.constant 0 : index
    %515 = vector.load %arg20[%c1_368, %c0_369, %c0_370] : memref<2x1x32xf32, #tpu.memory_space<vmem>>, vector<1x1x32xf32>
    %516 = vector.shape_cast %515 : vector<1x1x32xf32> to vector<1x32xf32>
    %517 = vector.broadcast %516 : vector<1x32xf32> to vector<16x32xf32>
    %518 = arith.addf %514, %517 : vector<16x32xf32>
    %519 = arith.addf %500, %518 : vector<16x32xf32>
    %c1_371 = arith.constant 1 : index
    %c0_372 = arith.constant 0 : index
    %c0_373 = arith.constant 0 : index
    %520 = vector.load %arg15[%c1_371, %c0_372, %c0_373] : memref<2x1x32xf32, #tpu.memory_space<vmem>>, vector<1x1x32xf32>
    %521 = vector.shape_cast %520 : vector<1x1x32xf32> to vector<1x32xf32>
    %c1_374 = arith.constant 1 : index
    %c0_375 = arith.constant 0 : index
    %c0_376 = arith.constant 0 : index
    %522 = vector.load %arg16[%c1_374, %c0_375, %c0_376] : memref<2x1x32xf32, #tpu.memory_space<vmem>>, vector<1x1x32xf32>
    %523 = vector.shape_cast %522 : vector<1x1x32xf32> to vector<1x32xf32>
    %cst_377 = arith.constant dense<0.000000e+00> : vector<16xf32>
    %524 = vector.multi_reduction <add>, %519, %cst_377 [1] : vector<16x32xf32> to vector<16xf32>
    %525 = vector.shape_cast %524 : vector<16xf32> to vector<16x1xf32>
    %cst_378 = arith.constant 3.200000e+01 : f32
    %526 = vector.broadcast %cst_378 : f32 to vector<16x1xf32>
    %527 = arith.divf %525, %526 : vector<16x1xf32>
    %528 = vector.broadcast %527 : vector<16x1xf32> to vector<16x32xf32>
    %529 = arith.subf %519, %528 : vector<16x32xf32>
    %530 = arith.mulf %529, %529 : vector<16x32xf32>
    %cst_379 = arith.constant dense<0.000000e+00> : vector<16xf32>
    %531 = vector.multi_reduction <add>, %530, %cst_379 [1] : vector<16x32xf32> to vector<16xf32>
    %532 = vector.shape_cast %531 : vector<16xf32> to vector<16x1xf32>
    %cst_380 = arith.constant 3.200000e+01 : f32
    %533 = vector.broadcast %cst_380 : f32 to vector<16x1xf32>
    %534 = arith.divf %532, %533 : vector<16x1xf32>
    %535 = vector.broadcast %527 : vector<16x1xf32> to vector<16x32xf32>
    %536 = arith.subf %519, %535 : vector<16x32xf32>
    %cst_381 = arith.constant 9.99999974E-6 : f32
    %537 = vector.broadcast %cst_381 : f32 to vector<16x1xf32>
    %538 = arith.addf %534, %537 : vector<16x1xf32>
    %539 = math.rsqrt %538 : vector<16x1xf32>
    %540 = vector.broadcast %539 : vector<16x1xf32> to vector<16x32xf32>
    %541 = arith.mulf %536, %540 : vector<16x32xf32>
    %542 = vector.broadcast %521 : vector<1x32xf32> to vector<16x32xf32>
    %543 = arith.mulf %541, %542 : vector<16x32xf32>
    %544 = vector.broadcast %523 : vector<1x32xf32> to vector<16x32xf32>
    %545 = arith.addf %543, %544 : vector<16x32xf32>
    %c0_382 = arith.constant 0 : index
    %c0_383 = arith.constant 0 : index
    %546 = vector.load %arg21[%c0_382, %c0_383] : memref<16x32xf32, #tpu.memory_space<vmem>>, vector<16x32xf32>
    tpu.vector_store %arg21[%c0_382, %c0_383], %545 {strides = array<i32>} : memref<16x32xf32, #tpu.memory_space<vmem>>, vector<16x32xf32>,
    return
  }
  func.func @transform_0(%arg0: i32) -> (i32, i32) {
    %c0_i32 = arith.constant 0 : i32
    %c0_i32_0 = arith.constant 0 : i32
    return %arg0, %c0_i32 : i32, i32
  }
  func.func @transform_1(%arg0: i32) -> (i32, i32) {
    %c0_i32 = arith.constant 0 : i32
    %c0_i32_0 = arith.constant 0 : i32
    %c0_i32_1 = arith.constant 0 : i32
    return %c0_i32, %c0_i32_0 : i32, i32
  }
  func.func @transform_2(%arg0: i32) -> (i32, i32) {
    %c0_i32 = arith.constant 0 : i32
    %c0_i32_0 = arith.constant 0 : i32
    %c0_i32_1 = arith.constant 0 : i32
    return %c0_i32, %c0_i32_0 : i32, i32
  }
  func.func @transform_3(%arg0: i32) -> (i32, i32) {
    %c0_i32 = arith.constant 0 : i32
    %c0_i32_0 = arith.constant 0 : i32
    %c0_i32_1 = arith.constant 0 : i32
    return %c0_i32, %c0_i32_0 : i32, i32
  }
  func.func @transform_4(%arg0: i32) -> (i32, i32, i32, i32) {
    %c0_i32 = arith.constant 0 : i32
    %c0_i32_0 = arith.constant 0 : i32
    %c0_i32_1 = arith.constant 0 : i32
    %c0_i32_2 = arith.constant 0 : i32
    %c0_i32_3 = arith.constant 0 : i32
    return %c0_i32, %c0_i32_0, %c0_i32_1, %c0_i32_2 : i32, i32, i32, i32
  }
  func.func @transform_5(%arg0: i32) -> (i32, i32, i32, i32) {
    %c0_i32 = arith.constant 0 : i32
    %c0_i32_0 = arith.constant 0 : i32
    %c0_i32_1 = arith.constant 0 : i32
    %c0_i32_2 = arith.constant 0 : i32
    %c0_i32_3 = arith.constant 0 : i32
    return %c0_i32, %c0_i32_0, %c0_i32_1, %c0_i32_2 : i32, i32, i32, i32
  }
  func.func @transform_6(%arg0: i32) -> (i32, i32, i32, i32) {
    %c0_i32 = arith.constant 0 : i32
    %c0_i32_0 = arith.constant 0 : i32
    %c0_i32_1 = arith.constant 0 : i32
    %c0_i32_2 = arith.constant 0 : i32
    %c0_i32_3 = arith.constant 0 : i32
    return %c0_i32, %c0_i32_0, %c0_i32_1, %c0_i32_2 : i32, i32, i32, i32
  }
  func.func @transform_7(%arg0: i32) -> (i32, i32, i32, i32) {
    %c0_i32 = arith.constant 0 : i32
    %c0_i32_0 = arith.constant 0 : i32
    %c0_i32_1 = arith.constant 0 : i32
    %c0_i32_2 = arith.constant 0 : i32
    %c0_i32_3 = arith.constant 0 : i32
    return %c0_i32, %c0_i32_0, %c0_i32_1, %c0_i32_2 : i32, i32, i32, i32
  }
  func.func @transform_8(%arg0: i32) -> (i32, i32, i32, i32) {
    %c0_i32 = arith.constant 0 : i32
    %c0_i32_0 = arith.constant 0 : i32
    %c0_i32_1 = arith.constant 0 : i32
    %c0_i32_2 = arith.constant 0 : i32
    %c0_i32_3 = arith.constant 0 : i32
    return %c0_i32, %c0_i32_0, %c0_i32_1, %c0_i32_2 : i32, i32, i32, i32
  }
  func.func @transform_9(%arg0: i32) -> (i32, i32, i32, i32) {
    %c0_i32 = arith.constant 0 : i32
    %c0_i32_0 = arith.constant 0 : i32
    %c0_i32_1 = arith.constant 0 : i32
    %c0_i32_2 = arith.constant 0 : i32
    %c0_i32_3 = arith.constant 0 : i32
    return %c0_i32, %c0_i32_0, %c0_i32_1, %c0_i32_2 : i32, i32, i32, i32
  }
  func.func @transform_10(%arg0: i32) -> (i32, i32, i32, i32) {
    %c0_i32 = arith.constant 0 : i32
    %c0_i32_0 = arith.constant 0 : i32
    %c0_i32_1 = arith.constant 0 : i32
    %c0_i32_2 = arith.constant 0 : i32
    %c0_i32_3 = arith.constant 0 : i32
    return %c0_i32, %c0_i32_0, %c0_i32_1, %c0_i32_2 : i32, i32, i32, i32
  }
  func.func @transform_11(%arg0: i32) -> (i32, i32, i32) {
    %c0_i32 = arith.constant 0 : i32
    %c0_i32_0 = arith.constant 0 : i32
    %c0_i32_1 = arith.constant 0 : i32
    %c0_i32_2 = arith.constant 0 : i32
    return %c0_i32, %c0_i32_0, %c0_i32_1 : i32, i32, i32
  }
  func.func @transform_12(%arg0: i32) -> (i32, i32, i32) {
    %c0_i32 = arith.constant 0 : i32
    %c0_i32_0 = arith.constant 0 : i32
    %c0_i32_1 = arith.constant 0 : i32
    %c0_i32_2 = arith.constant 0 : i32
    return %c0_i32, %c0_i32_0, %c0_i32_1 : i32, i32, i32
  }
  func.func @transform_13(%arg0: i32) -> (i32, i32, i32) {
    %c0_i32 = arith.constant 0 : i32
    %c0_i32_0 = arith.constant 0 : i32
    %c0_i32_1 = arith.constant 0 : i32
    %c0_i32_2 = arith.constant 0 : i32
    return %c0_i32, %c0_i32_0, %c0_i32_1 : i32, i32, i32
  }
  func.func @transform_14(%arg0: i32) -> (i32, i32, i32) {
    %c0_i32 = arith.constant 0 : i32
    %c0_i32_0 = arith.constant 0 : i32
    %c0_i32_1 = arith.constant 0 : i32
    %c0_i32_2 = arith.constant 0 : i32
    return %c0_i32, %c0_i32_0, %c0_i32_1 : i32, i32, i32
  }
  func.func @transform_15(%arg0: i32) -> (i32, i32, i32) {
    %c0_i32 = arith.constant 0 : i32
    %c0_i32_0 = arith.constant 0 : i32
    %c0_i32_1 = arith.constant 0 : i32
    %c0_i32_2 = arith.constant 0 : i32
    return %c0_i32, %c0_i32_0, %c0_i32_1 : i32, i32, i32
  }
  func.func @transform_16(%arg0: i32) -> (i32, i32, i32) {
    %c0_i32 = arith.constant 0 : i32
    %c0_i32_0 = arith.constant 0 : i32
    %c0_i32_1 = arith.constant 0 : i32
    %c0_i32_2 = arith.constant 0 : i32
    return %c0_i32, %c0_i32_0, %c0_i32_1 : i32, i32, i32
  }
  func.func @transform_17(%arg0: i32) -> (i32, i32, i32) {
    %c0_i32 = arith.constant 0 : i32
    %c0_i32_0 = arith.constant 0 : i32
    %c0_i32_1 = arith.constant 0 : i32
    %c0_i32_2 = arith.constant 0 : i32
    return %c0_i32, %c0_i32_0, %c0_i32_1 : i32, i32, i32
  }
  func.func @transform_18(%arg0: i32) -> (i32, i32, i32) {
    %c0_i32 = arith.constant 0 : i32
    %c0_i32_0 = arith.constant 0 : i32
    %c0_i32_1 = arith.constant 0 : i32
    %c0_i32_2 = arith.constant 0 : i32
    return %c0_i32, %c0_i32_0, %c0_i32_1 : i32, i32, i32
  }
  func.func @transform_19(%arg0: i32) -> (i32, i32, i32) {
    %c0_i32 = arith.constant 0 : i32
    %c0_i32_0 = arith.constant 0 : i32
    %c0_i32_1 = arith.constant 0 : i32
    %c0_i32_2 = arith.constant 0 : i32
    return %c0_i32, %c0_i32_0, %c0_i32_1 : i32, i32, i32
  }
  func.func @transform_20(%arg0: i32) -> (i32, i32) {
    %c0_i32 = arith.constant 0 : i32
    %c0_i32_0 = arith.constant 0 : i32
    return %arg0, %c0_i32 : i32, i32
  }
}

</mosaic_0001>

<bundles_post_ra>
// kernel: transformer_model_forward.3
= control target key start
LH: loop header
LB: loop body
LE: loop exit
PB: predicated region body
PF: predicated region fallthrough
CT: control target
= control target key end

     0   :  { %v340_v2 = vmov 0.0   ;;  %vm34_vm0 = vcmask 254976   ;;  %vm341_vm1 = vmmov 0   ;;  %s490_s0 = inlined_call_operand.vmem [shape: f32[16,2,32], index: 0, kind: input, shape index: {}]   ;;  %s491_s1 = inlined_call_operand.vmem [shape: f32[32,5], index: 1, kind: input, shape index: {}]   ;;  %s492_s2 = inlined_call_operand.vmem [shape: f32[32,5], index: 2, kind: input, shape index: {}]   ;;  %s493_s3 = inlined_call_operand.vmem [shape: f32[1,5], index: 3, kind: input, shape index: {}]   ;;  %s494_s4 = inlined_call_operand.hbm [shape: f32[2,5], index: 4, kind: output, shape index: {}]  }
   0x1   :  { %v103_v0 = vld [vmem:[%s491_s1 + $0x18] sm:$0xff]  ;;  %304 = vmatprep.subr.mxu1 %v340_v2  ;;  %293 = vmatprep.subr.mxu0 %v340_v2  ;;  %v102_v3 = vld [vmem:[%s491_s1 + $0x10] sm:$0xff]  ;;  %v101_v5 = vld [vmem:[%s491_s1 + $0x8] sm:$0xff] }
   0x2   :  { %v108_v1 = vld [vmem:[%s492_s2 + $0x18] sm:$0xff]  ;;  %v107_v4 = vld [vmem:[%s492_s2 + $0x10] sm:$0xff]  ;;  %305 = vmatpush3.msra.mxu1 %v103_v0  ;;  %v106_v6 = vld [vmem:[%s492_s2 + $0x8] sm:$0xff]  ;;  %312 = vmatprep.mubr.msk.f32.mxu1 %vm341_vm1, %v340_v2 }
   0x3   :  { %294 = vmatpush3.msra.mxu0 %v108_v1  ;;  %306 = vmatprep.subr.mxu1 %v340_v2  ;;  %v100_v7 = vld [vmem:[%s491_s1] sm:$0xff]  ;;  %v22_v12 = vld [vmem:[%s490_s0 + $0x8] sm:$0x3]  ;;  %v23_v13 = vld [vmem:[%s490_s0 + $0xa] sm:$0x3] }
   0x4   :  { %295 = vmatprep.subr.mxu0 %v340_v2  ;;  %307 = vmatpush3.msra.mxu1 %v102_v3  ;;  %v18_v8 = vld [vmem:[%s490_s0] sm:$0x3]  ;;  %v19_v9 = vld [vmem:[%s490_s0 + $0x2] sm:$0x3]  ;;  %v20_v10 = vld [vmem:[%s490_s0 + $0x4] sm:$0x3] }
   0x5   :  { %296 = vmatpush3.msra.mxu0 %v107_v4  ;;  %308 = vmatprep.subr.mxu1 %v340_v2  ;;  %v21_v11 = vld [vmem:[%s490_s0 + $0x6] sm:$0x3]  ;;  %v24_v14 = vld [vmem:[%s490_s0 + $0xc] sm:$0x3]  ;;  %v413_v15 = vld [vmem:[%s490_s0 + $0xe] sm:$0x3] }
   0x6   :  { %297 = vmatprep.subr.mxu0 %v340_v2  ;;  %309 = vmatpush3.msra.mxu1 %v101_v5  ;;  %v26_v16 = vld [vmem:[%s490_s0 + $0x10] sm:$0x3]  ;;  %v422_v17 = vld [vmem:[%s490_s0 + $0x12] sm:$0x3]  ;;  %v35_v18 = vsel %vm34_vm0, %v18_v8, -inf  ;;  %v36_v19 = vsel %vm34_vm0, %v19_v9, -inf }
   0x7   :  { %298 = vmatpush3.msra.mxu0 %v106_v6  ;;  %310 = vmatprep.subr.mxu1 %v340_v2  ;;  %v28_v20 = vld [vmem:[%s490_s0 + $0x14] sm:$0x3]  ;;  %v29_v21 = vld [vmem:[%s490_s0 + $0x16] sm:$0x3]  ;;  %v37_v22 = vsel %vm34_vm0, %v20_v10, -inf  ;;  %v38_v23 = vsel %vm34_vm0, %v21_v11, -inf }
   0x8   :  { %311 = vmatpush3.msra.mxu1 %v100_v7  ;;  %299 = vmatprep.subr.mxu0 %v340_v2  ;;  %v39_v24 = vsel %vm34_vm0, %v22_v12, -inf  ;;  %v41_v25 = vsel %vm34_vm0, %v23_v13, -inf  ;;  %v105_v26 = vld [vmem:[%s492_s2] sm:$0xff]  ;;  %v31_v27 = vld [vmem:[%s490_s0 + $0x1a] sm:$0x3]  ;;  %v43_v30 = vsel %vm34_vm0, %v24_v14, -inf }
   0x9   :  { %v40_v28 = vmax.f32 %v35_v18, %v39_v24  ;;  %v42_v29 = vmax.f32 %v36_v19, %v41_v25  ;;  %v45_v31 = vsel %vm34_vm0, %v413_v15, -inf  ;;  %300 = vmatpush3.msra.mxu0 %v105_v26  ;;  %301 = vmatprep.mubr.msk.f32.mxu0 %vm341_vm1, %v340_v2 }
   0xa   :  { %9 = vsyncpa [#allocation3], 0  ;;  %v32_v32 = vld [vmem:[%s490_s0 + $0x1c] sm:$0x3]  ;;  %v33_v33 = vld [vmem:[%s490_s0 + $0x1e] sm:$0x3]  ;;  %v44_v34 = vmax.f32 %v37_v22, %v43_v30  ;;  %v46_v35 = vmax.f32 %v38_v23, %v45_v31 }
   0xb   :  { %v47_v36 = vsel %vm34_vm0, %v26_v16, -inf  ;;  %v49_v37 = vsel %vm34_vm0, %v422_v17, -inf  ;;  %v30_v38 = vld [vmem:[%s490_s0 + $0x18] sm:$0x3]  ;;  %v51_v41 = vsel %vm34_vm0, %v28_v20, -inf  ;;  %v53_v42 = vsel %vm34_vm0, %v29_v21, -inf }
   0xc   :  { %v48_v39 = vmax.f32 %v40_v28, %v47_v36  ;;  %v50_v40 = vmax.f32 %v42_v29, %v49_v37  ;;  %v52_v43 = vmax.f32 %v44_v34, %v51_v41  ;;  %v54_v44 = vmax.f32 %v46_v35, %v53_v42  ;;  %v282_v30 = vld [vmem:[%s493_s3] ss:$0 sm:$0xff]  ;;  %s342_s10 = smov [#allocation2]  }
   0xd   :  { %v55_v45 = vsel %vm34_vm0, %v30_v38, -inf  ;;  %v57_v46 = vsel %vm34_vm0, %v31_v27, -inf  ;;  %v59_v49 = vsel %vm34_vm0, %v32_v32, -inf  ;;  %v61_v50 = vsel %vm34_vm0, %v33_v33, -inf  ;;  %s272_s1 = sshll.u32 %s342_s10, 4  ;;  %s273_s1 = int_to_ptr.vmem [resolvable:$true] %s272_s1 }
   0xe   :  { %v56_v47 = vmax.f32 %v48_v39, %v55_v45  ;;  %v58_v48 = vmax.f32 %v50_v40, %v57_v46  ;;  %v60_v51 = vmax.f32 %v52_v43, %v59_v49  ;;  %v62_v52 = vmax.f32 %v54_v44, %v61_v50  ;;  %s318_s11 = scalar_lea.vmem %s273_s1, 32  ;;  %p323_p1 = scmp.lt.s32.totalorder %s273_s1, %s273_s1 }
   0xf   :  { %v66_v53 = vsel %vm34_vm0, %v18_v8, 0.0  ;;  %v67_v54 = vsel %vm34_vm0, %v19_v9, 0.0  ;;  %v69_v57 = vsel %vm34_vm0, %v20_v10, 0.0  ;;  %v71_v59 = vsel %vm34_vm0, %v21_v11, 0.0  ;;  %p319_p0 = scmp.ne.s32.totalorder %s273_s1, %s318_s11  ;;  %p324_p2 = scmp.lt.s32.totalorder %s318_s11, %s318_s11 }
  0x10   :  { %v63_v55 = vmax.f32 %v56_v47, %v58_v48  ;;  %v68_v56 = vadd.f32 %v67_v54, %v66_v53  ;;  %v64_v58 = vmax.f32 %v60_v51, %v62_v52  ;;  %v73_v62 = vsel %vm34_vm0, %v22_v12, 0.0 }
  0x11   :  { %vm109_vm2 = vcmask 261120   ;;  %v75_v0 = vsel %vm34_vm0, %v23_v13, 0.0  ;;  %v77_v3 = vsel %vm34_vm0, %v24_v14, 0.0  ;;  %v79_v5 = vsel %vm34_vm0, %v413_v15, 0.0  ;;  %p325_p3 = por %p324_p2, %p323_p1 }
  0x12   :  { %v70_v60 = vadd.f32 %v69_v57, %v68_v56  ;;  %v65_v61 = vmax.f32 %v63_v55, %v64_v58  ;;  %v81_v7 = vsel %vm34_vm0, %v26_v16, 0.0  ;;  %v83_v9 = vsel %vm34_vm0, %v422_v17, 0.0 }
  0x13   :  { %v85_v11 = vsel %vm34_vm0, %v28_v20, 0.0  ;;  %v87_v13 = vsel %vm34_vm0, %v29_v21, 0.0  ;;  %v89_v18 = vsel %vm34_vm0, %v30_v38, 0.0  ;;  %v91_v22 = vsel %vm34_vm0, %v31_v27, 0.0  ;;  %p326_p4 = pnand %p325_p3, %p319_p0 }
  0x14   :  { %v72_v63 = vadd.f32 %v71_v59, %v70_v60  ;;  %v99_v1 = vmul.f32 0.999995, %v65_v61  ;;  %v93_v23 = vsel %vm34_vm0, %v32_v32, 0.0  ;;  %v95_v24 = vsel %vm34_vm0, %v33_v33, 0.0 }
  0x15   :  { %vm264_vm3 = vcmask 33792  }
  0x16   :  { %v74_v2 = vadd.f32 %v73_v62, %v72_v63  ;;  %313 = vmatmul.mubr.msk.f32.vlgmr.msra.gmra.mxu1 %vm109_vm2, %v99_v1 }
  0x18   :  { %v76_v4 = vadd.f32 %v75_v0, %v74_v2 }
  0x1a   :  { %v78_v6 = vadd.f32 %v77_v3, %v76_v4 }
  0x1c   :  { %v80_v8 = vadd.f32 %v79_v5, %v78_v6 }
  0x1e   :  { %v82_v10 = vadd.f32 %v81_v7, %v80_v8 }
  0x20   :  { %v84_v12 = vadd.f32 %v83_v9, %v82_v10 }
  0x22   :  { %v86_v14 = vadd.f32 %v85_v11, %v84_v12 }
  0x24   :  { %v88_v19 = vadd.f32 %v87_v13, %v86_v14 }
  0x26   :  { %v90_v15 = vadd.f32 %v89_v18, %v88_v19 }
  0x28   :  { %v92_v16 = vadd.f32 %v91_v22, %v90_v15 }
  0x2a   :  { %v94_v25 = vadd.f32 %v93_v23, %v92_v16 }
  0x2c   :  { %v96_v17 = vadd.f32 %v95_v24, %v94_v25 }
  0x2e   :  { %v98_v26 = vmul.f32 0.0625, %v96_v17 }
  0x30   :  { %v104_v28 = vmul.f32 0.999995, %v98_v26 }
  0x32   :  { %302 = vmatmul.mubr.msk.f32.vlgmr.msra.gmra.mxu0 %vm109_vm2, %v104_v28 }
  0xd6   :  { %v252_v20 = vpop.f32.mrf.mxu1 }
  0xd8   :  { %v314_v21 = vpop.f32.mrf.mxu1 }
  0xf2   :  { %v179_v29 = vpop.f32.mrf.mxu0 }
  0xf3   :  { %v253_v27 = vadd.f32 %v252_v20, %v179_v29 }
  0xf4   :  { %v303_v31 = vpop.f32.mrf.mxu0 }
  0xf5   :  { %v263_v32 = vadd.f32 %v282_v30, %v253_v27 }
  0xf7   :  { %265 = vst.msk [vmem:[#allocation2] sm:$0x3] %vm264_vm3, %v263_v32 }
  0xf8   :  { %329 = shalt.err (!%p326_p4)
}
  0xf9   :  { %275 = dma.vmem_to_hbm [thread:$0]  %s273_s1, 32, %s494_s4, [#allocation3]  }
  0xfa   :  { %338 = dma.done.wait [#allocation3], 32  }
  0xfb   :  { %339 = vsyncadd [#allocation3], 4294967264 }
  0xfc   :  { %279 = vsyncpa [#allocation3], 1 }

// kernel: transformer_model_forward.2
= control target key start
LH: loop header
LB: loop body
LE: loop exit
PB: predicated region body
PF: predicated region fallthrough
CT: control target
= control target key end

     0   :  { %s6033_s0 = inlined_call_operand.vmem [shape: f32[32,4], index: 0, kind: input, shape index: {}]   ;;  %s6034_s1 = inlined_call_operand.vmem [shape: f32[16,16], index: 1, kind: input, shape index: {}]   ;;  %s6035_s2 = inlined_call_operand.vmem [shape: bf16[4,32], index: 2, kind: input, shape index: {}]   ;;  %s6036_s3 = inlined_call_operand.vmem [shape: f32[1,32], index: 3, kind: input, shape index: {}]   ;;  %s6037_s4 = inlined_call_operand.vmem [shape: bf16[2,4,32,8], index: 4, kind: input, shape index: {}]   ;;  %s6038_s5 = inlined_call_operand.vmem [shape: f32[2,4,1,8], index: 5, kind: input, shape index: {}]   ;;  %s6039_s6 = inlined_call_operand.vmem [shape: bf16[2,4,32,8], index: 6, kind: input, shape index: {}]   ;;  %s6040_s7 = inlined_call_operand.vmem [shape: f32[2,4,1,8], index: 7, kind: input, shape index: {}]   ;;  %s6041_s8 = inlined_call_operand.vmem [shape: bf16[2,4,32,8], index: 8, kind: input, shape index: {}]   ;;  %s6042_s9 = inlined_call_operand.vmem [shape: f32[2,4,1,8], index: 9, kind: input, shape index: {}]   ;;  %s6043_s10 = inlined_call_operand.vmem [shape: bf16[2,4,8,32], index: 10, kind: input, shape index: {}]   ;;  %s6044_s11 = inlined_call_operand.vmem [shape: f32[2,1,32], index: 11, kind: input, shape index: {}]   ;;  %s6045_s12 = inlined_call_operand.vmem [shape: f32[2,1,32], index: 12, kind: input, shape index: {}]   ;;  %s6046_s13 = inlined_call_operand.vmem [shape: f32[2,1,32], index: 13, kind: input, shape index: {}]   ;;  %s6047_s14 = inlined_call_operand.vmem [shape: f32[2,1,32], index: 14, kind: input, shape index: {}]   ;;  %s6048_s15 = inlined_call_operand.vmem [shape: f32[2,1,32], index: 15, kind: input, shape index: {}]   ;;  %s6049_s16 = inlined_call_operand.vmem [shape: bf16[2,32,32], index: 16, kind: input, shape index: {}]   ;;  %s6050_s17 = inlined_call_operand.vmem [shape: f32[2,1,32], index: 17, kind: input, shape index: {}]   ;;  %s6051_s18 = inlined_call_operand.vmem [shape: bf16[2,32,32], index: 18, kind: input, shape index: {}]   ;;  %s6052_s19 = inlined_call_operand.vmem [shape: f32[2,1,32], index: 19, kind: input, shape index: {}]   ;;  %s6053_s20 = inlined_call_operand.vmem [shape: f32[32,32], index: 20, kind: output, shape index: {}]  }
   0x1   :  { %6056 = sst [smem:[#allocation2_spill]] %s6033_s0 }
   0x2   :  { %6057 = sst [smem:[#allocation3_spill]] %s6034_s1  ;;  %s5264_s1 = smov 0  }
   0x3   :  { %6058 = sst [smem:[#allocation4_spill]] %s6035_s2 }
   0x4   :  { %6059 = sst [smem:[#allocation5_spill]] %s6036_s3 }
   0x5   :  { %6060 = sst [smem:[#allocation6_spill]] %s6037_s4 }
   0x6 LB: > { %s4207_s22 = sadd.s32 4294967295, %s5155_s1   ;;  %p4211_p0 = scmp.ge.s32.totalorder %s5155_s1, 1  ;;  %s5155_s1 = sphi %s5264_s1, %s30_s1  }
   0x7   : > { %p563_p1 = scmp.lt.s32.totalorder %s5155_s1, 3 }
   0x9   : > { %p564_p2 = pnand %p4211_p0, %p563_p1 }
   0xa   : > { %s6061_s2 = sld [smem:[#allocation4_spill]] (!%p564_p2)  ;;  %s4212_s25 = sshll.u32 (!%p564_p2), %s4207_s22, 1 }
   0xb   : > { %567 = sbr.rel (%p564_p2) target bundleno = 9694 (0x25de), region = 100  ;;  %p622_p3 = scmp.lt.s32.totalorder (!%p564_p2), %s4212_s25, 3 }
   0xc   : > { %s6062_s28 = sld [smem:[#allocation2_spill]] (!%p564_p2) }
   0xd   : > { %s6063_s0 = sld [smem:[#allocation6_spill]] (!%p564_p2) }
  0x10   : > { %v638_v0 = vld [vmem:[%s6061_s2] sm:$0x3]  ;;  %vm651_vm0 = vcmask 1041408   ;;  %v5157_v1 = vmov 0.0   ;;  %vm5158_vm1 = vmmov 0   ;;  %s6067_s25 = smov (!%p622_p3, %s4212_s25), 3 }
  0x11   : > { %4627 = vmatprep.subr.bf16.mxu0 %v5157_v1  ;;  %v653_v2 = vsel %vm651_vm0, %v638_v0, 0  ;;  %4629 = vmatprep.mubr.msk.bf16.mxu0 %vm5158_vm1, %v5157_v1  ;;  %s4213_s3 = sshll.u32 %s6067_s25, 3  ;;  %vm647_vm2 = vcmask 31744   ;;  %v5012_v7 = vld [vmem:[%s6039_s6 + $0x8] sm:$0xff]   ;;  %v5014_v9 = vld [vmem:[%s6039_s6] sm:$0xff]   ;;  %vm720_vm3 = vcmask 261120  }
  0x12   : > { %4628 = vmatpush3.bf16.msra.mxu0 %v653_v2  ;;  %4633 = vmatprep.subr.bf16.mxu1 %v5157_v1  ;;  %s625_s4 = scalar_lea.vmem %s6062_s28, %s4213_s3  ;;  %v5015_v17 = vld [vmem:[%s6041_s8 + $0x8] sm:$0xff]   ;;  %v5016_v19 = vld [vmem:[%s6041_s8] sm:$0xff]   ;;  %vm895_vm4 = vcmask 64512   ;;  %v5019_v47 = vld [vmem:[%s6041_s8 + $0x18] sm:$0xff]   ;;  %s6065_s28 = sld [smem:[#allocation3_spill]]  ;;  %vm947_vm5 = vcmask 130048  }
  0x13   : > { %4641 = vmatprep.subr.bf16.mxu0 %v5157_v1  ;;  %4637 = vmatprep.mubr.msk.bf16.mxu1 %vm5158_vm1, %v5157_v1  ;;  %v636_v3 = vld [vmem:[%s625_s4] sm:$0xff]  ;;  %v637_v4 = vld [vmem:[%s625_s4 + $0x8] sm:$0xff]  ;;  %s6064_s4 = sld [smem:[#allocation5_spill]]  ;;  %v5017_v43 = vld [vmem:[%s6063_s0 + $0x18] sm:$0xff]   ;;  %vm1343_vm6 = vcmask 1043456   ;;  %s631_s24 = scalar_lea.vmem %s6053_s20, %s4213_s3 }
  0x14   : > { %v639_v5 = vpack.c.bf16 %v637_v4, %v636_v3  ;;  %v5011_v6 = vld [vmem:[%s6063_s0 + $0x8] sm:$0xff]   ;;  %v5013_v8 = vld [vmem:[%s6063_s0] sm:$0xff]   ;;  %v5018_v46 = vld [vmem:[%s6063_s0 + $0x10] sm:$0xff]  }
  0x15   : > { %4634 = vmatpush3.bf16.msra.mxu1 %v5011_v6  ;;  %v4222_v22 = vld [vmem:[%s6040_s7] ss:$0 sm:$0xff]  ;;  %v5020_v48 = vld [vmem:[%s6041_s8 + $0x10] sm:$0xff]   ;;  %v4237_v62 = vld [vmem:[%s6038_s5 + $0x1] ss:$0 sm:$0xff] }
  0x16   : > { %4630 = vmatmul.mubr.msk.bf16.vlgmr.msra.gmra.mxu0 %vm647_vm2, %v639_v5  ;;  %4635 = vmatprep.subr.bf16.mxu1 %v5157_v1  ;;  %v4218_v34 = vld [vmem:[%s6038_s5] ss:$0 sm:$0xff] }
  0x17   : > { %4645 = vmatprep.mubr.msk.bf16.mxu0 %vm5158_vm1, %v5157_v1  ;;  %4642 = vmatpush3.bf16.msra.mxu0 %v5012_v7  ;;  %v4226_v35 = vld [vmem:[%s6042_s9] ss:$0 sm:$0xff]  ;;  %v4255_v7 = vld [vmem:[%s6042_s9 + $0x1] ss:$0 sm:$0xff] }
  0x18   : > { %4643 = vmatprep.subr.bf16.mxu0 %v5157_v1  ;;  %v5381_v50 = vld [vmem:[%s6065_s28] sm:$0xff]  ;;  %v5387_v55 = vld [vmem:[%s6065_s28 + $0x8] sm:$0xff] }
  0x19   : > { %4636 = vmatpush3.bf16.msra.mxu1 %v5013_v8  ;;  %v4216_v11 = vld [vmem:[%s6064_s4] ss:$0 sm:$0xff] }
  0x1a   : > { %4649 = vmatprep.subr.bf16.mxu1 %v5157_v1 }
  0x1b   : > { %4644 = vmatpush3.bf16.msra.mxu0 %v5014_v9 }
  0x1c   : > { %4657 = vmatprep.subr.bf16.mxu0 %v5157_v1 }
  0xd6   : > { %v689_v10 = vpop.f32.mrf.mxu0 }
  0xd7   : > { %v5311_v14 = vadd.f32 %v4216_v11, %v689_v10 }
  0xd8   : > { %v4631_v12 = vpop.f32.mrf.mxu0 }
  0xda   : > { %v692_v13 = vpop.f32.mrf.mxu0 }
  0xdb   : > { %v5313_v15 = vadd.f32 %v4216_v11, %v692_v13 }
  0xdc   : > { %v4632_v16 = vpop.f32.mrf.mxu0 }
  0xdd   : > { %v5320_v18 = vpack.c.bf16 %v5313_v15, %v5311_v14 }
  0xdf   : > { %4638 = vmatmul.mubr.msk.bf16.vlgmr.msra.gmra.mxu1 %vm720_vm3, %v5320_v18  ;;  %4646 = vmatmul.mubr.msk.bf16.vlgmr.msra.gmra.mxu0 %vm720_vm3, %v5320_v18 }
  0xe0   : > { %4650 = vmatpush3.bf16.msra.mxu1 %v5015_v17  ;;  %4653 = vmatprep.mubr.msk.bf16.mxu1 %vm5158_vm1, %v5157_v1 }
  0xe1   : > { %4651 = vmatprep.subr.bf16.mxu1 %v5157_v1  ;;  %4659 = vmatprep.mubr.msk.bf16.mxu0 %vm5158_vm1, %v5157_v1 }
  0xe4   : > { %4652 = vmatpush3.bf16.msra.mxu1 %v5016_v19 }
  0xe5   : > { %4663 = vmatprep.subr.bf16.mxu1 %v5157_v1 }
  0xe7   : > { %4654 = vmatmul.mubr.msk.bf16.vlgmr.msra.gmra.mxu1 %vm720_vm3, %v5320_v18 }
  0xe8   : > { %4665 = vmatprep.mubr.msk.bf16.mxu1 %vm5158_vm1, %v5157_v1 }
 0x19f   : > { %v758_v20 = vpop.f32.mrf.mxu1  ;;  %v822_v21 = vpop.f32.mrf.mxu0 }
 0x1a0   : > { %v823_v27 = vadd.f32 %v4222_v22, %v822_v21  ;;  %v759_v39 = vadd.f32 %v4218_v34, %v758_v20 }
 0x1a1   : > { %v4639_v23 = vpop.f32.mrf.mxu1  ;;  %v4647_v24 = vpop.f32.mrf.mxu0 }
 0x1a3   : > { %v761_v25 = vpop.f32.mrf.mxu1  ;;  %v825_v26 = vpop.f32.mrf.mxu0 }
 0x1a4   : > { %v826_v28 = vadd.f32 %v4222_v22, %v825_v26  ;;  %v762_v37 = vadd.f32 %v4218_v34, %v761_v25 }
 0x1a5   : > { %v4640_v29 = vpop.f32.mrf.mxu1  ;;  %v4648_v30 = vpop.f32.mrf.mxu0 }
 0x1a6   : > { %v894_v31 = vpack.c.bf16 %v826_v28, %v823_v27  ;;  %v893_v44 = vpack.c.bf16 %v762_v37, %v759_v39 }
 0x1a7   : > { %v886_v32 = vpop.f32.mrf.mxu1 }
 0x1a8   : > { %v900_v33 = vsel %vm895_vm4, %v894_v31, 0  ;;  %v887_v40 = vadd.f32 %v4226_v35, %v886_v32 }
 0x1a9   : > { %v4655_v36 = vpop.f32.mrf.mxu1  ;;  %4658 = vmatpush3.bf16.xpose.msra.mxu0 %v900_v33  ;;  %v5021_v33 = vld [vmem:[%s6039_s6 + $0x18] sm:$0xff]  }
 0x1aa   : > { %4669 = vmatprep.subr.bf16.mxu0 %v5157_v1 }
 0x1ab   : > { %v889_v38 = vpop.f32.mrf.mxu1 }
 0x1ac   : > { %v890_v41 = vadd.f32 %v4226_v35, %v889_v38  ;;  %v5022_v35 = vld [vmem:[%s6039_s6 + $0x10] sm:$0xff]  }
 0x1ad   : > { %v4656_v42 = vpop.f32.mrf.mxu1 }
 0x1ae   : > { %v971_v45 = vpack.c.bf16 %v890_v41, %v887_v40  ;;  %v4246_v42 = vld [vmem:[%s6040_s7 + $0x1] ss:$0 sm:$0xff] }
 0x1b0   : > { %4660 = vmatmul.mubr.msk.bf16.vlgmr.msra.gmra.mxu0 %vm895_vm4, %v893_v44  ;;  %4664 = vmatpush3.bf16.msra.mxu1 %v971_v45 }
 0x1b1   : > { %4670 = vmatpush3.bf16.msra.mxu0 %v5017_v43  ;;  %4673 = vmatprep.mubr.msk.bf16.mxu0 %vm5158_vm1, %v5157_v1 }
 0x1b2   : > { %4671 = vmatprep.subr.bf16.mxu0 %v5157_v1  ;;  %4677 = vmatprep.subr.bf16.mxu1 %v5157_v1 }
 0x1b5   : > { %4672 = vmatpush3.bf16.msra.mxu0 %v5018_v46 }
 0x1b6   : > { %4685 = vmatprep.subr.bf16.mxu0 %v5157_v1 }
 0x1b8   : > { %4674 = vmatmul.mubr.msk.bf16.vlgmr.msra.gmra.mxu0 %vm720_vm3, %v5320_v18 }
 0x1b9   : > { %4686 = vmatpush3.bf16.msra.mxu0 %v5019_v47  ;;  %4689 = vmatprep.mubr.msk.bf16.mxu0 %vm5158_vm1, %v5157_v1 }
 0x1ba   : > { %4687 = vmatprep.subr.bf16.mxu0 %v5157_v1 }
 0x1bd   : > { %4688 = vmatpush3.bf16.msra.mxu0 %v5020_v48 }
 0x1be   : > { %4699 = vmatprep.subr.bf16.mxu0 %v5157_v1 }
 0x1c0   : > { %4690 = vmatmul.mubr.msk.bf16.vlgmr.msra.gmra.mxu0 %vm720_vm3, %v5320_v18 }
 0x1c1   : > { %4701 = vmatprep.mubr.msk.bf16.mxu0 %vm5158_vm1, %v5157_v1 }
 0x270   : > { %v936_v49 = vpop.f32.mrf.mxu0 }
 0x271   : > { %v943_v51 = vmul.f32 0.35355338, %v936_v49 }
 0x272   : > { %v4661_v52 = vpop.f32.mrf.mxu0 }
 0x273   : > { %v945_v53 = vadd.f32 %v943_v51, %v5381_v50 }
 0x274   : > { %v939_v54 = vpop.f32.mrf.mxu0 }
 0x275   : > { %v944_v56 = vmul.f32 0.35355338, %v939_v54  ;;  %v948_v57 = vsel %vm947_vm5, %v945_v53, -inf }
 0x276   : > { %949 = vmax.xlane.f32.xlu0 %v948_v57  ;;  %v4662_v58 = vpop.f32.mrf.mxu0 }
 0x277   : > { %v946_v59 = vadd.f32 %v944_v56, %v5387_v55 }
 0x278   : > { %v1077_v60 = vpop.f32.mrf.mxu0 }
 0x279   : > { %v951_v61 = vsel %vm947_vm5, %v946_v59, -inf  ;;  %v5395_v2 = vadd.f32 %v4237_v62, %v1077_v60 }
 0x27a   : > { %952 = vmax.xlane.f32.xlu0 %v951_v61  ;;  %v4675_v63 = vpop.f32.mrf.mxu0 }
 0x27c   : > { %v1080_v0 = vpop.f32.mrf.mxu0 }
 0x27d   : > { %v5397_v3 = vadd.f32 %v4237_v62, %v1080_v0 }
 0x27e   : > { %v4676_v4 = vpop.f32.mrf.mxu0 }
 0x27f   : > { %v1216_v5 = vpack.c.bf16 %v5397_v3, %v5395_v2 }
 0x280   : > { %v1209_v6 = vpop.f32.mrf.mxu0 }
 0x281   : > { %v1210_v10 = vadd.f32 %v4255_v7, %v1209_v6 }
 0x282   : > { %v4691_v8 = vpop.f32.mrf.mxu0 }
 0x284   : > { %v1212_v9 = vpop.f32.mrf.mxu0 }
 0x285   : > { %v1213_v11 = vadd.f32 %v4255_v7, %v1212_v9 }
 0x286   : > { %v4692_v12 = vpop.f32.mrf.mxu0 }
 0x287   : > { %v1292_v13 = vpack.c.bf16 %v1213_v11, %v1210_v10 }
 0x289   : > { %4700 = vmatpush3.bf16.msra.mxu0 %v1292_v13  ;;  %v1016_v13 = vld [vmem:[%s6043_s10] sm:$0xf] }
 0x28a   : > { %4711 = vmatprep.subr.bf16.mxu0 %v5157_v1 }
 0x2ff   : > { %v950_v16 = vpop.xlane.xlu0 %949 }
 0x300   : > { %v954_v17 = vsub.f32 %v945_v53, %v950_v16 }
 0x302   : > { %v956_v19 = vmul.f32 1.442695, %v954_v17 }
 0x303   : > { %v953_v20 = vpop.xlane.xlu0 %952 }
 0x304   : > { %5067 = vpow2.f32 %v956_v19  ;;  %v955_v21 = vsub.f32 %v946_v59, %v953_v20  ;;  %v1392_v20 = vsel %vm1343_vm6, %v1016_v13, 0 }
 0x306   : > { %v958_v22 = vmul.f32 1.442695, %v955_v21  ;;  %v5023_v21 = vld [vmem:[%s6039_s6 + $0x28] sm:$0xff]  }
 0x308   : > { %5069 = vpow2.f32 %v958_v22  ;;  %v5024_v22 = vld [vmem:[%s6039_s6 + $0x20] sm:$0xff]  }
 0x311   : > { %v5068_v23 = vpop.eup %5067 }
 0x312   : > { %v960_v24 = vsel %vm947_vm5, %v5068_v23, 0.0 }
 0x313   : > { %961 = vadd.xlane.f32.xlu1 %v960_v24 }
 0x315   : > { %v5070_v25 = vpop.eup %5069 }
 0x316   : > { %v963_v26 = vsel %vm947_vm5, %v5070_v25, 0.0 }
 0x317   : > { %964 = vadd.xlane.f32.xlu1 %v963_v26 }
 0x39c   : > { %v962_v27 = vpop.xlane.xlu1 %961 }
 0x39d   : > { %5071 = vrcp.f32 %v962_v27 }
 0x3a0   : > { %v965_v28 = vpop.xlane.xlu1 %964 }
 0x3a1   : > { %5073 = vrcp.f32 %v965_v28  ;;  %v5025_v28 = vld [vmem:[%s6063_s0 + $0x28] sm:$0xff]  }
 0x3aa   : > { %v5072_v29 = vpop.eup %5071 }
 0x3ab   : > { %v968_v31 = vmul.f32 %v5072_v29, %v5068_v23  ;;  %v4261_v23 = vld [vmem:[%s6043_s10 + $0x4] sm:$0xf] }
 0x3ac   : > { %v1345_v24 = vsel %vm1343_vm6, %v4261_v23, 0 }
 0x3ae   : > { %v5074_v30 = vpop.eup %5073 }
 0x3af   : > { %v969_v32 = vmul.f32 %v5074_v30, %v5070_v25 }
 0x3b1   : > { %v970_v34 = vpack.c.bf16 %v969_v32, %v968_v31  ;;  %v5026_v32 = vld [vmem:[%s6063_s0 + $0x20] sm:$0xff]  }
 0x3b3   : > { %4666 = vmatmul.mubr.msk.bf16.vlgmr.msra.gmra.mxu1 %vm947_vm5, %v970_v34 }
 0x3b4   : > { %4678 = vmatpush3.bf16.msra.mxu1 %v5021_v33  ;;  %4681 = vmatprep.mubr.msk.bf16.mxu1 %vm5158_vm1, %v5157_v1 }
 0x3b5   : > { %4679 = vmatprep.subr.bf16.mxu1 %v5157_v1 }
 0x3b8   : > { %4680 = vmatpush3.bf16.msra.mxu1 %v5022_v35  ;;  %v5027_v35 = vld [vmem:[%s6041_s8 + $0x28] sm:$0xff]  }
 0x3b9   : > { %4693 = vmatprep.subr.bf16.mxu1 %v5157_v1 }
 0x3bb   : > { %4682 = vmatmul.mubr.msk.bf16.vlgmr.msra.gmra.mxu1 %vm720_vm3, %v5320_v18 }
 0x3bc   : > { %4695 = vmatprep.mubr.msk.bf16.mxu1 %vm5158_vm1, %v5157_v1 }
 0x473   : > { %v1009_v36 = vpop.f32.mrf.mxu1 }
 0x475   : > { %v4667_v37 = vpop.f32.mrf.mxu1 }
 0x477   : > { %v1012_v38 = vpop.f32.mrf.mxu1 }
 0x478   : > { %v1017_v39 = vpack.c.bf16 %v1012_v38, %v1009_v36  ;;  %v5028_v38 = vld [vmem:[%s6041_s8 + $0x20] sm:$0xff]  }
 0x479   : > { %v4668_v40 = vpop.f32.mrf.mxu1 }
 0x47b   : > { %v1143_v41 = vpop.f32.mrf.mxu1 }
 0x47c   : > { %v1144_v45 = vadd.f32 %v4246_v42, %v1143_v41 }
 0x47d   : > { %v4683_v43 = vpop.f32.mrf.mxu1 }
 0x47f   : > { %v1146_v44 = vpop.f32.mrf.mxu1 }
 0x480   : > { %v1147_v46 = vadd.f32 %v4246_v42, %v1146_v44 }
 0x481   : > { %v4684_v47 = vpop.f32.mrf.mxu1 }
 0x482   : > { %v1217_v48 = vpack.c.bf16 %v1147_v46, %v1144_v45 }
 0x484   : > { %v1222_v49 = vsel %vm895_vm4, %v1217_v48, 0 }
 0x485   : > { %4694 = vmatpush3.bf16.xpose.msra.mxu1 %v1222_v49 }
 0x486   : > { %4705 = vmatprep.subr.bf16.mxu1 %v5157_v1 }
 0x48c   : > { %4696 = vmatmul.mubr.msk.bf16.vlgmr.msra.gmra.mxu1 %vm895_vm4, %v1216_v5 }
 0x48d   : > { %4707 = vmatprep.mubr.msk.bf16.mxu1 %vm5158_vm1, %v5157_v1  ;;  %4706 = vmatpush3.bf16.msra.mxu1 %v1345_v24 }
 0x48e   : > { %4717 = vmatprep.subr.bf16.mxu1 %v5157_v1 }
 0x54c   : > { %v1258_v51 = vpop.f32.mrf.mxu1 }
 0x54d   : > { %v1265_v52 = vmul.f32 0.35355338, %v1258_v51 }
 0x54e   : > { %v4697_v53 = vpop.f32.mrf.mxu1 }
 0x54f   : > { %v1267_v54 = vadd.f32 %v1265_v52, %v5381_v50  ;;  %v4269_v53 = vld [vmem:[%s6038_s5 + $0x2] ss:$0 sm:$0xff] }
 0x550   : > { %v1261_v56 = vpop.f32.mrf.mxu1 }
 0x551   : > { %v1266_v57 = vmul.f32 0.35355338, %v1261_v56  ;;  %v1269_v58 = vsel %vm947_vm5, %v1267_v54, -inf }
 0x552   : > { %1270 = vmax.xlane.f32.xlu0 %v1269_v58  ;;  %v4698_v59 = vpop.f32.mrf.mxu1 }
 0x553   : > { %v1268_v60 = vadd.f32 %v1266_v57, %v5387_v55 }
 0x555   : > { %v1272_v61 = vsel %vm947_vm5, %v1268_v60, -inf }
 0x556   : > { %1273 = vmax.xlane.f32.xlu1 %v1272_v61 }
 0x5db   : > { %v1271_v62 = vpop.xlane.xlu0 %1270 }
 0x5dc   : > { %v1275_v63 = vsub.f32 %v1267_v54, %v1271_v62  ;;  %v4287_v62 = vld [vmem:[%s6042_s9 + $0x2] ss:$0 sm:$0xff] }
 0x5de   : > { %v1277_v0 = vmul.f32 1.442695, %v1275_v63 }
 0x5df   : > { %v1274_v2 = vpop.xlane.xlu1 %1273 }
 0x5e0   : > { %5075 = vpow2.f32 %v1277_v0  ;;  %v1276_v3 = vsub.f32 %v1268_v60, %v1274_v2 }
 0x5e2   : > { %v1279_v4 = vmul.f32 1.442695, %v1276_v3 }
 0x5e4   : > { %5077 = vpow2.f32 %v1279_v4 }
 0x5ed   : > { %v5076_v5 = vpop.eup %5075 }
 0x5ee   : > { %v1281_v6 = vsel %vm947_vm5, %v5076_v5, 0.0 }
 0x5ef   : > { %1282 = vadd.xlane.f32.xlu0 %v1281_v6 }
 0x5f1   : > { %v5078_v7 = vpop.eup %5077 }
 0x5f2   : > { %v1284_v8 = vsel %vm947_vm5, %v5078_v7, 0.0 }
 0x5f3   : > { %1285 = vadd.xlane.f32.xlu1 %v1284_v8 }
 0x678   : > { %v1283_v9 = vpop.xlane.xlu0 %1282 }
 0x679   : > { %5079 = vrcp.f32 %v1283_v9 }
 0x67c   : > { %v1286_v10 = vpop.xlane.xlu1 %1285 }
 0x67d   : > { %5081 = vrcp.f32 %v1286_v10 }
 0x686   : > { %v5080_v11 = vpop.eup %5079 }
 0x687   : > { %v1289_v16 = vmul.f32 %v5080_v11, %v5076_v5 }
 0x68a   : > { %v5082_v12 = vpop.eup %5081 }
 0x68b   : > { %v1290_v17 = vmul.f32 %v5082_v12, %v5078_v7 }
 0x68d   : > { %v1291_v19 = vpack.c.bf16 %v1290_v17, %v1289_v16 }
 0x68f   : > { %4702 = vmatmul.mubr.msk.bf16.vlgmr.msra.gmra.mxu0 %vm947_vm5, %v1291_v19 }
 0x690   : > { %4712 = vmatpush3.bf16.msra.mxu0 %v1392_v20  ;;  %4713 = vmatprep.mubr.msk.bf16.mxu0 %vm5158_vm1, %v5157_v1 }
 0x691   : > { %4725 = vmatprep.subr.bf16.mxu0 %v5157_v1 }
 0x697   : > { %4714 = vmatmul.mubr.msk.bf16.vlgmr.msra.gmra.mxu0 %vm895_vm4, %v1017_v39  ;;  %v4278_v39 = vld [vmem:[%s6040_s7 + $0x2] ss:$0 sm:$0xff] }
 0x698   : > { %4726 = vmatpush3.bf16.msra.mxu0 %v5023_v21  ;;  %4729 = vmatprep.mubr.msk.bf16.mxu0 %vm5158_vm1, %v5157_v1 }
 0x699   : > { %4727 = vmatprep.subr.bf16.mxu0 %v5157_v1 }
 0x69c   : > { %4728 = vmatpush3.bf16.msra.mxu0 %v5024_v22 }
 0x69d   : > { %4741 = vmatprep.subr.bf16.mxu0 %v5157_v1 }
 0x69f   : > { %4730 = vmatmul.mubr.msk.bf16.vlgmr.msra.gmra.mxu0 %vm720_vm3, %v5320_v18 }
 0x6a0   : > { %4743 = vmatprep.mubr.msk.bf16.mxu0 %vm5158_vm1, %v5157_v1 }
 0x74f   : > { %v1330_v25 = vpop.f32.mrf.mxu0 }
 0x751   : > { %v4703_v26 = vpop.f32.mrf.mxu0 }
 0x753   : > { %v1333_v27 = vpop.f32.mrf.mxu0 }
 0x754   : > { %v1339_v29 = vpack.c.bf16 %v1333_v27, %v1330_v25 }
 0x755   : > { %v4704_v30 = vpop.f32.mrf.mxu0 }
 0x756   : > { %4708 = vmatmul.mubr.msk.bf16.vlgmr.msra.gmra.mxu1 %vm895_vm4, %v1339_v29 }
 0x757   : > { %v5468_v31 = vpop.f32.mrf.mxu0  ;;  %4718 = vmatpush3.bf16.msra.mxu1 %v5025_v28  ;;  %4721 = vmatprep.mubr.msk.bf16.mxu1 %vm5158_vm1, %v5157_v1 }
 0x758   : > { %4719 = vmatprep.subr.bf16.mxu1 %v5157_v1 }
 0x759   : > { %v4715_v33 = vpop.f32.mrf.mxu0 }
 0x75b   : > { %v5476_v34 = vpop.f32.mrf.mxu0  ;;  %4720 = vmatpush3.bf16.msra.mxu1 %v5026_v32 }
 0x75c   : > { %4733 = vmatprep.subr.bf16.mxu1 %v5157_v1 }
 0x75d   : > { %v4716_v36 = vpop.f32.mrf.mxu0 }
 0x75e   : > { %4722 = vmatmul.mubr.msk.bf16.vlgmr.msra.gmra.mxu1 %vm720_vm3, %v5320_v18 }
 0x75f   : > { %v1560_v37 = vpop.f32.mrf.mxu0  ;;  %4734 = vmatpush3.bf16.msra.mxu1 %v5027_v35  ;;  %4737 = vmatprep.mubr.msk.bf16.mxu1 %vm5158_vm1, %v5157_v1 }
 0x760   : > { %4735 = vmatprep.subr.bf16.mxu1 %v5157_v1  ;;  %v1561_v42 = vadd.f32 %v4278_v39, %v1560_v37  ;;  %v5029_v37 = vld [vmem:[%s6063_s0 + $0x38] sm:$0xff]  }
 0x761   : > { %v4731_v40 = vpop.f32.mrf.mxu0 }
 0x762   : > { %v5031_v40 = vld [vmem:[%s6041_s8 + $0x38] sm:$0xff]  }
 0x763   : > { %v1563_v41 = vpop.f32.mrf.mxu0  ;;  %4736 = vmatpush3.bf16.msra.mxu1 %v5028_v38 }
 0x764   : > { %v1564_v43 = vadd.f32 %v4278_v39, %v1563_v41  ;;  %4747 = vmatprep.subr.bf16.mxu1 %v5157_v1  ;;  %v5030_v39 = vld [vmem:[%s6063_s0 + $0x30] sm:$0xff]  }
 0x765   : > { %v4732_v44 = vpop.f32.mrf.mxu0  ;;  %v5032_v41 = vld [vmem:[%s6041_s8 + $0x30] sm:$0xff]  }
 0x766   : > { %v1634_v45 = vpack.c.bf16 %v1564_v43, %v1561_v42  ;;  %4738 = vmatmul.mubr.msk.bf16.vlgmr.msra.gmra.mxu1 %vm720_vm3, %v5320_v18  ;;  %v4293_v42 = vld [vmem:[%s6043_s10 + $0x8] sm:$0xf] }
 0x767   : > { %4749 = vmatprep.mubr.msk.bf16.mxu1 %vm5158_vm1, %v5157_v1  ;;  %v1761_v43 = vsel %vm1343_vm6, %v4293_v42, 0 }
 0x768   : > { %v1639_v46 = vsel %vm895_vm4, %v1634_v45, 0 }
 0x769   : > { %4742 = vmatpush3.bf16.xpose.msra.mxu0 %v1639_v46 }
 0x76a   : > { %4753 = vmatprep.subr.bf16.mxu0 %v5157_v1 }
 0x816   : > { %v5500_v47 = vpop.f32.mrf.mxu1 }
 0x818   : > { %v4709_v48 = vpop.f32.mrf.mxu1 }
 0x819   : > { %v5033_v48 = vld [vmem:[%s6039_s6 + $0x38] sm:$0xff]  }
 0x81a   : > { %v5502_v49 = vpop.f32.mrf.mxu1 }
 0x81c   : > { %v4710_v51 = vpop.f32.mrf.mxu1 }
 0x81e   : > { %v1494_v52 = vpop.f32.mrf.mxu1 }
 0x81f   : > { %v1495_v57 = vadd.f32 %v4269_v53, %v1494_v52 }
 0x820   : > { %v4723_v54 = vpop.f32.mrf.mxu1 }
 0x821   : > { %v5034_v54 = vld [vmem:[%s6039_s6 + $0x30] sm:$0xff]  }
 0x822   : > { %v1497_v56 = vpop.f32.mrf.mxu1 }
 0x823   : > { %v1498_v58 = vadd.f32 %v4269_v53, %v1497_v56  ;;  %v4300_v56 = vld [vmem:[%s6038_s5 + $0x3] ss:$0 sm:$0xff] }
 0x824   : > { %v4724_v59 = vpop.f32.mrf.mxu1 }
 0x825   : > { %v1633_v60 = vpack.c.bf16 %v1498_v58, %v1495_v57 }
 0x826   : > { %v1626_v61 = vpop.f32.mrf.mxu1 }
 0x827   : > { %4744 = vmatmul.mubr.msk.bf16.vlgmr.msra.gmra.mxu0 %vm895_vm4, %v1633_v60  ;;  %v1627_v2 = vadd.f32 %v4287_v62, %v1626_v61 }
 0x828   : > { %v4739_v63 = vpop.f32.mrf.mxu1  ;;  %4755 = vmatprep.mubr.msk.bf16.mxu0 %vm5158_vm1, %v5157_v1  ;;  %4754 = vmatpush3.bf16.msra.mxu0 %v1761_v43 }
 0x829   : > { %4767 = vmatprep.subr.bf16.mxu0 %v5157_v1 }
 0x82a   : > { %v1629_v0 = vpop.f32.mrf.mxu1 }
 0x82b   : > { %v1630_v3 = vadd.f32 %v4287_v62, %v1629_v0  ;;  %v4318_v0 = vld [vmem:[%s6042_s9 + $0x3] ss:$0 sm:$0xff] }
 0x82c   : > { %v4740_v4 = vpop.f32.mrf.mxu1 }
 0x82d   : > { %v1709_v5 = vpack.c.bf16 %v1630_v3, %v1627_v2 }
 0x82f   : > { %4748 = vmatpush3.bf16.msra.mxu1 %v1709_v5 }
 0x830   : > { %4759 = vmatprep.subr.bf16.mxu1 %v5157_v1 }
 0x8e7   : > { %v1675_v6 = vpop.f32.mrf.mxu0 }
 0x8e8   : > { %v1682_v7 = vmul.f32 0.35355338, %v1675_v6 }
 0x8e9   : > { %v4745_v8 = vpop.f32.mrf.mxu0 }
 0x8ea   : > { %v1684_v9 = vadd.f32 %v1682_v7, %v5381_v50 }
 0x8eb   : > { %v1678_v10 = vpop.f32.mrf.mxu0 }
 0x8ec   : > { %v1683_v11 = vmul.f32 0.35355338, %v1678_v10  ;;  %v1686_v12 = vsel %vm947_vm5, %v1684_v9, -inf }
 0x8ed   : > { %1687 = vmax.xlane.f32.xlu0 %v1686_v12  ;;  %v4746_v13 = vpop.f32.mrf.mxu0 }
 0x8ee   : > { %v1685_v16 = vadd.f32 %v1683_v11, %v5387_v55  ;;  %v1432_v11 = vadd.f32 %v5476_v34, %v5502_v49 }
 0x8f0   : > { %v1689_v17 = vsel %vm947_vm5, %v1685_v16, -inf }
 0x8f1   : > { %1690 = vmax.xlane.f32.xlu1 %v1689_v17 }
 0x976   : > { %v1688_v19 = vpop.xlane.xlu0 %1687 }
 0x977   : > { %v1692_v20 = vsub.f32 %v1684_v9, %v1688_v19  ;;  %v4309_v19 = vld [vmem:[%s6040_s7 + $0x3] ss:$0 sm:$0xff] }
 0x979   : > { %v1694_v21 = vmul.f32 1.442695, %v1692_v20 }
 0x97a   : > { %v1691_v22 = vpop.xlane.xlu1 %1690 }
 0x97b   : > { %5083 = vpow2.f32 %v1694_v21  ;;  %v1693_v23 = vsub.f32 %v1685_v16, %v1691_v22 }
 0x97d   : > { %v1696_v24 = vmul.f32 1.442695, %v1693_v23 }
 0x97f   : > { %5085 = vpow2.f32 %v1696_v24 }
 0x988   : > { %v5084_v25 = vpop.eup %5083 }
 0x989   : > { %v1698_v26 = vsel %vm947_vm5, %v5084_v25, 0.0 }
 0x98a   : > { %1699 = vadd.xlane.f32.xlu0 %v1698_v26 }
 0x98c   : > { %v5086_v27 = vpop.eup %5085 }
 0x98d   : > { %v1701_v28 = vsel %vm947_vm5, %v5086_v27, 0.0 }
 0x98e   : > { %1702 = vadd.xlane.f32.xlu1 %v1701_v28 }
 0xa13   : > { %v1700_v29 = vpop.xlane.xlu0 %1699 }
 0xa14   : > { %5087 = vrcp.f32 %v1700_v29 }
 0xa17   : > { %v1703_v30 = vpop.xlane.xlu1 %1702 }
 0xa18   : > { %5089 = vrcp.f32 %v1703_v30 }
 0xa21   : > { %v5088_v32 = vpop.eup %5087 }
 0xa22   : > { %v1706_v35 = vmul.f32 %v5088_v32, %v5084_v25 }
 0xa25   : > { %v5090_v33 = vpop.eup %5089 }
 0xa26   : > { %v1707_v36 = vmul.f32 %v5090_v33, %v5086_v27 }
 0xa28   : > { %v1708_v38 = vpack.c.bf16 %v1707_v36, %v1706_v35 }
 0xa2a   : > { %4750 = vmatmul.mubr.msk.bf16.vlgmr.msra.gmra.mxu1 %vm947_vm5, %v1708_v38 }
 0xa2b   : > { %4760 = vmatpush3.bf16.msra.mxu1 %v5029_v37  ;;  %4763 = vmatprep.mubr.msk.bf16.mxu1 %vm5158_vm1, %v5157_v1 }
 0xa2c   : > { %4761 = vmatprep.subr.bf16.mxu1 %v5157_v1 }
 0xa2f   : > { %4762 = vmatpush3.bf16.msra.mxu1 %v5030_v39 }
 0xa30   : > { %4775 = vmatprep.subr.bf16.mxu1 %v5157_v1 }
 0xa32   : > { %4764 = vmatmul.mubr.msk.bf16.vlgmr.msra.gmra.mxu1 %vm720_vm3, %v5320_v18 }
 0xa33   : > { %4776 = vmatpush3.bf16.msra.mxu1 %v5031_v40  ;;  %4779 = vmatprep.mubr.msk.bf16.mxu1 %vm5158_vm1, %v5157_v1 }
 0xa34   : > { %4777 = vmatprep.subr.bf16.mxu1 %v5157_v1 }
 0xa37   : > { %4778 = vmatpush3.bf16.msra.mxu1 %v5032_v41 }
 0xa38   : > { %4789 = vmatprep.subr.bf16.mxu1 %v5157_v1 }
 0xa3a   : > { %4780 = vmatmul.mubr.msk.bf16.vlgmr.msra.gmra.mxu1 %vm720_vm3, %v5320_v18 }
 0xa3b   : > { %4791 = vmatprep.mubr.msk.bf16.mxu1 %vm5158_vm1, %v5157_v1 }
 0xaea   : > { %v1747_v44 = vpop.f32.mrf.mxu1 }
 0xaec   : > { %v4751_v45 = vpop.f32.mrf.mxu1 }
 0xaee   : > { %v1750_v46 = vpop.f32.mrf.mxu1 }
 0xaef   : > { %v1756_v51 = vpack.c.bf16 %v1750_v46, %v1747_v44 }
 0xaf0   : > { %v4752_v52 = vpop.f32.mrf.mxu1 }
 0xaf1   : > { %4756 = vmatmul.mubr.msk.bf16.vlgmr.msra.gmra.mxu0 %vm895_vm4, %v1756_v51 }
 0xaf2   : > { %v1865_v53 = vpop.f32.mrf.mxu1  ;;  %4768 = vmatpush3.bf16.msra.mxu0 %v5033_v48  ;;  %4771 = vmatprep.mubr.msk.bf16.mxu0 %vm5158_vm1, %v5157_v1 }
 0xaf3   : > { %4769 = vmatprep.subr.bf16.mxu0 %v5157_v1  ;;  %v1866_v59 = vadd.f32 %v4300_v56, %v1865_v53  ;;  %v4324_v53 = vld [vmem:[%s6043_s10 + $0xc] sm:$0xf] }
 0xaf4   : > { %v4765_v57 = vpop.f32.mrf.mxu1 }
 0xaf6   : > { %v1868_v58 = vpop.f32.mrf.mxu1  ;;  %4770 = vmatpush3.bf16.msra.mxu0 %v5034_v54  ;;  %v2132_v54 = vsel %vm1343_vm6, %v4324_v53, 0 }
 0xaf7   : > { %v1869_v60 = vadd.f32 %v4300_v56, %v1868_v58  ;;  %4783 = vmatprep.subr.bf16.mxu0 %v5157_v1 }
 0xaf8   : > { %v4766_v61 = vpop.f32.mrf.mxu1 }
 0xaf9   : > { %v2004_v62 = vpack.c.bf16 %v1869_v60, %v1866_v59  ;;  %4772 = vmatmul.mubr.msk.bf16.vlgmr.msra.gmra.mxu0 %vm720_vm3, %v5320_v18  ;;  %v1429_v18 = vadd.f32 %v5468_v31, %v5500_v47 }
 0xafa   : > { %v1997_v63 = vpop.f32.mrf.mxu1  ;;  %4785 = vmatprep.mubr.msk.bf16.mxu0 %vm5158_vm1, %v5157_v1 }
 0xafb   : > { %v1998_v4 = vadd.f32 %v4318_v0, %v1997_v63 }
 0xafc   : > { %v4781_v2 = vpop.f32.mrf.mxu1 }
 0xafe   : > { %v2000_v3 = vpop.f32.mrf.mxu1 }
 0xaff   : > { %v2001_v5 = vadd.f32 %v4318_v0, %v2000_v3 }
 0xb00   : > { %v4782_v6 = vpop.f32.mrf.mxu1 }
 0xb01   : > { %v2080_v7 = vpack.c.bf16 %v2001_v5, %v1998_v4 }
 0xb03   : > { %4790 = vmatpush3.bf16.msra.mxu1 %v2080_v7 }
 0xb04   : > { %4801 = vmatprep.subr.bf16.mxu1 %v5157_v1 }
 0xbb1   : > { %v1797_v8 = vpop.f32.mrf.mxu0 }
 0xbb2   : > { %v5576_v9 = vadd.f32 %v1797_v8, %v1429_v18 }
 0xbb3   : > { %v4757_v10 = vpop.f32.mrf.mxu0 }
 0xbb5   : > { %v1800_v12 = vpop.f32.mrf.mxu0 }
 0xbb6   : > { %v5580_v13 = vadd.f32 %v1800_v12, %v1432_v11 }
 0xbb7   : > { %v4758_v16 = vpop.f32.mrf.mxu0 }
 0xbb9   : > { %v1931_v17 = vpop.f32.mrf.mxu0 }
 0xbba   : > { %v1932_v22 = vadd.f32 %v4309_v19, %v1931_v17 }
 0xbbb   : > { %v4773_v20 = vpop.f32.mrf.mxu0 }
 0xbbd   : > { %v1934_v21 = vpop.f32.mrf.mxu0 }
 0xbbe   : > { %v1935_v31 = vadd.f32 %v4309_v19, %v1934_v21 }
 0xbbf   : > { %v4774_v47 = vpop.f32.mrf.mxu0 }
 0xbc0   : > { %v2005_v23 = vpack.c.bf16 %v1935_v31, %v1932_v22  ;;  %v5036_v22 = vld [vmem:[%s6049_s16] sm:$0xff]  }
 0xbc2   : > { %v2010_v24 = vsel %vm895_vm4, %v2005_v23, 0 }
 0xbc3   : > { %4784 = vmatpush3.bf16.xpose.msra.mxu0 %v2010_v24 }
 0xbc4   : > { %4795 = vmatprep.subr.bf16.mxu0 %v5157_v1 }
 0xbca   : > { %4786 = vmatmul.mubr.msk.bf16.vlgmr.msra.gmra.mxu0 %vm895_vm4, %v2004_v62  ;;  %v4326_v62 = vld [vmem:[%s6044_s11] ss:$0 sm:$0xff] }
 0xbcb   : > { %4797 = vmatprep.mubr.msk.bf16.mxu0 %vm5158_vm1, %v5157_v1  ;;  %4796 = vmatpush3.bf16.msra.mxu0 %v2132_v54 }
 0xbcc   : > { %4809 = vmatprep.subr.bf16.mxu0 %v5157_v1 }
 0xc8a   : > { %v2046_v34 = vpop.f32.mrf.mxu0 }
 0xc8b   : > { %v2053_v49 = vmul.f32 0.35355338, %v2046_v34 }
 0xc8c   : > { %v4787_v25 = vpop.f32.mrf.mxu0 }
 0xc8d   : > { %v2055_v26 = vadd.f32 %v2053_v49, %v5381_v50 }
 0xc8e   : > { %v2049_v27 = vpop.f32.mrf.mxu0 }
 0xc8f   : > { %v2054_v28 = vmul.f32 0.35355338, %v2049_v27  ;;  %v2057_v29 = vsel %vm947_vm5, %v2055_v26, -inf  ;;  %v4327_v27 = vld [vmem:[%s6045_s12] ss:$0 sm:$0xff] }
 0xc90   : > { %2058 = vmax.xlane.f32.xlu0 %v2057_v29  ;;  %v4788_v30 = vpop.f32.mrf.mxu0 }
 0xc91   : > { %v2056_v32 = vadd.f32 %v2054_v28, %v5387_v55 }
 0xc93   : > { %v2060_v33 = vsel %vm947_vm5, %v2056_v32, -inf }
 0xc94   : > { %2061 = vmax.xlane.f32.xlu1 %v2060_v33 }
 0xd19   : > { %v2059_v35 = vpop.xlane.xlu0 %2058 }
 0xd1a   : > { %v2063_v36 = vsub.f32 %v2055_v26, %v2059_v35 }
 0xd1c   : > { %v2065_v37 = vmul.f32 1.442695, %v2063_v36 }
 0xd1d   : > { %v2062_v38 = vpop.xlane.xlu1 %2061 }
 0xd1e   : > { %5091 = vpow2.f32 %v2065_v37  ;;  %v2064_v39 = vsub.f32 %v2056_v32, %v2062_v38  ;;  %v4328_v32 = vld [vmem:[%s6046_s13] ss:$0 sm:$0xff]  ;;  %v5037_v38 = vld [vmem:[%s6051_s18 + $0x8] sm:$0xff]  }
 0xd20   : > { %v2067_v40 = vmul.f32 1.442695, %v2064_v39  ;;  %v5038_v39 = vld [vmem:[%s6051_s18] sm:$0xff]  }
 0xd22   : > { %5093 = vpow2.f32 %v2067_v40  ;;  %v4329_v40 = vld [vmem:[%s6050_s17] ss:$0 sm:$0xff] }
 0xd2b   : > { %v5092_v50 = vpop.eup %5091 }
 0xd2c   : > { %v2069_v41 = vsel %vm947_vm5, %v5092_v50, 0.0 }
 0xd2d   : > { %2070 = vadd.xlane.f32.xlu0 %v2069_v41 }
 0xd2f   : > { %v5094_v42 = vpop.eup %5093 }
 0xd30   : > { %v2072_v43 = vsel %vm947_vm5, %v5094_v42, 0.0 }
 0xd31   : > { %2073 = vadd.xlane.f32.xlu1 %v2072_v43 }
 0xdb6   : > { %v2071_v55 = vpop.xlane.xlu0 %2070 }
 0xdb7   : > { %5095 = vrcp.f32 %v2071_v55 }
 0xdba   : > { %v2074_v44 = vpop.xlane.xlu1 %2073 }
 0xdbb   : > { %5097 = vrcp.f32 %v2074_v44 }
 0xdc4   : > { %v5096_v45 = vpop.eup %5095 }
 0xdc5   : > { %v2077_v48 = vmul.f32 %v5096_v45, %v5092_v50 }
 0xdc8   : > { %v5098_v46 = vpop.eup %5097 }
 0xdc9   : > { %v2078_v51 = vmul.f32 %v5098_v46, %v5094_v42 }
 0xdcb   : > { %v2079_v52 = vpack.c.bf16 %v2078_v51, %v2077_v48  ;;  %v4333_v51 = vld [vmem:[%s6052_s19] ss:$0 sm:$0xff] }
 0xdcd   : > { %4792 = vmatmul.mubr.msk.bf16.vlgmr.msra.gmra.mxu1 %vm947_vm5, %v2079_v52 }
 0xdce   : > { %4805 = vmatprep.mubr.msk.bf16.mxu1 %vm5158_vm1, %v5157_v1 }
 0xe8d   : > { %v2118_v56 = vpop.f32.mrf.mxu1 }
 0xe8f   : > { %v4793_v57 = vpop.f32.mrf.mxu1 }
 0xe91   : > { %v2121_v58 = vpop.f32.mrf.mxu1 }
 0xe92   : > { %v2127_v59 = vpack.c.bf16 %v2121_v58, %v2118_v56 }
 0xe93   : > { %v4794_v60 = vpop.f32.mrf.mxu1 }
 0xe94   : > { %4798 = vmatmul.mubr.msk.bf16.vlgmr.msra.gmra.mxu0 %vm895_vm4, %v2127_v59 }
 0xe95   : > { %4813 = vmatprep.mubr.msk.bf16.mxu0 %vm5158_vm1, %v5157_v1  ;;  %4810 = vmatpush3.bf16.msra.mxu0 %v5037_v38 }
 0xe96   : > { %4811 = vmatprep.subr.bf16.mxu0 %v5157_v1 }
 0xe99   : > { %4812 = vmatpush3.bf16.msra.mxu0 %v5038_v39 }
 0xe9a   : > { %4825 = vmatprep.subr.bf16.mxu0 %v5157_v1 }
 0xf54   : > { %v2168_v61 = vpop.f32.mrf.mxu0 }
 0xf55   : > { %v2175_v63 = vadd.f32 %v2168_v61, %v5576_v9 }
 0xf56   : > { %v4799_v0 = vpop.f32.mrf.mxu0 }
 0xf57   : > { %v2184_v2 = vadd.f32 %v4326_v62, %v2175_v63 }
 0xf58   : > { %v2171_v3 = vpop.f32.mrf.mxu0 }
 0xf59   : > { %v2176_v4 = vadd.f32 %v2171_v3, %v5580_v13  ;;  %v2186_v5 = vadd.f32 %v2184_v2, %v5311_v14 }
 0xf5a   : > { %v4800_v6 = vpop.f32.mrf.mxu0 }
 0xf5b   : > { %v2185_v7 = vadd.f32 %v4326_v62, %v2176_v4  ;;  %v2190_v18 = vsel %vm720_vm3, %v2186_v5, 0.0 }
 0xf5c   : > { %2191 = vadd.xlane.f32.xlu0 %v2190_v18 }
 0xf5d   : > { %v2187_v8 = vadd.f32 %v2185_v7, %v5313_v15  ;;  %v5035_v15 = vld [vmem:[%s6049_s16 + $0x8] sm:$0xff]  }
 0xf5e   : > { %4802 = vmatpush3.bf16.msra.mxu1 %v5035_v15 }
 0xf5f   : > { %v2193_v10 = vsel %vm720_vm3, %v2187_v8, 0.0  ;;  %4803 = vmatprep.subr.bf16.mxu1 %v5157_v1 }
 0xf60   : > { %2194 = vadd.xlane.f32.xlu1 %v2193_v10  ;;  %v5039_v10 = vld [vmem:[%s6063_s0 + $0x48] sm:$0xff]  }
 0xf62   : > { %4804 = vmatpush3.bf16.msra.mxu1 %v5036_v22  ;;  %v4337_v22 = vld [vmem:[%s6047_s14] ss:$0 sm:$0xff] }
 0xf63   : > { %4817 = vmatprep.subr.bf16.mxu1 %v5157_v1 }
 0xfe5   : > { %v2192_v11 = vpop.xlane.xlu0 %2191 }
 0xfe6   : > { %v2197_v12 = vmul.f32 0.03125, %v2192_v11  ;;  %v5040_v11 = vld [vmem:[%s6039_s6 + $0x48] sm:$0xff]  }
 0xfe8   : > { %v2199_v9 = vsub.f32 %v2186_v5, %v2197_v12  ;;  %v5041_v12 = vld [vmem:[%s6063_s0 + $0x40] sm:$0xff]  }
 0xfe9   : > { %v2195_v16 = vpop.xlane.xlu1 %2194 }
 0xfea   : > { %v2198_v17 = vmul.f32 0.03125, %v2195_v16  ;;  %v2201_v19 = vmul.f32 %v2199_v9, %v2199_v9 }
 0xfec   : > { %v2200_v20 = vsub.f32 %v2187_v8, %v2198_v17  ;;  %v2203_v13 = vsel %vm720_vm3, %v2201_v19, 0.0 }
 0xfed   : > { %2204 = vadd.xlane.f32.xlu0 %v2203_v13 }
 0xfee   : > { %v2202_v14 = vmul.f32 %v2200_v20, %v2200_v20 }
 0xff0   : > { %v2206_v21 = vsel %vm720_vm3, %v2202_v14, 0.0 }
 0xff1   : > { %2207 = vadd.xlane.f32.xlu1 %v2206_v21 }
0x1076   : > { %v2205_v31 = vpop.xlane.xlu0 %2204 }
0x1077   : > { %v2209_v47 = vmul.f32 0.03125, %v2205_v31 }
0x1079   : > { %v2211_v23 = vadd.f32 1e-05, %v2209_v47 }
0x107a   : > { %v2208_v24 = vpop.xlane.xlu1 %2207 }
0x107b   : > { %5099 = vrsqrt.f32 %v2211_v23  ;;  %v2210_v34 = vmul.f32 0.03125, %v2208_v24  ;;  %v4338_v24 = vld [vmem:[%s6048_s15] ss:$0 sm:$0xff] }
0x107d   : > { %v2212_v49 = vadd.f32 1e-05, %v2210_v34 }
0x107f   : > { %5101 = vrsqrt.f32 %v2212_v49 }
0x1088   : > { %v5100_v25 = vpop.eup %5099 }
0x1089   : > { %v2215_v26 = vmul.f32 %v5100_v25, %v2199_v9  ;;  %v5042_v9 = vld [vmem:[%s6039_s6 + $0x40] sm:$0xff]  }
0x108b   : > { %v2223_v30 = vmul.f32 %v4327_v27, %v2215_v26  ;;  %v5043_v26 = vld [vmem:[%s6041_s8 + $0x48] sm:$0xff]  }
0x108c   : > { %v5102_v28 = vpop.eup %5101 }
0x108d   : > { %v2216_v29 = vmul.f32 %v5102_v28, %v2200_v20  ;;  %v2231_v35 = vadd.f32 %v4328_v32, %v2223_v30  ;;  %v5044_v28 = vld [vmem:[%s6041_s8 + $0x40] sm:$0xff]  }
0x108f   : > { %v2224_v33 = vmul.f32 %v4327_v27, %v2216_v29 }
0x1091   : > { %v2232_v36 = vadd.f32 %v4328_v32, %v2224_v33  ;;  %v4353_v32 = vld [vmem:[%s6040_s7 + $0x4] ss:$0 sm:$0xff] }
0x1093   : > { %v2237_v37 = vpack.c.bf16 %v2232_v36, %v2231_v35 }
0x1095   : > { %4806 = vmatmul.mubr.msk.bf16.vlgmr.msra.gmra.mxu1 %vm720_vm3, %v2237_v37 }
0x1096   : > { %4821 = vmatprep.mubr.msk.bf16.mxu1 %vm5158_vm1, %v5157_v1  ;;  %4818 = vmatpush3.bf16.msra.mxu1 %v5039_v10 }
0x1097   : > { %4819 = vmatprep.subr.bf16.mxu1 %v5157_v1 }
0x109a   : > { %4820 = vmatpush3.bf16.msra.mxu1 %v5041_v12  ;;  %v4374_v12 = vld [vmem:[%s6038_s5 + $0x5] ss:$0 sm:$0xff] }
0x109b   : > { %4833 = vmatprep.subr.bf16.mxu1 %v5157_v1 }
0x1155   : > { %v2294_v50 = vpop.f32.mrf.mxu1 }
0x1156   : > { %v2295_v42 = vadd.f32 %v4329_v40, %v2294_v50 }
0x1157   : > { %v4807_v41 = vpop.f32.mrf.mxu1 }
0x1158   : > { %v2301_v45 = vmax.f32 %v2295_v42, 0.0 }
0x1159   : > { %v2297_v43 = vpop.f32.mrf.mxu1 }
0x115a   : > { %v2298_v55 = vadd.f32 %v4329_v40, %v2297_v43 }
0x115b   : > { %v4808_v44 = vpop.f32.mrf.mxu1 }
0x115c   : > { %v2302_v46 = vmax.f32 %v2298_v55, 0.0  ;;  %v4344_v55 = vld [vmem:[%s6038_s5 + $0x4] ss:$0 sm:$0xff] }
0x115d   : > { %v4362_v44 = vld [vmem:[%s6042_s9 + $0x4] ss:$0 sm:$0xff] }
0x115e   : > { %v2307_v48 = vpack.c.bf16 %v2302_v46, %v2301_v45 }
0x1160   : > { %4814 = vmatmul.mubr.msk.bf16.vlgmr.msra.gmra.mxu0 %vm720_vm3, %v2307_v48 }
0x1161   : > { %4829 = vmatprep.mubr.msk.bf16.mxu0 %vm5158_vm1, %v5157_v1  ;;  %4826 = vmatpush3.bf16.msra.mxu0 %v5040_v11 }
0x1162   : > { %4827 = vmatprep.subr.bf16.mxu0 %v5157_v1 }
0x1165   : > { %4828 = vmatpush3.bf16.msra.mxu0 %v5042_v9 }
0x1166   : > { %4841 = vmatprep.subr.bf16.mxu0 %v5157_v1 }
0x1220   : > { %v2364_v52 = vpop.f32.mrf.mxu0 }
0x1221   : > { %v2365_v53 = vadd.f32 %v4333_v51, %v2364_v52 }
0x1222   : > { %v4815_v54 = vpop.f32.mrf.mxu0 }
0x1223   : > { %v2371_v56 = vadd.f32 %v2365_v53, %v2231_v35 }
0x1224   : > { %v2367_v57 = vpop.f32.mrf.mxu0 }
0x1225   : > { %v2368_v58 = vadd.f32 %v4333_v51, %v2367_v57  ;;  %v2375_v59 = vsel %vm720_vm3, %v2371_v56, 0.0 }
0x1226   : > { %2376 = vadd.xlane.f32.xlu0 %v2375_v59  ;;  %v4816_v60 = vpop.f32.mrf.mxu0  ;;  %v5046_v59 = vld [vmem:[%s6063_s0 + $0x50] sm:$0xff]  }
0x1227   : > { %v2372_v61 = vadd.f32 %v2368_v58, %v2232_v36  ;;  %v5047_v60 = vld [vmem:[%s6041_s8 + $0x58] sm:$0xff]  }
0x1229   : > { %v2378_v62 = vsel %vm720_vm3, %v2372_v61, 0.0 }
0x122a   : > { %2379 = vadd.xlane.f32.xlu1 %v2378_v62 }
0x12af   : > { %v2377_v63 = vpop.xlane.xlu0 %2376 }
0x12b0   : > { %v2381_v0 = vmul.f32 0.03125, %v2377_v63 }
0x12b2   : > { %v2383_v2 = vsub.f32 %v2371_v56, %v2381_v0  ;;  %v5045_v56 = vld [vmem:[%s6063_s0 + $0x58] sm:$0xff]  }
0x12b3   : > { %v2380_v3 = vpop.xlane.xlu1 %2379 }
0x12b4   : > { %v2382_v4 = vmul.f32 0.03125, %v2380_v3  ;;  %v2385_v5 = vmul.f32 %v2383_v2, %v2383_v2 }
0x12b6   : > { %v2384_v6 = vsub.f32 %v2372_v61, %v2382_v4  ;;  %v2387_v7 = vsel %vm720_vm3, %v2385_v5, 0.0  ;;  %v5048_v61 = vld [vmem:[%s6041_s8 + $0x50] sm:$0xff]  }
0x12b7   : > { %2388 = vadd.xlane.f32.xlu0 %v2387_v7 }
0x12b8   : > { %v2386_v18 = vmul.f32 %v2384_v6, %v2384_v6 }
0x12ba   : > { %v2390_v8 = vsel %vm720_vm3, %v2386_v18, 0.0  ;;  %v5755_v18 = vld [vmem:[%s6065_s28 + $0x8] sm:$0xff] }
0x12bb   : > { %2391 = vadd.xlane.f32.xlu1 %v2390_v8 }
0x1340   : > { %v2389_v16 = vpop.xlane.xlu0 %2388 }
0x1341   : > { %v2393_v17 = vmul.f32 0.03125, %v2389_v16 }
0x1343   : > { %v2395_v19 = vadd.f32 1e-05, %v2393_v17 }
0x1344   : > { %v2392_v20 = vpop.xlane.xlu1 %2391 }
0x1345   : > { %5103 = vrsqrt.f32 %v2395_v19  ;;  %v2394_v13 = vmul.f32 0.03125, %v2392_v20 }
0x1347   : > { %v2396_v14 = vadd.f32 1e-05, %v2394_v13 }
0x1349   : > { %5105 = vrsqrt.f32 %v2396_v14 }
0x1352   : > { %v5104_v21 = vpop.eup %5103 }
0x1353   : > { %v2399_v15 = vmul.f32 %v5104_v21, %v2383_v2  ;;  %v5748_v2 = vld [vmem:[%s6065_s28] sm:$0xff] }
0x1354   : > { %v4392_v21 = vld [vmem:[%s6042_s9 + $0x5] ss:$0 sm:$0xff] }
0x1355   : > { %v2407_v47 = vmul.f32 %v4337_v22, %v2399_v15 }
0x1356   : > { %v5106_v31 = vpop.eup %5105 }
0x1357   : > { %v2400_v23 = vmul.f32 %v5106_v31, %v2384_v6  ;;  %v5678_v49 = vadd.f32 %v4338_v24, %v2407_v47 }
0x1359   : > { %v2408_v34 = vmul.f32 %v4337_v22, %v2400_v23 }
0x135b   : > { %v5680_v25 = vadd.f32 %v4338_v24, %v2408_v34 }
0x135d   : > { %v5687_v27 = vpack.c.bf16 %v5680_v25, %v5678_v49 }
0x135f   : > { %4822 = vmatmul.mubr.msk.bf16.vlgmr.msra.gmra.mxu1 %vm720_vm3, %v5687_v27  ;;  %4830 = vmatmul.mubr.msk.bf16.vlgmr.msra.gmra.mxu0 %vm720_vm3, %v5687_v27 }
0x1360   : > { %4834 = vmatpush3.bf16.msra.mxu1 %v5043_v26  ;;  %4837 = vmatprep.mubr.msk.bf16.mxu1 %vm5158_vm1, %v5157_v1 }
0x1361   : > { %4835 = vmatprep.subr.bf16.mxu1 %v5157_v1  ;;  %4843 = vmatprep.mubr.msk.bf16.mxu0 %vm5158_vm1, %v5157_v1 }
0x1364   : > { %4836 = vmatpush3.bf16.msra.mxu1 %v5044_v28 }
0x1365   : > { %4847 = vmatprep.subr.bf16.mxu1 %v5157_v1 }
0x1367   : > { %4838 = vmatmul.mubr.msk.bf16.vlgmr.msra.gmra.mxu1 %vm720_vm3, %v5687_v27 }
0x1368   : > { %4849 = vmatprep.mubr.msk.bf16.mxu1 %vm5158_vm1, %v5157_v1 }
0x141f   : > { %v2480_v29 = vpop.f32.mrf.mxu1  ;;  %v2546_v30 = vpop.f32.mrf.mxu0 }
0x1420   : > { %v2547_v38 = vadd.f32 %v4353_v32, %v2546_v30  ;;  %v2481_v51 = vadd.f32 %v4344_v55, %v2480_v29 }
0x1421   : > { %v4823_v33 = vpop.f32.mrf.mxu1  ;;  %v4831_v35 = vpop.f32.mrf.mxu0 }
0x1423   : > { %v2483_v36 = vpop.f32.mrf.mxu1  ;;  %v2549_v37 = vpop.f32.mrf.mxu0 }
0x1424   : > { %v2550_v39 = vadd.f32 %v4353_v32, %v2549_v37  ;;  %v2484_v46 = vadd.f32 %v4344_v55, %v2483_v36 }
0x1425   : > { %v4824_v40 = vpop.f32.mrf.mxu1  ;;  %v4832_v50 = vpop.f32.mrf.mxu0 }
0x1426   : > { %v2620_v41 = vpack.c.bf16 %v2550_v39, %v2547_v38  ;;  %v2619_v57 = vpack.c.bf16 %v2484_v46, %v2481_v51 }
0x1427   : > { %v2612_v42 = vpop.f32.mrf.mxu1 }
0x1428   : > { %v2625_v43 = vsel %vm895_vm4, %v2620_v41, 0  ;;  %v2613_v52 = vadd.f32 %v4362_v44, %v2612_v42 }
0x1429   : > { %v4839_v45 = vpop.f32.mrf.mxu1  ;;  %4842 = vmatpush3.bf16.xpose.msra.mxu0 %v2625_v43  ;;  %v5049_v43 = vld [vmem:[%s6039_s6 + $0x58] sm:$0xff]  }
0x142a   : > { %4853 = vmatprep.subr.bf16.mxu0 %v5157_v1 }
0x142b   : > { %v2615_v48 = vpop.f32.mrf.mxu1 }
0x142c   : > { %v2616_v53 = vadd.f32 %v4362_v44, %v2615_v48  ;;  %v5050_v44 = vld [vmem:[%s6039_s6 + $0x50] sm:$0xff]  }
0x142d   : > { %v4840_v54 = vpop.f32.mrf.mxu1 }
0x142e   : > { %v2695_v58 = vpack.c.bf16 %v2616_v53, %v2613_v52  ;;  %v4383_v54 = vld [vmem:[%s6040_s7 + $0x5] ss:$0 sm:$0xff] }
0x1430   : > { %4844 = vmatmul.mubr.msk.bf16.vlgmr.msra.gmra.mxu0 %vm895_vm4, %v2619_v57  ;;  %4848 = vmatpush3.bf16.msra.mxu1 %v2695_v58 }
0x1431   : > { %4854 = vmatpush3.bf16.msra.mxu0 %v5045_v56  ;;  %4857 = vmatprep.mubr.msk.bf16.mxu0 %vm5158_vm1, %v5157_v1 }
0x1432   : > { %4855 = vmatprep.subr.bf16.mxu0 %v5157_v1  ;;  %4861 = vmatprep.subr.bf16.mxu1 %v5157_v1 }
0x1435   : > { %4856 = vmatpush3.bf16.msra.mxu0 %v5046_v59 }
0x1436   : > { %4869 = vmatprep.subr.bf16.mxu0 %v5157_v1 }
0x1438   : > { %4858 = vmatmul.mubr.msk.bf16.vlgmr.msra.gmra.mxu0 %vm720_vm3, %v5687_v27 }
0x1439   : > { %4870 = vmatpush3.bf16.msra.mxu0 %v5047_v60  ;;  %4873 = vmatprep.mubr.msk.bf16.mxu0 %vm5158_vm1, %v5157_v1 }
0x143a   : > { %4871 = vmatprep.subr.bf16.mxu0 %v5157_v1 }
0x143d   : > { %4872 = vmatpush3.bf16.msra.mxu0 %v5048_v61 }
0x143e   : > { %4883 = vmatprep.subr.bf16.mxu0 %v5157_v1 }
0x1440   : > { %4874 = vmatmul.mubr.msk.bf16.vlgmr.msra.gmra.mxu0 %vm720_vm3, %v5687_v27 }
0x1441   : > { %4885 = vmatprep.mubr.msk.bf16.mxu0 %vm5158_vm1, %v5157_v1 }
0x14f0   : > { %v2661_v62 = vpop.f32.mrf.mxu0 }
0x14f1   : > { %v2668_v63 = vmul.f32 0.35355338, %v2661_v62 }
0x14f2   : > { %v4845_v0 = vpop.f32.mrf.mxu0 }
0x14f3   : > { %v2670_v3 = vadd.f32 %v5748_v2, %v2668_v63 }
0x14f4   : > { %v2664_v4 = vpop.f32.mrf.mxu0 }
0x14f5   : > { %v2669_v5 = vmul.f32 0.35355338, %v2664_v4  ;;  %v2672_v6 = vsel %vm947_vm5, %v2670_v3, -inf }
0x14f6   : > { %2673 = vmax.xlane.f32.xlu0 %v2672_v6  ;;  %v4846_v7 = vpop.f32.mrf.mxu0 }
0x14f7   : > { %v2671_v8 = vadd.f32 %v5755_v18, %v2669_v5 }
0x14f8   : > { %v2802_v10 = vpop.f32.mrf.mxu0 }
0x14f9   : > { %v2675_v11 = vsel %vm947_vm5, %v2671_v8, -inf  ;;  %v5762_v17 = vadd.f32 %v4374_v12, %v2802_v10 }
0x14fa   : > { %2676 = vmax.xlane.f32.xlu1 %v2675_v11  ;;  %v4859_v9 = vpop.f32.mrf.mxu0 }
0x14fc   : > { %v2805_v16 = vpop.f32.mrf.mxu0 }
0x14fd   : > { %v5764_v19 = vadd.f32 %v4374_v12, %v2805_v16 }
0x14fe   : > { %v4860_v20 = vpop.f32.mrf.mxu0 }
0x14ff   : > { %v2941_v13 = vpack.c.bf16 %v5764_v19, %v5762_v17 }
0x1500   : > { %v2934_v14 = vpop.f32.mrf.mxu0 }
0x1501   : > { %v2935_v31 = vadd.f32 %v4392_v21, %v2934_v14 }
0x1502   : > { %v4875_v15 = vpop.f32.mrf.mxu0 }
0x1504   : > { %v2937_v22 = vpop.f32.mrf.mxu0 }
0x1505   : > { %v2938_v47 = vadd.f32 %v4392_v21, %v2937_v22 }
0x1506   : > { %v4876_v23 = vpop.f32.mrf.mxu0 }
0x1507   : > { %v3017_v24 = vpack.c.bf16 %v2938_v47, %v2935_v31 }
0x1509   : > { %4884 = vmatpush3.bf16.msra.mxu0 %v3017_v24  ;;  %v4368_v24 = vld [vmem:[%s6043_s10 + $0x10] sm:$0xf] }
0x150a   : > { %4895 = vmatprep.subr.bf16.mxu0 %v5157_v1 }
0x157f   : > { %v2674_v34 = vpop.xlane.xlu0 %2673 }
0x1580   : > { %v2678_v26 = vsub.f32 %v2670_v3, %v2674_v34 }
0x1582   : > { %v2680_v28 = vmul.f32 1.442695, %v2678_v26 }
0x1583   : > { %v2677_v29 = vpop.xlane.xlu1 %2676 }
0x1584   : > { %5107 = vpow2.f32 %v2680_v28  ;;  %v2679_v30 = vsub.f32 %v2671_v8, %v2677_v29  ;;  %v3116_v29 = vsel %vm1343_vm6, %v4368_v24, 0 }
0x1586   : > { %v2682_v32 = vmul.f32 1.442695, %v2679_v30  ;;  %v5051_v30 = vld [vmem:[%s6039_s6 + $0x68] sm:$0xff]  }
0x1588   : > { %5109 = vpow2.f32 %v2682_v32  ;;  %v5052_v32 = vld [vmem:[%s6039_s6 + $0x60] sm:$0xff]  }
0x1591   : > { %v5108_v33 = vpop.eup %5107 }
0x1592   : > { %v2684_v35 = vsel %vm947_vm5, %v5108_v33, 0.0 }
0x1593   : > { %2685 = vadd.xlane.f32.xlu0 %v2684_v35 }
0x1595   : > { %v5110_v36 = vpop.eup %5109 }
0x1596   : > { %v2687_v37 = vsel %vm947_vm5, %v5110_v36, 0.0 }
0x1597   : > { %2688 = vadd.xlane.f32.xlu1 %v2687_v37 }
0x161c   : > { %v2686_v38 = vpop.xlane.xlu0 %2685 }
0x161d   : > { %5111 = vrcp.f32 %v2686_v38 }
0x1620   : > { %v2689_v39 = vpop.xlane.xlu1 %2688 }
0x1621   : > { %5113 = vrcp.f32 %v2689_v39  ;;  %v5053_v39 = vld [vmem:[%s6063_s0 + $0x68] sm:$0xff]  }
0x162a   : > { %v5112_v40 = vpop.eup %5111 }
0x162b   : > { %v2692_v41 = vmul.f32 %v5112_v40, %v5108_v33  ;;  %v4398_v33 = vld [vmem:[%s6043_s10 + $0x14] sm:$0xf] }
0x162c   : > { %v3069_v35 = vsel %vm1343_vm6, %v4398_v33, 0 }
0x162e   : > { %v5114_v50 = vpop.eup %5113 }
0x162f   : > { %v2693_v42 = vmul.f32 %v5114_v50, %v5110_v36 }
0x1631   : > { %v2694_v55 = vpack.c.bf16 %v2693_v42, %v2692_v41  ;;  %v5054_v42 = vld [vmem:[%s6063_s0 + $0x60] sm:$0xff]  }
0x1633   : > { %4850 = vmatmul.mubr.msk.bf16.vlgmr.msra.gmra.mxu1 %vm947_vm5, %v2694_v55 }
0x1634   : > { %4862 = vmatpush3.bf16.msra.mxu1 %v5049_v43  ;;  %4865 = vmatprep.mubr.msk.bf16.mxu1 %vm5158_vm1, %v5157_v1 }
0x1635   : > { %4863 = vmatprep.subr.bf16.mxu1 %v5157_v1 }
0x1638   : > { %4864 = vmatpush3.bf16.msra.mxu1 %v5050_v44  ;;  %v5055_v44 = vld [vmem:[%s6041_s8 + $0x68] sm:$0xff]  }
0x1639   : > { %4877 = vmatprep.subr.bf16.mxu1 %v5157_v1 }
0x163b   : > { %4866 = vmatmul.mubr.msk.bf16.vlgmr.msra.gmra.mxu1 %vm720_vm3, %v5687_v27 }
0x163c   : > { %4879 = vmatprep.mubr.msk.bf16.mxu1 %vm5158_vm1, %v5157_v1 }
0x16f3   : > { %v2733_v45 = vpop.f32.mrf.mxu1 }
0x16f5   : > { %v4851_v46 = vpop.f32.mrf.mxu1 }
0x16f7   : > { %v2736_v48 = vpop.f32.mrf.mxu1 }
0x16f8   : > { %v2742_v51 = vpack.c.bf16 %v2736_v48, %v2733_v45  ;;  %v5056_v48 = vld [vmem:[%s6041_s8 + $0x60] sm:$0xff]  }
0x16f9   : > { %v4852_v52 = vpop.f32.mrf.mxu1 }
0x16fb   : > { %v2868_v53 = vpop.f32.mrf.mxu1 }
0x16fc   : > { %v2869_v58 = vadd.f32 %v4383_v54, %v2868_v53 }
0x16fd   : > { %v4867_v56 = vpop.f32.mrf.mxu1 }
0x16ff   : > { %v2871_v57 = vpop.f32.mrf.mxu1 }
0x1700   : > { %v2872_v59 = vadd.f32 %v4383_v54, %v2871_v57 }
0x1701   : > { %v4868_v60 = vpop.f32.mrf.mxu1 }
0x1702   : > { %v2942_v61 = vpack.c.bf16 %v2872_v59, %v2869_v58 }
0x1704   : > { %v2947_v62 = vsel %vm895_vm4, %v2942_v61, 0 }
0x1705   : > { %4878 = vmatpush3.bf16.xpose.msra.mxu1 %v2947_v62 }
0x1706   : > { %4889 = vmatprep.subr.bf16.mxu1 %v5157_v1 }
0x170c   : > { %4880 = vmatmul.mubr.msk.bf16.vlgmr.msra.gmra.mxu1 %vm895_vm4, %v2941_v13 }
0x170d   : > { %4891 = vmatprep.mubr.msk.bf16.mxu1 %vm5158_vm1, %v5157_v1  ;;  %4890 = vmatpush3.bf16.msra.mxu1 %v3069_v35 }
0x170e   : > { %4901 = vmatprep.subr.bf16.mxu1 %v5157_v1 }
0x17cc   : > { %v2983_v63 = vpop.f32.mrf.mxu1 }
0x17cd   : > { %v2990_v0 = vmul.f32 0.35355338, %v2983_v63 }
0x17ce   : > { %v4881_v3 = vpop.f32.mrf.mxu1 }
0x17cf   : > { %v2992_v4 = vadd.f32 %v5748_v2, %v2990_v0  ;;  %v4406_v3 = vld [vmem:[%s6038_s5 + $0x6] ss:$0 sm:$0xff] }
0x17d0   : > { %v2986_v5 = vpop.f32.mrf.mxu1 }
0x17d1   : > { %v2991_v6 = vmul.f32 0.35355338, %v2986_v5  ;;  %v2994_v7 = vsel %vm947_vm5, %v2992_v4, -inf }
0x17d2   : > { %2995 = vmax.xlane.f32.xlu0 %v2994_v7  ;;  %v4882_v8 = vpop.f32.mrf.mxu1 }
0x17d3   : > { %v2993_v10 = vadd.f32 %v5755_v18, %v2991_v6 }
0x17d5   : > { %v2997_v11 = vsel %vm947_vm5, %v2993_v10, -inf }
0x17d6   : > { %2998 = vmax.xlane.f32.xlu1 %v2997_v11 }
0x185b   : > { %v2996_v12 = vpop.xlane.xlu0 %2995 }
0x185c   : > { %v3000_v9 = vsub.f32 %v2992_v4, %v2996_v12  ;;  %v4424_v12 = vld [vmem:[%s6042_s9 + $0x6] ss:$0 sm:$0xff] }
0x185e   : > { %v3002_v16 = vmul.f32 1.442695, %v3000_v9 }
0x185f   : > { %v2999_v17 = vpop.xlane.xlu1 %2998 }
0x1860   : > { %5115 = vpow2.f32 %v3002_v16  ;;  %v3001_v19 = vsub.f32 %v2993_v10, %v2999_v17 }
0x1862   : > { %v3004_v20 = vmul.f32 1.442695, %v3001_v19 }
0x1864   : > { %5117 = vpow2.f32 %v3004_v20 }
0x186d   : > { %v5116_v13 = vpop.eup %5115 }
0x186e   : > { %v3006_v14 = vsel %vm947_vm5, %v5116_v13, 0.0 }
0x186f   : > { %3007 = vadd.xlane.f32.xlu0 %v3006_v14 }
0x1871   : > { %v5118_v21 = vpop.eup %5117 }
0x1872   : > { %v3009_v15 = vsel %vm947_vm5, %v5118_v21, 0.0 }
0x1873   : > { %3010 = vadd.xlane.f32.xlu1 %v3009_v15 }
0x18f8   : > { %v3008_v22 = vpop.xlane.xlu0 %3007 }
0x18f9   : > { %5119 = vrcp.f32 %v3008_v22 }
0x18fc   : > { %v3011_v31 = vpop.xlane.xlu1 %3010 }
0x18fd   : > { %5121 = vrcp.f32 %v3011_v31 }
0x1906   : > { %v5120_v47 = vpop.eup %5119 }
0x1907   : > { %v3014_v34 = vmul.f32 %v5120_v47, %v5116_v13 }
0x190a   : > { %v5122_v23 = vpop.eup %5121 }
0x190b   : > { %v3015_v26 = vmul.f32 %v5122_v23, %v5118_v21 }
0x190d   : > { %v3016_v28 = vpack.c.bf16 %v3015_v26, %v3014_v34 }
0x190f   : > { %4886 = vmatmul.mubr.msk.bf16.vlgmr.msra.gmra.mxu0 %vm947_vm5, %v3016_v28 }
0x1910   : > { %4896 = vmatpush3.bf16.msra.mxu0 %v3116_v29  ;;  %4897 = vmatprep.mubr.msk.bf16.mxu0 %vm5158_vm1, %v5157_v1 }
0x1911   : > { %4909 = vmatprep.subr.bf16.mxu0 %v5157_v1 }
0x1917   : > { %4898 = vmatmul.mubr.msk.bf16.vlgmr.msra.gmra.mxu0 %vm895_vm4, %v2742_v51  ;;  %v4415_v51 = vld [vmem:[%s6040_s7 + $0x6] ss:$0 sm:$0xff] }
0x1918   : > { %4910 = vmatpush3.bf16.msra.mxu0 %v5051_v30  ;;  %4913 = vmatprep.mubr.msk.bf16.mxu0 %vm5158_vm1, %v5157_v1 }
0x1919   : > { %4911 = vmatprep.subr.bf16.mxu0 %v5157_v1 }
0x191c   : > { %4912 = vmatpush3.bf16.msra.mxu0 %v5052_v32 }
0x191d   : > { %4925 = vmatprep.subr.bf16.mxu0 %v5157_v1 }
0x191f   : > { %4914 = vmatmul.mubr.msk.bf16.vlgmr.msra.gmra.mxu0 %vm720_vm3, %v5687_v27 }
0x1920   : > { %4927 = vmatprep.mubr.msk.bf16.mxu0 %vm5158_vm1, %v5157_v1 }
0x19cf   : > { %v3055_v36 = vpop.f32.mrf.mxu0 }
0x19d1   : > { %v4887_v37 = vpop.f32.mrf.mxu0 }
0x19d3   : > { %v3058_v38 = vpop.f32.mrf.mxu0 }
0x19d4   : > { %v3064_v40 = vpack.c.bf16 %v3058_v38, %v3055_v36 }
0x19d5   : > { %v4888_v50 = vpop.f32.mrf.mxu0 }
0x19d6   : > { %4892 = vmatmul.mubr.msk.bf16.vlgmr.msra.gmra.mxu1 %vm895_vm4, %v3064_v40 }
0x19d7   : > { %v5835_v41 = vpop.f32.mrf.mxu0  ;;  %4902 = vmatpush3.bf16.msra.mxu1 %v5053_v39  ;;  %4905 = vmatprep.mubr.msk.bf16.mxu1 %vm5158_vm1, %v5157_v1 }
0x19d8   : > { %4903 = vmatprep.subr.bf16.mxu1 %v5157_v1 }
0x19d9   : > { %v4899_v43 = vpop.f32.mrf.mxu0 }
0x19db   : > { %v5843_v55 = vpop.f32.mrf.mxu0  ;;  %4904 = vmatpush3.bf16.msra.mxu1 %v5054_v42 }
0x19dc   : > { %4917 = vmatprep.subr.bf16.mxu1 %v5157_v1 }
0x19dd   : > { %v4900_v45 = vpop.f32.mrf.mxu0 }
0x19de   : > { %4906 = vmatmul.mubr.msk.bf16.vlgmr.msra.gmra.mxu1 %vm720_vm3, %v5687_v27 }
0x19df   : > { %v3284_v46 = vpop.f32.mrf.mxu0  ;;  %4918 = vmatpush3.bf16.msra.mxu1 %v5055_v44  ;;  %4921 = vmatprep.mubr.msk.bf16.mxu1 %vm5158_vm1, %v5157_v1 }
0x19e0   : > { %4919 = vmatprep.subr.bf16.mxu1 %v5157_v1  ;;  %v3285_v54 = vadd.f32 %v4415_v51, %v3284_v46  ;;  %v5057_v46 = vld [vmem:[%s6063_s0 + $0x78] sm:$0xff]  }
0x19e1   : > { %v4915_v52 = vpop.f32.mrf.mxu0 }
0x19e2   : > { %v5059_v52 = vld [vmem:[%s6041_s8 + $0x78] sm:$0xff]  }
0x19e3   : > { %v3287_v53 = vpop.f32.mrf.mxu0  ;;  %4920 = vmatpush3.bf16.msra.mxu1 %v5056_v48 }
0x19e4   : > { %v3288_v56 = vadd.f32 %v4415_v51, %v3287_v53  ;;  %4931 = vmatprep.subr.bf16.mxu1 %v5157_v1  ;;  %v5058_v51 = vld [vmem:[%s6063_s0 + $0x70] sm:$0xff]  }
0x19e5   : > { %v4916_v57 = vpop.f32.mrf.mxu0  ;;  %v5060_v53 = vld [vmem:[%s6041_s8 + $0x70] sm:$0xff]  }
0x19e6   : > { %v3358_v58 = vpack.c.bf16 %v3288_v56, %v3285_v54  ;;  %4922 = vmatmul.mubr.msk.bf16.vlgmr.msra.gmra.mxu1 %vm720_vm3, %v5687_v27  ;;  %v4430_v54 = vld [vmem:[%s6043_s10 + $0x18] sm:$0xf] }
0x19e7   : > { %4933 = vmatprep.mubr.msk.bf16.mxu1 %vm5158_vm1, %v5157_v1  ;;  %v3485_v56 = vsel %vm1343_vm6, %v4430_v54, 0 }
0x19e8   : > { %v3363_v59 = vsel %vm895_vm4, %v3358_v58, 0 }
0x19e9   : > { %4926 = vmatpush3.bf16.xpose.msra.mxu0 %v3363_v59 }
0x19ea   : > { %4937 = vmatprep.subr.bf16.mxu0 %v5157_v1 }
0x1a96   : > { %v5867_v60 = vpop.f32.mrf.mxu1 }
0x1a98   : > { %v4893_v61 = vpop.f32.mrf.mxu1 }
0x1a99   : > { %v5061_v61 = vld [vmem:[%s6039_s6 + $0x78] sm:$0xff]  }
0x1a9a   : > { %v5869_v62 = vpop.f32.mrf.mxu1 }
0x1a9c   : > { %v4894_v63 = vpop.f32.mrf.mxu1 }
0x1a9e   : > { %v3218_v0 = vpop.f32.mrf.mxu1 }
0x1a9f   : > { %v3219_v6 = vadd.f32 %v4406_v3, %v3218_v0 }
0x1aa0   : > { %v4907_v4 = vpop.f32.mrf.mxu1 }
0x1aa1   : > { %v5062_v4 = vld [vmem:[%s6039_s6 + $0x70] sm:$0xff]  }
0x1aa2   : > { %v3221_v5 = vpop.f32.mrf.mxu1 }
0x1aa3   : > { %v3222_v7 = vadd.f32 %v4406_v3, %v3221_v5  ;;  %v4437_v5 = vld [vmem:[%s6038_s5 + $0x7] ss:$0 sm:$0xff] }
0x1aa4   : > { %v4908_v8 = vpop.f32.mrf.mxu1 }
0x1aa5   : > { %v3357_v10 = vpack.c.bf16 %v3222_v7, %v3219_v6 }
0x1aa6   : > { %v3350_v11 = vpop.f32.mrf.mxu1 }
0x1aa7   : > { %4928 = vmatmul.mubr.msk.bf16.vlgmr.msra.gmra.mxu0 %vm895_vm4, %v3357_v10  ;;  %v3351_v17 = vadd.f32 %v4424_v12, %v3350_v11 }
0x1aa8   : > { %v4923_v9 = vpop.f32.mrf.mxu1  ;;  %4939 = vmatprep.mubr.msk.bf16.mxu0 %vm5158_vm1, %v5157_v1  ;;  %4938 = vmatpush3.bf16.msra.mxu0 %v3485_v56 }
0x1aa9   : > { %4951 = vmatprep.subr.bf16.mxu0 %v5157_v1 }
0x1aaa   : > { %v3353_v16 = vpop.f32.mrf.mxu1 }
0x1aab   : > { %v3354_v19 = vadd.f32 %v4424_v12, %v3353_v16  ;;  %v4455_v16 = vld [vmem:[%s6042_s9 + $0x7] ss:$0 sm:$0xff] }
0x1aac   : > { %v4924_v20 = vpop.f32.mrf.mxu1 }
0x1aad   : > { %v3433_v13 = vpack.c.bf16 %v3354_v19, %v3351_v17 }
0x1aaf   : > { %4932 = vmatpush3.bf16.msra.mxu1 %v3433_v13 }
0x1ab0   : > { %4943 = vmatprep.subr.bf16.mxu1 %v5157_v1 }
0x1b67   : > { %v3399_v14 = vpop.f32.mrf.mxu0 }
0x1b68   : > { %v3406_v21 = vmul.f32 0.35355338, %v3399_v14 }
0x1b69   : > { %v4929_v15 = vpop.f32.mrf.mxu0 }
0x1b6a   : > { %v3408_v22 = vadd.f32 %v5748_v2, %v3406_v21 }
0x1b6b   : > { %v3402_v31 = vpop.f32.mrf.mxu0 }
0x1b6c   : > { %v3407_v47 = vmul.f32 0.35355338, %v3402_v31  ;;  %v3410_v23 = vsel %vm947_vm5, %v3408_v22, -inf }
0x1b6d   : > { %3411 = vmax.xlane.f32.xlu0 %v3410_v23  ;;  %v4930_v24 = vpop.f32.mrf.mxu0 }
0x1b6e   : > { %v3409_v34 = vadd.f32 %v5755_v18, %v3407_v47  ;;  %v3156_v47 = vadd.f32 %v5843_v55, %v5869_v62 }
0x1b70   : > { %v3413_v26 = vsel %vm947_vm5, %v3409_v34, -inf }
0x1b71   : > { %3414 = vmax.xlane.f32.xlu1 %v3413_v26 }
0x1bf6   : > { %v3412_v28 = vpop.xlane.xlu0 %3411 }
0x1bf7   : > { %v3416_v29 = vsub.f32 %v3408_v22, %v3412_v28  ;;  %v4446_v28 = vld [vmem:[%s6040_s7 + $0x7] ss:$0 sm:$0xff] }
0x1bf9   : > { %v3418_v30 = vmul.f32 1.442695, %v3416_v29 }
0x1bfa   : > { %v3415_v32 = vpop.xlane.xlu1 %3414 }
0x1bfb   : > { %5123 = vpow2.f32 %v3418_v30  ;;  %v3417_v33 = vsub.f32 %v3409_v34, %v3415_v32 }
0x1bfd   : > { %v3420_v35 = vmul.f32 1.442695, %v3417_v33 }
0x1bff   : > { %5125 = vpow2.f32 %v3420_v35 }
0x1c08   : > { %v5124_v36 = vpop.eup %5123 }
0x1c09   : > { %v3422_v37 = vsel %vm947_vm5, %v5124_v36, 0.0 }
0x1c0a   : > { %3423 = vadd.xlane.f32.xlu0 %v3422_v37 }
0x1c0c   : > { %v5126_v38 = vpop.eup %5125 }
0x1c0d   : > { %v3425_v39 = vsel %vm947_vm5, %v5126_v38, 0.0 }
0x1c0e   : > { %3426 = vadd.xlane.f32.xlu1 %v3425_v39 }
0x1c93   : > { %v3424_v40 = vpop.xlane.xlu0 %3423 }
0x1c94   : > { %5127 = vrcp.f32 %v3424_v40 }
0x1c97   : > { %v3427_v50 = vpop.xlane.xlu1 %3426 }
0x1c98   : > { %5129 = vrcp.f32 %v3427_v50 }
0x1ca1   : > { %v5128_v42 = vpop.eup %5127 }
0x1ca2   : > { %v3430_v44 = vmul.f32 %v5128_v42, %v5124_v36 }
0x1ca5   : > { %v5130_v43 = vpop.eup %5129 }
0x1ca6   : > { %v3431_v45 = vmul.f32 %v5130_v43, %v5126_v38 }
0x1ca8   : > { %v3432_v48 = vpack.c.bf16 %v3431_v45, %v3430_v44 }
0x1caa   : > { %4934 = vmatmul.mubr.msk.bf16.vlgmr.msra.gmra.mxu1 %vm947_vm5, %v3432_v48 }
0x1cab   : > { %4944 = vmatpush3.bf16.msra.mxu1 %v5057_v46  ;;  %4947 = vmatprep.mubr.msk.bf16.mxu1 %vm5158_vm1, %v5157_v1 }
0x1cac   : > { %4945 = vmatprep.subr.bf16.mxu1 %v5157_v1 }
0x1caf   : > { %4946 = vmatpush3.bf16.msra.mxu1 %v5058_v51 }
0x1cb0   : > { %4959 = vmatprep.subr.bf16.mxu1 %v5157_v1 }
0x1cb2   : > { %4948 = vmatmul.mubr.msk.bf16.vlgmr.msra.gmra.mxu1 %vm720_vm3, %v5687_v27 }
0x1cb3   : > { %4960 = vmatpush3.bf16.msra.mxu1 %v5059_v52  ;;  %4963 = vmatprep.mubr.msk.bf16.mxu1 %vm5158_vm1, %v5157_v1 }
0x1cb4   : > { %4961 = vmatprep.subr.bf16.mxu1 %v5157_v1 }
0x1cb7   : > { %4962 = vmatpush3.bf16.msra.mxu1 %v5060_v53 }
0x1cb8   : > { %4973 = vmatprep.subr.bf16.mxu1 %v5157_v1 }
0x1cba   : > { %4964 = vmatmul.mubr.msk.bf16.vlgmr.msra.gmra.mxu1 %vm720_vm3, %v5687_v27 }
0x1cbb   : > { %4975 = vmatprep.mubr.msk.bf16.mxu1 %vm5158_vm1, %v5157_v1 }
0x1d6a   : > { %v3471_v57 = vpop.f32.mrf.mxu1 }
0x1d6c   : > { %v4935_v58 = vpop.f32.mrf.mxu1 }
0x1d6e   : > { %v3474_v59 = vpop.f32.mrf.mxu1 }
0x1d6f   : > { %v3480_v63 = vpack.c.bf16 %v3474_v59, %v3471_v57 }
0x1d70   : > { %v4936_v0 = vpop.f32.mrf.mxu1 }
0x1d71   : > { %4940 = vmatmul.mubr.msk.bf16.vlgmr.msra.gmra.mxu0 %vm895_vm4, %v3480_v63 }
0x1d72   : > { %v3589_v3 = vpop.f32.mrf.mxu1  ;;  %4952 = vmatpush3.bf16.msra.mxu0 %v5061_v61  ;;  %4955 = vmatprep.mubr.msk.bf16.mxu0 %vm5158_vm1, %v5157_v1 }
0x1d73   : > { %4953 = vmatprep.subr.bf16.mxu0 %v5157_v1  ;;  %v3590_v8 = vadd.f32 %v4437_v5, %v3589_v3  ;;  %v4461_v3 = vld [vmem:[%s6043_s10 + $0x1c] sm:$0xf] }
0x1d74   : > { %v4949_v6 = vpop.f32.mrf.mxu1 }
0x1d76   : > { %v3592_v7 = vpop.f32.mrf.mxu1  ;;  %4954 = vmatpush3.bf16.msra.mxu0 %v5062_v4  ;;  %v3856_v4 = vsel %vm1343_vm6, %v4461_v3, 0 }
0x1d77   : > { %v3593_v10 = vadd.f32 %v4437_v5, %v3592_v7  ;;  %4967 = vmatprep.subr.bf16.mxu0 %v5157_v1 }
0x1d78   : > { %v4950_v11 = vpop.f32.mrf.mxu1 }
0x1d79   : > { %v3728_v12 = vpack.c.bf16 %v3593_v10, %v3590_v8  ;;  %4956 = vmatmul.mubr.msk.bf16.vlgmr.msra.gmra.mxu0 %vm720_vm3, %v5687_v27  ;;  %v3153_v27 = vadd.f32 %v5835_v41, %v5867_v60 }
0x1d7a   : > { %v3721_v9 = vpop.f32.mrf.mxu1  ;;  %4969 = vmatprep.mubr.msk.bf16.mxu0 %vm5158_vm1, %v5157_v1 }
0x1d7b   : > { %v3722_v20 = vadd.f32 %v4455_v16, %v3721_v9 }
0x1d7c   : > { %v4965_v17 = vpop.f32.mrf.mxu1 }
0x1d7e   : > { %v3724_v19 = vpop.f32.mrf.mxu1 }
0x1d7f   : > { %v3725_v13 = vadd.f32 %v4455_v16, %v3724_v19 }
0x1d80   : > { %v4966_v14 = vpop.f32.mrf.mxu1 }
0x1d81   : > { %v3804_v21 = vpack.c.bf16 %v3725_v13, %v3722_v20 }
0x1d83   : > { %4974 = vmatpush3.bf16.msra.mxu1 %v3804_v21 }
0x1d84   : > { %4985 = vmatprep.subr.bf16.mxu1 %v5157_v1 }
0x1e31   : > { %v3521_v15 = vpop.f32.mrf.mxu0 }
0x1e32   : > { %v5943_v22 = vadd.f32 %v3521_v15, %v3153_v27 }
0x1e33   : > { %v4941_v31 = vpop.f32.mrf.mxu0 }
0x1e35   : > { %v3524_v23 = vpop.f32.mrf.mxu0 }
0x1e36   : > { %v5947_v24 = vadd.f32 %v3524_v23, %v3156_v47 }
0x1e37   : > { %v4942_v34 = vpop.f32.mrf.mxu0 }
0x1e39   : > { %v3655_v26 = vpop.f32.mrf.mxu0 }
0x1e3a   : > { %v3656_v32 = vadd.f32 %v4446_v28, %v3655_v26 }
0x1e3b   : > { %v4957_v29 = vpop.f32.mrf.mxu0 }
0x1e3d   : > { %v3658_v30 = vpop.f32.mrf.mxu0 }
0x1e3e   : > { %v3659_v41 = vadd.f32 %v4446_v28, %v3658_v30 }
0x1e3f   : > { %v4958_v60 = vpop.f32.mrf.mxu0 }
0x1e40   : > { %v3729_v33 = vpack.c.bf16 %v3659_v41, %v3656_v32  ;;  %v5064_v32 = vld [vmem:[%s6049_s16 + $0x10] sm:$0xff]  }
0x1e42   : > { %v3734_v35 = vsel %vm895_vm4, %v3729_v33, 0 }
0x1e43   : > { %4968 = vmatpush3.bf16.xpose.msra.mxu0 %v3734_v35 }
0x1e44   : > { %4979 = vmatprep.subr.bf16.mxu0 %v5157_v1 }
0x1e4a   : > { %4970 = vmatmul.mubr.msk.bf16.vlgmr.msra.gmra.mxu0 %vm895_vm4, %v3728_v12  ;;  %v4464_v12 = vld [vmem:[%s6044_s11 + $0x1] ss:$0 sm:$0xff] }
0x1e4b   : > { %4981 = vmatprep.mubr.msk.bf16.mxu0 %vm5158_vm1, %v5157_v1  ;;  %4980 = vmatpush3.bf16.msra.mxu0 %v3856_v4 }
0x1e4c   : > { %4993 = vmatprep.subr.bf16.mxu0 %v5157_v1 }
0x1f0a   : > { %v3770_v55 = vpop.f32.mrf.mxu0 }
0x1f0b   : > { %v3777_v62 = vmul.f32 0.35355338, %v3770_v55 }
0x1f0c   : > { %v4971_v36 = vpop.f32.mrf.mxu0 }
0x1f0d   : > { %v3779_v37 = vadd.f32 %v5748_v2, %v3777_v62 }
0x1f0e   : > { %v3773_v38 = vpop.f32.mrf.mxu0 }
0x1f0f   : > { %v3778_v39 = vmul.f32 0.35355338, %v3773_v38  ;;  %v3781_v40 = vsel %vm947_vm5, %v3779_v37, -inf  ;;  %v4467_v38 = vld [vmem:[%s6045_s12 + $0x1] ss:$0 sm:$0xff] }
0x1f10   : > { %3782 = vmax.xlane.f32.xlu0 %v3781_v40  ;;  %v4972_v50 = vpop.f32.mrf.mxu0 }
0x1f11   : > { %v3780_v42 = vadd.f32 %v5755_v18, %v3778_v39 }
0x1f13   : > { %v3784_v43 = vsel %vm947_vm5, %v3780_v42, -inf }
0x1f14   : > { %3785 = vmax.xlane.f32.xlu1 %v3784_v43 }
0x1f99   : > { %v3783_v44 = vpop.xlane.xlu0 %3782 }
0x1f9a   : > { %v3787_v45 = vsub.f32 %v3779_v37, %v3783_v44 }
0x1f9c   : > { %v3789_v46 = vmul.f32 1.442695, %v3787_v45 }
0x1f9d   : > { %v3786_v48 = vpop.xlane.xlu1 %3785 }
0x1f9e   : > { %5131 = vpow2.f32 %v3789_v46  ;;  %v3788_v51 = vsub.f32 %v3780_v42, %v3786_v48  ;;  %v4468_v42 = vld [vmem:[%s6046_s13 + $0x1] ss:$0 sm:$0xff]  ;;  %v5065_v48 = vld [vmem:[%s6051_s18 + $0x18] sm:$0xff]  }
0x1fa0   : > { %v3791_v52 = vmul.f32 1.442695, %v3788_v51  ;;  %v5066_v51 = vld [vmem:[%s6051_s18 + $0x10] sm:$0xff]  }
0x1fa2   : > { %5133 = vpow2.f32 %v3791_v52  ;;  %v4474_v52 = vld [vmem:[%s6050_s17 + $0x1] ss:$0 sm:$0xff] }
0x1fab   : > { %v5132_v2 = vpop.eup %5131 }
0x1fac   : > { %v3793_v53 = vsel %vm947_vm5, %v5132_v2, 0.0 }
0x1fad   : > { %3794 = vadd.xlane.f32.xlu0 %v3793_v53 }
0x1faf   : > { %v5134_v54 = vpop.eup %5133 }
0x1fb0   : > { %v3796_v56 = vsel %vm947_vm5, %v5134_v54, 0.0 }
0x1fb1   : > { %3797 = vadd.xlane.f32.xlu1 %v3796_v56 }
0x2036   : > { %v3795_v18 = vpop.xlane.xlu0 %3794 }
0x2037   : > { %5135 = vrcp.f32 %v3795_v18 }
0x203a   : > { %v3798_v57 = vpop.xlane.xlu1 %3797 }
0x203b   : > { %5137 = vrcp.f32 %v3798_v57 }
0x2044   : > { %v5136_v58 = vpop.eup %5135 }
0x2045   : > { %v3801_v61 = vmul.f32 %v5136_v58, %v5132_v2 }
0x2048   : > { %v5138_v59 = vpop.eup %5137 }
0x2049   : > { %v3802_v63 = vmul.f32 %v5138_v59, %v5134_v54 }
0x204b   : > { %v3803_v0 = vpack.c.bf16 %v3802_v63, %v3801_v61 }
0x204d   : > { %4976 = vmatmul.mubr.msk.bf16.vlgmr.msra.gmra.mxu1 %vm947_vm5, %v3803_v0 }
0x204e   : > { %4989 = vmatprep.mubr.msk.bf16.mxu1 %vm5158_vm1, %v5157_v1 }
0x210d   : > { %v3842_v5 = vpop.f32.mrf.mxu1 }
0x210f   : > { %v4977_v6 = vpop.f32.mrf.mxu1 }
0x2111   : > { %v3845_v7 = vpop.f32.mrf.mxu1 }
0x2112   : > { %v3851_v8 = vpack.c.bf16 %v3845_v7, %v3842_v5 }
0x2113   : > { %v4978_v10 = vpop.f32.mrf.mxu1 }
0x2114   : > { %4982 = vmatmul.mubr.msk.bf16.vlgmr.msra.gmra.mxu0 %vm895_vm4, %v3851_v8 }
0x2115   : > { %4997 = vmatprep.mubr.msk.bf16.mxu0 %vm5158_vm1, %v5157_v1  ;;  %4994 = vmatpush3.bf16.msra.mxu0 %v5065_v48 }
0x2116   : > { %4995 = vmatprep.subr.bf16.mxu0 %v5157_v1 }
0x2119   : > { %4996 = vmatpush3.bf16.msra.mxu0 %v5066_v51 }
0x21d4   : > { %v3892_v11 = vpop.f32.mrf.mxu0 }
0x21d5   : > { %v3899_v9 = vadd.f32 %v3892_v11, %v5943_v22 }
0x21d6   : > { %v4983_v16 = vpop.f32.mrf.mxu0 }
0x21d7   : > { %v3909_v17 = vadd.f32 %v4464_v12, %v3899_v9 }
0x21d8   : > { %v3895_v19 = vpop.f32.mrf.mxu0 }
0x21d9   : > { %v3900_v20 = vadd.f32 %v3895_v19, %v5947_v24  ;;  %v3911_v13 = vadd.f32 %v3909_v17, %v5678_v49 }
0x21da   : > { %v4984_v14 = vpop.f32.mrf.mxu0 }
0x21db   : > { %v3910_v21 = vadd.f32 %v4464_v12, %v3900_v20  ;;  %v3917_v27 = vsel %vm720_vm3, %v3911_v13, 0.0 }
0x21dc   : > { %3918 = vadd.xlane.f32.xlu0 %v3917_v27 }
0x21dd   : > { %v3912_v15 = vadd.f32 %v3910_v21, %v5680_v25  ;;  %v5063_v25 = vld [vmem:[%s6049_s16 + $0x18] sm:$0xff]  }
0x21de   : > { %4986 = vmatpush3.bf16.msra.mxu1 %v5063_v25 }
0x21df   : > { %v3920_v31 = vsel %vm720_vm3, %v3912_v15, 0.0  ;;  %4987 = vmatprep.subr.bf16.mxu1 %v5157_v1  ;;  %v4483_v1 = vld [vmem:[%s6052_s19 + $0x1] ss:$0 sm:$0xff] }
0x21e0   : > { %3921 = vadd.xlane.f32.xlu1 %v3920_v31 }
0x21e2   : > { %4988 = vmatpush3.bf16.msra.mxu1 %v5064_v32 }
0x2265   : > { %v3919_v47 = vpop.xlane.xlu0 %3918 }
0x2266   : > { %v3923_v23 = vmul.f32 0.03125, %v3919_v47 }
0x2268   : > { %v3925_v22 = vsub.f32 %v3911_v13, %v3923_v23 }
0x2269   : > { %v3922_v34 = vpop.xlane.xlu1 %3921 }
0x226a   : > { %v3924_v26 = vmul.f32 0.03125, %v3922_v34  ;;  %v3927_v28 = vmul.f32 %v3925_v22, %v3925_v22 }
0x226c   : > { %v3926_v29 = vsub.f32 %v3912_v15, %v3924_v26  ;;  %v3929_v24 = vsel %vm720_vm3, %v3927_v28, 0.0  ;;  %v4489_v28 = vld [vmem:[%s6047_s14 + $0x1] ss:$0 sm:$0xff] }
0x226d   : > { %3930 = vadd.xlane.f32.xlu0 %v3929_v24  ;;  %v4490_v24 = vld [vmem:[%s6048_s15 + $0x1] ss:$0 sm:$0xff] }
0x226e   : > { %v3928_v49 = vmul.f32 %v3926_v29, %v3926_v29 }
0x2270   : > { %v3932_v30 = vsel %vm720_vm3, %v3928_v49, 0.0 }
0x2271   : > { %3933 = vadd.xlane.f32.xlu1 %v3932_v30 }
0x22f6   : > { %v3931_v41 = vpop.xlane.xlu0 %3930 }
0x22f7   : > { %v3935_v60 = vmul.f32 0.03125, %v3931_v41 }
0x22f9   : > { %v3937_v33 = vadd.f32 1e-05, %v3935_v60 }
0x22fa   : > { %v3934_v35 = vpop.xlane.xlu1 %3933 }
0x22fb   : > { %5139 = vrsqrt.f32 %v3937_v33  ;;  %v3936_v55 = vmul.f32 0.03125, %v3934_v35 }
0x22fd   : > { %v3938_v62 = vadd.f32 1e-05, %v3936_v55 }
0x22ff   : > { %5141 = vrsqrt.f32 %v3938_v62 }
0x2308   : > { %v5140_v36 = vpop.eup %5139 }
0x2309   : > { %v3941_v37 = vmul.f32 %v5140_v36, %v3925_v22 }
0x230b   : > { %v3949_v50 = vmul.f32 %v4467_v38, %v3941_v37 }
0x230c   : > { %v5142_v39 = vpop.eup %5141 }
0x230d   : > { %v3942_v40 = vmul.f32 %v5142_v39, %v3926_v29  ;;  %v3957_v44 = vadd.f32 %v4468_v42, %v3949_v50 }
0x230f   : > { %v3950_v43 = vmul.f32 %v4467_v38, %v3942_v40 }
0x2311   : > { %v3958_v45 = vadd.f32 %v4468_v42, %v3950_v43 }
0x2313   : > { %v3964_v46 = vpack.c.bf16 %v3958_v45, %v3957_v44 }
0x2315   : > { %4990 = vmatmul.mubr.msk.bf16.vlgmr.msra.gmra.mxu1 %vm720_vm3, %v3964_v46 }
0x23d5   : > { %v4022_v2 = vpop.f32.mrf.mxu1 }
0x23d6   : > { %v4023_v54 = vadd.f32 %v4474_v52, %v4022_v2 }
0x23d7   : > { %v4991_v53 = vpop.f32.mrf.mxu1 }
0x23d8   : > { %v4029_v58 = vmax.f32 %v4023_v54, 0.0 }
0x23d9   : > { %v4025_v56 = vpop.f32.mrf.mxu1 }
0x23da   : > { %v4026_v18 = vadd.f32 %v4474_v52, %v4025_v56 }
0x23db   : > { %v4992_v57 = vpop.f32.mrf.mxu1 }
0x23dc   : > { %v4030_v59 = vmax.f32 %v4026_v18, 0.0 }
0x23de   : > { %v4036_v61 = vpack.c.bf16 %v4030_v59, %v4029_v58 }
0x23e0   : > { %4998 = vmatmul.mubr.msk.bf16.vlgmr.msra.gmra.mxu0 %vm720_vm3, %v4036_v61 }
0x24a0   : > { %v4094_v63 = vpop.f32.mrf.mxu0 }
0x24a1   : > { %v4095_v0 = vadd.f32 %v4483_v1, %v4094_v63 }
0x24a2   : > { %v4999_v3 = vpop.f32.mrf.mxu0 }
0x24a3   : > { %v4101_v4 = vadd.f32 %v4095_v0, %v3957_v44 }
0x24a4   : > { %v4097_v5 = vpop.f32.mrf.mxu0 }
0x24a5   : > { %v4098_v6 = vadd.f32 %v4483_v1, %v4097_v5  ;;  %v4107_v7 = vsel %vm720_vm3, %v4101_v4, 0.0 }
0x24a6   : > { %4108 = vadd.xlane.f32.xlu0 %v4107_v7  ;;  %v5000_v8 = vpop.f32.mrf.mxu0 }
0x24a7   : > { %v4102_v10 = vadd.f32 %v4098_v6, %v3958_v45 }
0x24a9   : > { %v4110_v11 = vsel %vm720_vm3, %v4102_v10, 0.0 }
0x24aa   : > { %4111 = vadd.xlane.f32.xlu1 %v4110_v11 }
0x252f   : > { %v4109_v12 = vpop.xlane.xlu0 %4108 }
0x2530   : > { %v4113_v9 = vmul.f32 0.03125, %v4109_v12 }
0x2532   : > { %v4115_v16 = vsub.f32 %v4101_v4, %v4113_v9 }
0x2533   : > { %v4112_v17 = vpop.xlane.xlu1 %4111 }
0x2534   : > { %v4114_v19 = vmul.f32 0.03125, %v4112_v17  ;;  %v4117_v20 = vmul.f32 %v4115_v16, %v4115_v16 }
0x2536   : > { %v4116_v13 = vsub.f32 %v4102_v10, %v4114_v19  ;;  %v4119_v14 = vsel %vm720_vm3, %v4117_v20, 0.0 }
0x2537   : > { %4120 = vadd.xlane.f32.xlu0 %v4119_v14 }
0x2538   : > { %v4118_v21 = vmul.f32 %v4116_v13, %v4116_v13 }
0x253a   : > { %v4122_v27 = vsel %vm720_vm3, %v4118_v21, 0.0 }
0x253b   : > { %4123 = vadd.xlane.f32.xlu1 %v4122_v27 }
0x25c0   : > { %v4121_v15 = vpop.xlane.xlu0 %4120 }
0x25c1   : > { %v4125_v31 = vmul.f32 0.03125, %v4121_v15 }
0x25c3   : > { %v4127_v47 = vadd.f32 1e-05, %v4125_v31 }
0x25c4   : > { %v4124_v23 = vpop.xlane.xlu1 %4123 }
0x25c5   : > { %5143 = vrsqrt.f32 %v4127_v47  ;;  %v4126_v22 = vmul.f32 0.03125, %v4124_v23 }
0x25c7   : > { %v4128_v34 = vadd.f32 1e-05, %v4126_v22 }
0x25c9   : > { %5145 = vrsqrt.f32 %v4128_v34 }
0x25d2   : > { %v5144_v26 = vpop.eup %5143 }
0x25d3   : > { %v4131_v29 = vmul.f32 %v5144_v26, %v4115_v16 }
0x25d5   : > { %v4139_v49 = vmul.f32 %v4489_v28, %v4131_v29 }
0x25d6   : > { %v5146_v30 = vpop.eup %5145 }
0x25d7   : > { %v4147_v25 = vadd.f32 %v4490_v24, %v4139_v49  ;;  %v4132_v32 = vmul.f32 %v5146_v30, %v4116_v13 }
0x25d9   : > { %4149 = vst.msk [vmem:[%s631_s24] sm:$0xff] %vm720_vm3, %v4147_v25  ;;  %v4140_v41 = vmul.f32 %v4489_v28, %v4132_v32 }
0x25db   : > { %v4148_v60 = vadd.f32 %v4490_v24, %v4140_v41 }
0x25dd   : > { %4150 = vst.msk [vmem:[%s631_s24 + $0x8] sm:$0xff] %vm720_vm3, %v4148_v60 }
0x25de PF: > { %s30_s1 = sadd.s32 1, %s5155_s1  }
0x25df   : > { %p27_p4 = scmp.ge.s32.totalorder %s30_s1, 4  }
0x25e1   :  { %29 = sbr.rel (!%p27_p4) target bundleno = 6 (0x6), region = 188 }

</bundles_post_ra>
